<compile_context>
chip_gen: v6e
topology: v6e:2x2x1
jax: 0.10.0
libtpu: 0.0.40
codegen_flags: <defaults>
</compile_context>

<pallas_src>
import functools
import math

import jax
import jax.numpy as jnp
import numpy as np
from jax import lax
from jax.experimental import pallas as pl
from jax.experimental.pallas import tpu as pltpu

NEG_INF = -1e30


# --------------------------------------------------------------------------- helpers
def _compiler_params(sem):
    kw = dict(dimension_semantics=sem)
    try:  # size scoped VMEM against the actual chip (128 MiB v5e/v6e, 64 MiB v7x)
        cap = pltpu.get_tpu_info().vmem_capacity_bytes
        kw["vmem_limit_bytes"] = int(cap * 3 // 4)
    except Exception:
        pass
    return pltpu.CompilerParams(**kw)


def _rope_head_perm(n_heads, d_head):
    """Per-head column permutation: [x0,x1,x2,...] -> [x0,x2,...,x_{d-2},x1,x3,...]."""
    hd2 = d_head // 2
    j = np.arange(d_head)
    within = np.where(j < hd2, 2 * j, 2 * (j - hd2) + 1)
    return (np.arange(n_heads)[:, None] * d_head + within[None, :]).reshape(-1)


# -------------------------------------------------------- kernel 1: norm + QKV + RoPE
def _qkv_rope_kernel(n_heads, n_kv_heads, d_head, eps,
                     x_ref, cos_ref, sin_ref, wqkv_ref,
                     q_ref, k_ref, v_ref):
    hd2 = d_head // 2
    x = x_ref[...].astype(jnp.float32)
    var = jnp.mean(x * x, axis=-1, keepdims=True)
    xn = (x * lax.rsqrt(var + eps)).astype(jnp.bfloat16)   # RMS gain folded into wqkv
    qkv = jnp.dot(xn, wqkv_ref[...], preferred_element_type=jnp.float32)

    cos, sin = cos_ref[...], sin_ref[...]                   # sign already folded in sin
    for h in range(n_heads):                                # one roll per head
        qh = qkv[:, h * d_head:(h + 1) * d_head]            # 1/sqrt(d_head) folded in wq
        q_ref[h] = (qh * cos + pltpu.roll(qh, shift=hd2, axis=1) * sin).astype(jnp.bfloat16)
    off = n_heads * d_head
    for g in range(n_kv_heads):
        kh = qkv[:, off + g * d_head: off + (g + 1) * d_head]
        k_ref[g] = (kh * cos + pltpu.roll(kh, shift=hd2, axis=1) * sin).astype(jnp.bfloat16)
    off = (n_heads + n_kv_heads) * d_head
    for g in range(n_kv_heads):
        v_ref[g] = qkv[:, off + g * d_head: off + (g + 1) * d_head].astype(jnp.bfloat16)


# ----------------------------------------------- kernel 2: flash attention + Wo + res
def _flash_attn_kernel(n_heads, n_kv_heads, d_head, tq, tk,
                       q_ref, k_ref, v_ref, xres_ref, wo_ref,
                       o_ref, m_scr, l_scr, acc_scr, comb_scr):
    reps = n_heads // n_kv_heads
    qi = pl.program_id(0)
    ki = pl.program_id(1)
    nk = pl.num_programs(1)

    @pl.when(ki == 0)
    def _init():
        m_scr[...] = jnp.full_like(m_scr, NEG_INF)
        l_scr[...] = jnp.zeros_like(l_scr)
        acc_scr[...] = jnp.zeros_like(acc_scr)

    # Causal block skip: this KV block contributes iff its first column is visible
    # to the last row of the Q tile.
    @pl.when(ki * tk <= qi * tq + tq - 1)
    def _compute():
        # In-kernel causal mask (no [seq, seq] mask DMA).  Rows of the stacked
        # [reps*tq, tk] score block are laid out as (rep, row-within-tile).
        rows = qi * tq + (lax.broadcasted_iota(jnp.int32, (reps * tq, tk), 0) % tq)
        cols = ki * tk + lax.broadcasted_iota(jnp.int32, (reps * tq, tk), 1)
        visible = cols <= rows
        for g in range(n_kv_heads):                       # GQA: batch reps q heads / group
            qg = q_ref[pl.ds(g * reps, reps)].reshape(reps * tq, d_head)   # bf16
            kg = k_ref[g]                                  # [tk, d_head] bf16
            s = lax.dot_general(qg, kg, (((1,), (1,)), ((), ())),
                                preferred_element_type=jnp.float32)
            s = jnp.where(visible, s, NEG_INF)
            m_prev = m_scr[g]
            m_new = jnp.maximum(m_prev, jnp.max(s, axis=-1, keepdims=True))
            alpha = jnp.exp(m_prev - m_new)
            p = jnp.exp(s - m_new)
            l_scr[g] = alpha * l_scr[g] + jnp.sum(p, axis=-1, keepdims=True)
            acc_scr[g] = alpha * acc_scr[g] + jnp.dot(
                p.astype(jnp.bfloat16), v_ref[g], preferred_element_type=jnp.float32)
            m_scr[g] = m_new

    @pl.when(ki == nk - 1)
    def _finalize():
        # TODO(synk): at real head counts (32 heads), switch this and the compute loop
        # to lax.fori_loop with dynamic first-axis indexing to bound vreg live ranges.
        for g in range(n_kv_heads):
            og = acc_scr[g] / l_scr[g]                     # exact f32 normalization
            for r in range(reps):
                h = g * reps + r
                comb_scr[:, h * d_head:(h + 1) * d_head] = (
                    og[r * tq:(r + 1) * tq].astype(jnp.bfloat16))
        attn = jnp.dot(comb_scr[...], wo_ref[...], preferred_element_type=jnp.float32)
        o_ref[...] = (xres_ref[...].astype(jnp.float32) + attn).astype(o_ref.dtype)


# ---------------------------------------------------- kernel 3: SwiGLU FFN (streamed)
def _ffn_kernel(eps, tf,
                x_ref, wgu_ref, wdown_ref, o_ref, xn_scr, acc_scr):
    fi = pl.program_id(1)
    nf = pl.num_programs(1)

    @pl.when(fi == 0)
    def _init():
        x = x_ref[...].astype(jnp.float32)
        var = jnp.mean(x * x, axis=-1, keepdims=True)
        xn_scr[...] = (x * lax.rsqrt(var + eps)).astype(jnp.bfloat16)  # gain folded in wgu
        acc_scr[...] = x                                   # start from the residual

    gu = jnp.dot(xn_scr[...], wgu_ref[0], preferred_element_type=jnp.float32)
    gate, up = gu[:, :tf], gu[:, tf:]                      # fused gate/up projection
    hid = (jax.nn.silu(gate) * up).astype(jnp.bfloat16)
    acc_scr[...] += jnp.dot(hid, wdown_ref[...], preferred_element_type=jnp.float32)

    @pl.when(fi == nf - 1)
    def _done():
        o_ref[...] = acc_scr[...].astype(o_ref.dtype)


# ------------------------------------------------------------------------ wrapper
def llama_layer(x, r_cos, r_sin, mask, params, *, n_heads, n_kv_heads, d_head, eps,
                tq=128, tk=256, ts_ffn=512, tf=512):
    # The causal mask is generated in-kernel (and fully-masked KV blocks skipped), so
    # the [seq, seq] mask input is not read — this matches the demo/decoder usage.
    # TODO(synk): arbitrary (non-causal) mask patterns would need the tiled mask input back.
    del mask
    seq, d_model = x.shape
    d_ffn = params["w_gate"].shape[0]
    reps = n_heads // n_kv_heads
    assert n_heads % n_kv_heads == 0 and d_head % 2 == 0

    tq, tk, ts_ffn = min(tq, seq), min(tk, seq), min(ts_ffn, seq)
    # If the whole fused FFN weight set is small, use a single d_ffn tile so the FFN
    # weights are DMA'd exactly once (constant block index across all grid steps).
    if 3 * d_model * d_ffn * 2 <= 8 * 1024 * 1024:
        tf = d_ffn
    tf = min(tf, d_ffn)
    assert seq % tq == 0 and seq % tk == 0 and seq % ts_ffn == 0 and d_ffn % tf == 0
    assert tq % 8 == 0 and (tk % 128 == 0 or tk == seq)

    bf16, f32 = jnp.bfloat16, jnp.float32
    scale = 1.0 / math.sqrt(d_head)

    # RoPE half-rotation layout: permute wq/wk output features per head; fold the
    # even/odd sign into sin, the 1/sqrt(d_head) scale into wq, and the RMSNorm gains
    # into the projection weights (all one-time constant-weight folds).
    perm_q = _rope_head_perm(n_heads, d_head)
    perm_k = _rope_head_perm(n_kv_heads, d_head)
    n1 = params["attn_norm_w"].astype(f32)
    n2 = params["ffn_norm_w"].astype(f32)

    wq = params["wq"][perm_q, :].T * scale                  # [d_model, n_heads*d_head]
    wk = params["wk"][perm_k, :].T
    wv = params["wv"].T
    wqkv = (jnp.concatenate([wq, wk, wv], axis=1) * n1[:, None]).astype(bf16)

    cos_p = jnp.concatenate([r_cos[:, 0::2], r_cos[:, 1::2]], axis=-1).astype(f32)
    sin_p = jnp.concatenate([-r_sin[:, 0::2], r_sin[:, 1::2]], axis=-1).astype(f32)

    wo = params["wo"].T.astype(bf16)                        # [n_heads*d_head, d_model]

    n_ft = d_ffn // tf
    wg = (params["w_gate"].T * n2[:, None]).reshape(d_model, n_ft, tf).transpose(1, 0, 2)
    wi = (params["w_input"].T * n2[:, None]).reshape(d_model, n_ft, tf).transpose(1, 0, 2)
    wgu = jnp.concatenate([wg, wi], axis=-1).astype(bf16)   # [n_ft, d_model, 2*tf]
    wdown = params["w_output"].T.astype(bf16)               # [d_ffn, d_model]

    n_sq, n_kt, n_sf = seq // tq, seq // tk, seq // ts_ffn

    # ---- kernel 1: RMSNorm + QKV + RoPE (head-split bf16 outputs) ----
    q_rot, k_rot, v_sp = pl.pallas_call(
        functools.partial(_qkv_rope_kernel, n_heads, n_kv_heads, d_head, eps),
        grid=(n_sq,),
        in_specs=[
            pl.BlockSpec((tq, d_model), lambda i: (i, 0)),
            pl.BlockSpec((tq, d_head), lambda i: (i, 0)),
            pl.BlockSpec((tq, d_head), lambda i: (i, 0)),
            pl.BlockSpec((d_model, (n_heads + 2 * n_kv_heads) * d_head), lambda i: (0, 0)),
        ],
        out_specs=[
            pl.BlockSpec((n_heads, tq, d_head), lambda i: (0, i, 0)),
            pl.BlockSpec((n_kv_heads, tq, d_head), lambda i: (0, i, 0)),
            pl.BlockSpec((n_kv_heads, tq, d_head), lambda i: (0, i, 0)),
        ],
        out_shape=[
            jax.ShapeDtypeStruct((n_heads, seq, d_head), bf16),
            jax.ShapeDtypeStruct((n_kv_heads, seq, d_head), bf16),
            jax.ShapeDtypeStruct((n_kv_heads, seq, d_head), bf16),
        ],
        compiler_params=_compiler_params(("parallel",)),
    )(x, cos_p, sin_p, wqkv)

    # Clamp the KV block index to the last causally-visible block for this q tile so
    # skipped blocks do not re-DMA K/V (the block index repeats -> copy elided).
    def kv_index(qi, ki):
        last_visible = (qi * tq + tq - 1) // tk
        return (0, jnp.minimum(ki, last_visible), 0)

    # ---- kernel 2: causal flash attention (online softmax) + Wo + residual ----
    x_attn = pl.pallas_call(
        functools.partial(_flash_attn_kernel, n_heads, n_kv_heads, d_head, tq, tk),
        grid=(n_sq, n_kt),
        in_specs=[
            pl.BlockSpec((n_heads, tq, d_head), lambda qi, ki: (0, qi, 0)),
            pl.BlockSpec((n_kv_heads, tk, d_head), kv_index),
            pl.BlockSpec((n_kv_heads, tk, d_head), kv_index),
            pl.BlockSpec((tq, d_model), lambda qi, ki: (qi, 0)),
            pl.BlockSpec((n_heads * d_head, d_model), lambda qi, ki: (0, 0)),
        ],
        out_specs=pl.BlockSpec((tq, d_model), lambda qi, ki: (qi, 0)),
        out_shape=jax.ShapeDtypeStruct((seq, d_model), x.dtype),
        scratch_shapes=[
            pltpu.VMEM((n_kv_heads, reps * tq, 1), f32),      # running max
            pltpu.VMEM((n_kv_heads, reps * tq, 1), f32),      # running denom
            pltpu.VMEM((n_kv_heads, reps * tq, d_head), f32), # output accumulator
            pltpu.VMEM((tq, n_heads * d_head), bf16),         # combined heads
        ],
        compiler_params=_compiler_params(("parallel", "arbitrary")),
    )(q_rot, k_rot, v_sp, x, wo)

    # ---- kernel 3: SwiGLU FFN (streamed d_ffn tiles, fused gate/up) + residual ----
    out = pl.pallas_call(
        functools.partial(_ffn_kernel, eps, tf),
        grid=(n_sf, n_ft),
        in_specs=[
            pl.BlockSpec((ts_ffn, d_model), lambda si, fi: (si, 0)),
            pl.BlockSpec((1, d_model, 2 * tf), lambda si, fi: (fi, 0, 0)),
            pl.BlockSpec((tf, d_model), lambda si, fi: (fi, 0)),
        ],
        out_specs=pl.BlockSpec((ts_ffn, d_model), lambda si, fi: (si, 0)),
        out_shape=jax.ShapeDtypeStruct((seq, d_model), x.dtype),
        scratch_shapes=[
            pltpu.VMEM((ts_ffn, d_model), bf16),              # cached normalized x
            pltpu.VMEM((ts_ffn, d_model), f32),               # residual + down-proj acc
        ],
        compiler_params=_compiler_params(("parallel", "arbitrary")),
    )(x_attn, wgu, wdown)
    return out


# ---------------- pure-JAX reference (mirrors the PyTorch module, f32) ----------------
def ref_layer(x, r_cos, r_sin, mask, params, *, n_heads, n_kv_heads, d_head, eps):
    def norm(y, w):
        return y * lax.rsqrt(jnp.mean(y * y, -1, keepdims=True) + eps) * w

    def rope_swap(y):
        s = y.shape
        yr = y.reshape(-1, 2)[:, ::-1].reshape(s)
        sign = jnp.where(jnp.arange(s[-1]) % 2 == 0, -1.0, 1.0)
        return yr * sign

    def rotate(y):
        return y * r_cos + rope_swap(y) * r_sin

    residual = x
    xn = norm(x, params["attn_norm_w"])
    q = (xn @ params["wq"].T).reshape(-1, n_heads, d_head).transpose(1, 0, 2)
    k = (xn @ params["wk"].T).reshape(-1, n_kv_heads, d_head).transpose(1, 0, 2)
    v = (xn @ params["wv"].T).reshape(-1, n_kv_heads, d_head).transpose(1, 0, 2)
    reps = n_heads // n_kv_heads
    k = jnp.repeat(k, reps, axis=0)
    v = jnp.repeat(v, reps, axis=0)
    q = rotate(q)
    k = rotate(k)
    scores = q @ k.transpose(0, 2, 1) / math.sqrt(d_head) + mask
    a = jax.nn.softmax(scores, axis=-1) @ v
    a = a.transpose(1, 0, 2).reshape(-1, n_heads * d_head)
    x = residual + a @ params["wo"].T
    residual = x
    xn = norm(x, params["ffn_norm_w"])
    f = jax.nn.silu(xn @ params["w_gate"].T) * (xn @ params["w_input"].T)
    return residual + f @ params["w_output"].T


if __name__ == "__main__":
    # Small but grid-exercising shapes (module requires n_heads * d_head == d_model).
    seq, d_model, d_head = 256, 512, 128
    n_heads, n_kv_heads, d_ffn = 4, 2, 1024
    eps = 1e-5
    rope_theta = 500000.0

    key = jax.random.PRNGKey(0)
    keys = jax.random.split(key, 8)
    params = {
        "attn_norm_w": jnp.ones((d_model,), jnp.float32),
        "ffn_norm_w": jnp.ones((d_model,), jnp.float32),
        "wq": 0.05 * jax.random.normal(keys[0], (n_heads * d_head, d_model), jnp.float32),
        "wk": 0.05 * jax.random.normal(keys[1], (n_kv_heads * d_head, d_model), jnp.float32),
        "wv": 0.05 * jax.random.normal(keys[2], (n_kv_heads * d_head, d_model), jnp.float32),
        "wo": 0.05 * jax.random.normal(keys[3], (d_model, n_heads * d_head), jnp.float32),
        "w_gate": 0.05 * jax.random.normal(keys[4], (d_ffn, d_model), jnp.float32),
        "w_input": 0.05 * jax.random.normal(keys[5], (d_ffn, d_model), jnp.float32),
        "w_output": 0.05 * jax.random.normal(keys[6], (d_model, d_ffn), jnp.float32),
    }
    x = jax.random.normal(keys[7], (seq, d_model), jnp.float32)

    # interleaved-pair RoPE tables, shape [seq, d_head]
    inv_freq = 1.0 / (rope_theta ** (jnp.arange(0, d_head, 2, dtype=jnp.float32) / d_head))
    freqs = jnp.outer(jnp.arange(seq, dtype=jnp.float32), inv_freq)
    emb = jnp.repeat(freqs, 2, axis=-1)
    r_cos, r_sin = jnp.cos(emb), jnp.sin(emb)

    # causal mask (module-level input; the kernel regenerates it in-kernel)
    mask = jnp.where(jnp.tril(jnp.ones((seq, seq), bool)), 0.0, -1e9).astype(jnp.float32)

    out = llama_layer(x, r_cos, r_sin, mask, params,
                      n_heads=n_heads, n_kv_heads=n_kv_heads, d_head=d_head, eps=eps)
    out = jax.block_until_ready(out)

    ref = ref_layer(x, r_cos, r_sin, mask, params,
                    n_heads=n_heads, n_kv_heads=n_kv_heads, d_head=d_head, eps=eps)
    err = float(jnp.max(jnp.abs(out - ref)))
    rel = float(jnp.linalg.norm(out - ref) / jnp.linalg.norm(ref))
    assert out.shape == (seq, d_model)
    # bf16 MXU operands vs f32 reference: contractions of 512/1024 give ~1e-2-scale
    # absolute deviations on O(1) outputs.
    assert jnp.allclose(out, ref, rtol=2e-2, atol=6e-2) and rel < 2e-2, (err, rel)
    print("KERNEL_OK")
</pallas_src>

<mosaic_0001>
module attributes {stable_mosaic.version = 11 : i64} {
  func.func @_qkv_rope_kernel(%arg0: i32, %arg1: memref<128x512xf32, #tpu.memory_space<vmem>>, %arg2: memref<128x128xf32, #tpu.memory_space<vmem>>, %arg3: memref<128x128xf32, #tpu.memory_space<vmem>>, %arg4: memref<512x1024xbf16, #tpu.memory_space<vmem>>, %arg5: memref<4x128x128xbf16, #tpu.memory_space<vmem>>, %arg6: memref<2x128x128xbf16, #tpu.memory_space<vmem>>, %arg7: memref<2x128x128xbf16, #tpu.memory_space<vmem>>) attributes {dimension_semantics = [#tpu.dimension_semantics<parallel>], iteration_bounds = array<i64: 2>, scalar_prefetch = 0 : i64, scratch_operands = 0 : i64, tpu.core_type = #tpu.core_type<tc>, window_params = [{transform_indices = @transform_0, window_bounds = array<i64: 128, 512>}, {transform_indices = @transform_1, window_bounds = array<i64: 128, 128>}, {transform_indices = @transform_2, window_bounds = array<i64: 128, 128>}, {pipeline_mode = #tpu.pipeline_mode<synchronous>, transform_indices = @transform_3, window_bounds = array<i64: 512, 1024>}, {transform_indices = @transform_4, window_bounds = array<i64: 4, 128, 128>}, {transform_indices = @transform_5, window_bounds = array<i64: 2, 128, 128>}, {transform_indices = @transform_6, window_bounds = array<i64: 2, 128, 128>}]} {
    %c0 = arith.constant 0 : index
    %c0_0 = arith.constant 0 : index
    %0 = vector.load %arg1[%c0, %c0_0] : memref<128x512xf32, #tpu.memory_space<vmem>>, vector<128x512xf32>
    %1 = arith.mulf %0, %0 : vector<128x512xf32>
    %cst = arith.constant dense<0.000000e+00> : vector<128xf32>
    %2 = vector.multi_reduction <add>, %1, %cst [1] : vector<128x512xf32> to vector<128xf32>
    %3 = vector.shape_cast %2 : vector<128xf32> to vector<128x1xf32>
    %cst_1 = arith.constant 5.120000e+02 : f32
    %4 = vector.broadcast %cst_1 : f32 to vector<128x1xf32>
    %5 = arith.divf %3, %4 : vector<128x1xf32>
    %cst_2 = arith.constant 9.99999974E-6 : f32
    %6 = vector.broadcast %cst_2 : f32 to vector<128x1xf32>
    %7 = arith.addf %5, %6 : vector<128x1xf32>
    %8 = math.rsqrt %7 : vector<128x1xf32>
    %9 = vector.broadcast %8 : vector<128x1xf32> to vector<128x512xf32>
    %10 = arith.mulf %0, %9 : vector<128x512xf32>
    %11 = arith.truncf %10 : vector<128x512xf32> to vector<128x512xbf16>
    %c0_3 = arith.constant 0 : index
    %c0_4 = arith.constant 0 : index
    %12 = vector.load %arg4[%c0_3, %c0_4] : memref<512x1024xbf16, #tpu.memory_space<vmem>>, vector<512x1024xbf16>
    %cst_5 = arith.constant dense<0.000000e+00> : vector<128x1024xf32>
    %13 = tpu.matmul %11, %12, %cst_5 {dimension_numbers = #tpu.dot_dimension_numbers<[1], [0], [0], [1], [0, 0, 1, 1], [], []>} : vector<128x512xbf16>, vector<512x1024xbf16>, vector<128x1024xf32> -> vector<128x1024xf32>
    %c0_6 = arith.constant 0 : index
    %c0_7 = arith.constant 0 : index
    %14 = vector.load %arg2[%c0_6, %c0_7] : memref<128x128xf32, #tpu.memory_space<vmem>>, vector<128x128xf32>
    %c0_8 = arith.constant 0 : index
    %c0_9 = arith.constant 0 : index
    %15 = vector.load %arg3[%c0_8, %c0_9] : memref<128x128xf32, #tpu.memory_space<vmem>>, vector<128x128xf32>
    %16 = vector.extract_strided_slice %13 {offsets = [0, 0], sizes = [128, 128], strides = [1, 1]} : vector<128x1024xf32> to vector<128x128xf32>
    %17 = arith.mulf %16, %14 : vector<128x128xf32>
    %c64_i32 = arith.constant 64 : i32
    %18 = tpu.dynamic_rotate %16 by %c64_i32 dim 1 : vector<128x128xf32>, i32 -> vector<128x128xf32>
    %19 = arith.mulf %18, %15 : vector<128x128xf32>
    %20 = arith.addf %17, %19 : vector<128x128xf32>
    %21 = arith.truncf %20 : vector<128x128xf32> to vector<128x128xbf16>
    %c0_10 = arith.constant 0 : index
    %c0_11 = arith.constant 0 : index
    %c0_12 = arith.constant 0 : index
    %22 = vector.load %arg5[%c0_10, %c0_11, %c0_12] : memref<4x128x128xbf16, #tpu.memory_space<vmem>>, vector<1x128x128xbf16>
    %23 = vector.shape_cast %22 : vector<1x128x128xbf16> to vector<128x128xbf16>
    %24 = vector.shape_cast %21 : vector<128x128xbf16> to vector<1x128x128xbf16>
    tpu.vector_store %arg5[%c0_10, %c0_11, %c0_12], %24 {strides = array<i32>} : memref<4x128x128xbf16, #tpu.memory_space<vmem>>, vector<1x128x128xbf16>,
    %25 = vector.extract_strided_slice %13 {offsets = [0, 128], sizes = [128, 128], strides = [1, 1]} : vector<128x1024xf32> to vector<128x128xf32>
    %26 = arith.mulf %25, %14 : vector<128x128xf32>
    %c64_i32_13 = arith.constant 64 : i32
    %27 = tpu.dynamic_rotate %25 by %c64_i32_13 dim 1 : vector<128x128xf32>, i32 -> vector<128x128xf32>
    %28 = arith.mulf %27, %15 : vector<128x128xf32>
    %29 = arith.addf %26, %28 : vector<128x128xf32>
    %30 = arith.truncf %29 : vector<128x128xf32> to vector<128x128xbf16>
    %c1 = arith.constant 1 : index
    %c0_14 = arith.constant 0 : index
    %c0_15 = arith.constant 0 : index
    %31 = vector.load %arg5[%c1, %c0_14, %c0_15] : memref<4x128x128xbf16, #tpu.memory_space<vmem>>, vector<1x128x128xbf16>
    %32 = vector.shape_cast %31 : vector<1x128x128xbf16> to vector<128x128xbf16>
    %33 = vector.shape_cast %30 : vector<128x128xbf16> to vector<1x128x128xbf16>
    tpu.vector_store %arg5[%c1, %c0_14, %c0_15], %33 {strides = array<i32>} : memref<4x128x128xbf16, #tpu.memory_space<vmem>>, vector<1x128x128xbf16>,
    %34 = vector.extract_strided_slice %13 {offsets = [0, 256], sizes = [128, 128], strides = [1, 1]} : vector<128x1024xf32> to vector<128x128xf32>
    %35 = arith.mulf %34, %14 : vector<128x128xf32>
    %c64_i32_16 = arith.constant 64 : i32
    %36 = tpu.dynamic_rotate %34 by %c64_i32_16 dim 1 : vector<128x128xf32>, i32 -> vector<128x128xf32>
    %37 = arith.mulf %36, %15 : vector<128x128xf32>
    %38 = arith.addf %35, %37 : vector<128x128xf32>
    %39 = arith.truncf %38 : vector<128x128xf32> to vector<128x128xbf16>
    %c2 = arith.constant 2 : index
    %c0_17 = arith.constant 0 : index
    %c0_18 = arith.constant 0 : index
    %40 = vector.load %arg5[%c2, %c0_17, %c0_18] : memref<4x128x128xbf16, #tpu.memory_space<vmem>>, vector<1x128x128xbf16>
    %41 = vector.shape_cast %40 : vector<1x128x128xbf16> to vector<128x128xbf16>
    %42 = vector.shape_cast %39 : vector<128x128xbf16> to vector<1x128x128xbf16>
    tpu.vector_store %arg5[%c2, %c0_17, %c0_18], %42 {strides = array<i32>} : memref<4x128x128xbf16, #tpu.memory_space<vmem>>, vector<1x128x128xbf16>,
    %43 = vector.extract_strided_slice %13 {offsets = [0, 384], sizes = [128, 128], strides = [1, 1]} : vector<128x1024xf32> to vector<128x128xf32>
    %44 = arith.mulf %43, %14 : vector<128x128xf32>
    %c64_i32_19 = arith.constant 64 : i32
    %45 = tpu.dynamic_rotate %43 by %c64_i32_19 dim 1 : vector<128x128xf32>, i32 -> vector<128x128xf32>
    %46 = arith.mulf %45, %15 : vector<128x128xf32>
    %47 = arith.addf %44, %46 : vector<128x128xf32>
    %48 = arith.truncf %47 : vector<128x128xf32> to vector<128x128xbf16>
    %c3 = arith.constant 3 : index
    %c0_20 = arith.constant 0 : index
    %c0_21 = arith.constant 0 : index
    %49 = vector.load %arg5[%c3, %c0_20, %c0_21] : memref<4x128x128xbf16, #tpu.memory_space<vmem>>, vector<1x128x128xbf16>
    %50 = vector.shape_cast %49 : vector<1x128x128xbf16> to vector<128x128xbf16>
    %51 = vector.shape_cast %48 : vector<128x128xbf16> to vector<1x128x128xbf16>
    tpu.vector_store %arg5[%c3, %c0_20, %c0_21], %51 {strides = array<i32>} : memref<4x128x128xbf16, #tpu.memory_space<vmem>>, vector<1x128x128xbf16>,
    %52 = vector.extract_strided_slice %13 {offsets = [0, 512], sizes = [128, 128], strides = [1, 1]} : vector<128x1024xf32> to vector<128x128xf32>
    %53 = arith.mulf %52, %14 : vector<128x128xf32>
    %c64_i32_22 = arith.constant 64 : i32
    %54 = tpu.dynamic_rotate %52 by %c64_i32_22 dim 1 : vector<128x128xf32>, i32 -> vector<128x128xf32>
    %55 = arith.mulf %54, %15 : vector<128x128xf32>
    %56 = arith.addf %53, %55 : vector<128x128xf32>
    %57 = arith.truncf %56 : vector<128x128xf32> to vector<128x128xbf16>
    %c0_23 = arith.constant 0 : index
    %c0_24 = arith.constant 0 : index
    %c0_25 = arith.constant 0 : index
    %58 = vector.load %arg6[%c0_23, %c0_24, %c0_25] : memref<2x128x128xbf16, #tpu.memory_space<vmem>>, vector<1x128x128xbf16>
    %59 = vector.shape_cast %58 : vector<1x128x128xbf16> to vector<128x128xbf16>
    %60 = vector.shape_cast %57 : vector<128x128xbf16> to vector<1x128x128xbf16>
    tpu.vector_store %arg6[%c0_23, %c0_24, %c0_25], %60 {strides = array<i32>} : memref<2x128x128xbf16, #tpu.memory_space<vmem>>, vector<1x128x128xbf16>,
    %61 = vector.extract_strided_slice %13 {offsets = [0, 640], sizes = [128, 128], strides = [1, 1]} : vector<128x1024xf32> to vector<128x128xf32>
    %62 = arith.mulf %61, %14 : vector<128x128xf32>
    %c64_i32_26 = arith.constant 64 : i32
    %63 = tpu.dynamic_rotate %61 by %c64_i32_26 dim 1 : vector<128x128xf32>, i32 -> vector<128x128xf32>
    %64 = arith.mulf %63, %15 : vector<128x128xf32>
    %65 = arith.addf %62, %64 : vector<128x128xf32>
    %66 = arith.truncf %65 : vector<128x128xf32> to vector<128x128xbf16>
    %c1_27 = arith.constant 1 : index
    %c0_28 = arith.constant 0 : index
    %c0_29 = arith.constant 0 : index
    %67 = vector.load %arg6[%c1_27, %c0_28, %c0_29] : memref<2x128x128xbf16, #tpu.memory_space<vmem>>, vector<1x128x128xbf16>
    %68 = vector.shape_cast %67 : vector<1x128x128xbf16> to vector<128x128xbf16>
    %69 = vector.shape_cast %66 : vector<128x128xbf16> to vector<1x128x128xbf16>
    tpu.vector_store %arg6[%c1_27, %c0_28, %c0_29], %69 {strides = array<i32>} : memref<2x128x128xbf16, #tpu.memory_space<vmem>>, vector<1x128x128xbf16>,
    %70 = vector.extract_strided_slice %13 {offsets = [0, 768], sizes = [128, 128], strides = [1, 1]} : vector<128x1024xf32> to vector<128x128xf32>
    %71 = arith.truncf %70 : vector<128x128xf32> to vector<128x128xbf16>
    %c0_30 = arith.constant 0 : index
    %c0_31 = arith.constant 0 : index
    %c0_32 = arith.constant 0 : index
    %72 = vector.load %arg7[%c0_30, %c0_31, %c0_32] : memref<2x128x128xbf16, #tpu.memory_space<vmem>>, vector<1x128x128xbf16>
    %73 = vector.shape_cast %72 : vector<1x128x128xbf16> to vector<128x128xbf16>
    %74 = vector.shape_cast %71 : vector<128x128xbf16> to vector<1x128x128xbf16>
    tpu.vector_store %arg7[%c0_30, %c0_31, %c0_32], %74 {strides = array<i32>} : memref<2x128x128xbf16, #tpu.memory_space<vmem>>, vector<1x128x128xbf16>,
    %75 = vector.extract_strided_slice %13 {offsets = [0, 896], sizes = [128, 128], strides = [1, 1]} : vector<128x1024xf32> to vector<128x128xf32>
    %76 = arith.truncf %75 : vector<128x128xf32> to vector<128x128xbf16>
    %c1_33 = arith.constant 1 : index
    %c0_34 = arith.constant 0 : index
    %c0_35 = arith.constant 0 : index
    %77 = vector.load %arg7[%c1_33, %c0_34, %c0_35] : memref<2x128x128xbf16, #tpu.memory_space<vmem>>, vector<1x128x128xbf16>
    %78 = vector.shape_cast %77 : vector<1x128x128xbf16> to vector<128x128xbf16>
    %79 = vector.shape_cast %76 : vector<128x128xbf16> to vector<1x128x128xbf16>
    tpu.vector_store %arg7[%c1_33, %c0_34, %c0_35], %79 {strides = array<i32>} : memref<2x128x128xbf16, #tpu.memory_space<vmem>>, vector<1x128x128xbf16>,
    return
  }
  func.func @transform_0(%arg0: i32) -> (i32, i32) {
    %c0_i32 = arith.constant 0 : i32
    %c0_i32_0 = arith.constant 0 : i32
    return %arg0, %c0_i32 : i32, i32
  }
  func.func @transform_1(%arg0: i32) -> (i32, i32) {
    %c0_i32 = arith.constant 0 : i32
    %c0_i32_0 = arith.constant 0 : i32
    return %arg0, %c0_i32 : i32, i32
  }
  func.func @transform_2(%arg0: i32) -> (i32, i32) {
    %c0_i32 = arith.constant 0 : i32
    %c0_i32_0 = arith.constant 0 : i32
    return %arg0, %c0_i32 : i32, i32
  }
  func.func @transform_3(%arg0: i32) -> (i32, i32) {
    %c0_i32 = arith.constant 0 : i32
    %c0_i32_0 = arith.constant 0 : i32
    %c0_i32_1 = arith.constant 0 : i32
    return %c0_i32, %c0_i32_0 : i32, i32
  }
  func.func @transform_4(%arg0: i32) -> (i32, i32, i32) {
    %c0_i32 = arith.constant 0 : i32
    %c0_i32_0 = arith.constant 0 : i32
    %c0_i32_1 = arith.constant 0 : i32
    return %c0_i32, %arg0, %c0_i32_0 : i32, i32, i32
  }
  func.func @transform_5(%arg0: i32) -> (i32, i32, i32) {
    %c0_i32 = arith.constant 0 : i32
    %c0_i32_0 = arith.constant 0 : i32
    %c0_i32_1 = arith.constant 0 : i32
    return %c0_i32, %arg0, %c0_i32_0 : i32, i32, i32
  }
  func.func @transform_6(%arg0: i32) -> (i32, i32, i32) {
    %c0_i32 = arith.constant 0 : i32
    %c0_i32_0 = arith.constant 0 : i32
    %c0_i32_1 = arith.constant 0 : i32
    return %c0_i32, %arg0, %c0_i32_0 : i32, i32, i32
  }
}

</mosaic_0001>

<bundles_post_ra>
// kernel: tpu_custom_call.1
= control target key start
LH: loop header
LB: loop body
LE: loop exit
PB: predicated region body
PF: predicated region fallthrough
CT: control target
= control target key end

     0   :  { %s7861_s0 = inlined_call_operand.hbm [shape: f32[256,512], index: 0, kind: input, shape index: {}]   ;;  %s7862_s1 = inlined_call_operand.hbm [shape: f32[256,128], index: 1, kind: input, shape index: {}]   ;;  %s7863_s2 = inlined_call_operand.hbm [shape: f32[256,128], index: 2, kind: input, shape index: {}]   ;;  %s7864_s3 = inlined_call_operand.hbm [shape: bf16[512,1024], index: 3, kind: input, shape index: {}]   ;;  %s7865_s4 = inlined_call_operand.hbm [shape: bf16[4,256,128], index: 4, kind: output, shape index: {0}]   ;;  %s7866_s5 = inlined_call_operand.hbm [shape: bf16[2,256,128], index: 5, kind: output, shape index: {1}]   ;;  %s7867_s6 = inlined_call_operand.hbm [shape: bf16[2,256,128], index: 6, kind: output, shape index: {2}]  }
   0x1   :  { %7940 = sst [smem:[#allocation80_spill]] %s7862_s1 }
   0x2   :  { %7941 = sst [smem:[#allocation81_spill]] %s7867_s6 }
   0x3   :  { %12 = vsyncpa [#allocation3], 0 }
   0x4   :  { %14 = vsyncpa [#allocation3 + $0x1], 0 }
   0x5   :  { %15 = vsyncpa [#allocation6], 0 }
   0x6   :  { %17 = vsyncpa [#allocation6 + $0x1], 0 }
   0x7   :  { %18 = vsyncpa [#allocation9], 0 }
   0x8   :  { %19 = vsyncpa [#allocation4], 0 }
   0x9   :  { %21 = vsyncpa [#allocation4 + $0x1], 0 }
   0xa   :  { %22 = vsyncpa [#allocation12], 0 }
   0xb   :  { %24 = vsyncpa [#allocation12 + $0x1], 0  ;;  %s6101_s21 = smov 0   ;;  %s6103_s22 = smov 0  }
   0xc   :  { %s6105_s23 = smov 0   ;;  %s6107_s24 = smov 0  }
   0xd LB: > { %7942 = sst [smem:[#allocation25_spill]] %s6022_s21  ;;  %s6122_s25 = sadd.s32 1, %s6034_s24   ;;  %s6034_s24 = sphi %s6107_s24, %s8085_s24   ;;  %s6030_s23 = sphi %s6105_s23, %s8087_s23   ;;  %s6026_s22 = sphi %s6103_s22, %s8089_s22   ;;  %s6022_s21 = sphi %s6101_s21, %s8088_s21  }
   0xe   : > { %7943 = sst [smem:[#allocation26_spill]] %s6030_s23  ;;  %s37_s26 = sadd.s32 1, %s6030_s23 }
   0xf   : > { %7944 = sst [smem:[#allocation27_spill]] %s6034_s24  ;;  %s34_s27 = ssub.s32 %s6034_s24, %s6122_s25 }
  0x10   : > { %7945 = sst [smem:[#allocation28_spill]] %s6122_s25  ;;  %p7868_p0 = scmp.ne.s32.totalorder %s6030_s23, %s6026_s22 }
  0x11   : > { %p35_p1 = scmp.eq.s32.totalorder %s34_s27, 0  ;;  %p45_p2 = scmp.eq.s32.totalorder %s6034_s24, 0 }
  0x12   : > { %p5721_p4 = scmp.lt.s32.totalorder %s6034_s24, 2  ;;  %s6139_s29 = sand.u32 1, %s6030_s23  }
  0x13   : > { %s6133_s28 = scalar_select %p35_p1, %s6030_s23, %s37_s26  }
  0x14   : > { %p46_p5 = por %p45_p2, %p7868_p0  ;;  %s260_s30 = sand.u32 1, %s6034_s24  }
  0x15   : > { %7946 = sst [smem:[#allocation29_spill]] %s6133_s28  ;;  %s4657_s7 = sshll.u32 %s6139_s29, 7 }
  0x16   : > { %p6143_p6 = pnand %p5721_p4, %p46_p5  ;;  %s5148_s9 = sshll.u32 %s6034_s24, 11 }
  0x17   : > { %s7948_s1 = sld [smem:[#allocation80_spill]]  ;;  %s264_s13 = scalar_lea.vmem [#allocation5], %s4657_s7 }
  0x18   : > { %s271_s14 = sshll.u32 %s264_s13, 4  ;;  %s6159_s15 = scalar_lea.sflag [#allocation6], %s260_s30  ;;  %s6157_s14 = int_to_ptr.vmem [resolvable:$true] %s271_s14 }
  0x19   : > { %p6165_p8 = pneg %p6143_p6 }
  0x1d   : > { %s6153_s12 = scalar_lea.hbm %s7948_s1, %s5148_s9  ;;  %s5879_s20 = scalar_lea.hbm %s7948_s1, 4096 }
  0x1e   : > { %s5874_s16 = scalar_lea.hbm %s6153_s12, 2048  ;;  %p5880_p11 = scmp.lt.s32.totalorder %s6153_s12, %s7948_s1 }
  0x1f   : > { %p5875_p7 = scmp.ne.s32.totalorder %s6153_s12, %s5874_s16  ;;  %p5881_p12 = scmp.lt.s32.totalorder %s5879_s20, %s5874_s16 }
  0x21   : > { %p5877_p9 = pnand %p6165_p8, %p5875_p7  ;;  %p5882_p13 = por %p5881_p12, %p5880_p11 }
  0x23   : > { %p5878_p10 = pneg %p5877_p9 }
  0x25   : > { %p5883_p1 = pnand %p5882_p13, %p5878_p10 }
  0x27   : > { %5886 = shalt.err (!%p5883_p1)
}
  0x28   : > { %s5887_s30 = scalar_lea.vmem %s6157_s14, 2048  ;;  %s6036_s10 = smov [#allocation5]  }
  0x29   : > { %p5888_p2 = scmp.ne.s32.totalorder %s6157_s14, %s5887_s30  ;;  %s5892_s11 = sshll.u32 %s6036_s10, 4  ;;  %s5893_s11 = int_to_ptr.vmem [resolvable:$false] %s5892_s11 }
  0x2a   : > { %s5894_s13 = scalar_lea.vmem %s5893_s11, 4096  ;;  %p5895_p7 = scmp.lt.s32.totalorder %s6157_s14, %s5893_s11 }
  0x2b   : > { %p5890_p4 = pnand %p5888_p2, %p6165_p8  ;;  %p5896_p9 = scmp.lt.s32.totalorder %s5894_s13, %s5887_s30 }
  0x2d   : > { %p5891_p5 = pneg %p5890_p4  ;;  %p5897_p3 = por %p5896_p9, %p5895_p7 }
  0x2f   : > { %p5898_p0 = pnand %p5897_p3, %p5891_p5 }
  0x31   : > { %5901 = shalt.err (!%p5898_p0)
}
  0x32   : > { %s7870_s16 = smov 128   ;;  %s7871_s18 = smov 8  }
  0x33   : > { %5706 = dma.hbm_to_vmem [thread:$0]  (!%p6143_p6), %s6153_s12, 2048, %s6157_s14, %s6159_s15, %s7870_s16, %s7870_s16, %s7871_s18  }
  0x34   : > { %s6196_s26 = scalar_lea.hbm %s7863_s2, %s5148_s9  ;;  %s285_s27 = scalar_lea.vmem [#allocation7], %s4657_s7 }
  0x35   : > { %s292_s30 = sshll.u32 %s285_s27, 4  ;;  %s6203_s10 = sadd.s32 4294967295, %s6034_s24   ;;  %s6200_s30 = int_to_ptr.vmem [resolvable:$true] %s292_s30 }
  0x36   : > { %s7869_s11 = sadd.s32 4294967294, %s6034_s24   ;;  %p50_p0 = scmp.ne.s32.totalorder %s6026_s22, %s6022_s21 }
  0x37   : > { %p7873_p3 = scmp.eq.s32.totalorder %s6203_s10, 0  ;;  %p147_p10 = scmp.eq.s32.totalorder %s6203_s10, 1 }
  0x38   : > { %p153_p11 = scmp.eq.s32.totalorder %s7869_s11, 1  ;;  %p4650_p13 = scmp.ge.s32.totalorder %s6034_s24, 1 }
  0x39   : > { %p6214_p12 = por %p7873_p3, %p50_p0  ;;  %p7951_p1 = scmp.ne.s32.totalorder %s6030_s23, %s6026_s22 }
  0x3a   : > { %p6226_p4 = por %p153_p11, %p50_p0  ;;  %p212_p5 = scmp.lt.s32.totalorder %s6034_s24, 3 }
  0x3b   : > { %s7950_s7 = scalar_select %p6214_p12, 1, 0 }
  0x3c   : > { %p6222_p2 = por %p147_p10, %p7951_p1  ;;  %p6231_p7 = pnand %p4650_p13, %p212_p5 }
  0x3d   : > { %s7953_s12 = scalar_select %p6226_p4, 1, 0 }
  0x3e   : > { %s7952_s9 = scalar_select %p6222_p2, 1, 0 }
  0x3f   : > { %7954 = sst [smem:[#allocation30_spill]] %s7953_s12  ;;  %s6039_s13 = smov [#allocation8]  }
  0x40   : > { %s7955_s14 = scalar_select %p6231_p7, 1, 0 }
  0x41   : > { %s224_s19 = sshll.u32 %s6039_s13, 4  ;;  %p5696_p9 = pneg %p6231_p7  ;;  %s225_s19 = int_to_ptr.vmem [resolvable:$true] %s224_s19 }
  0x42   : > { %s4653_s20 = sshll.u32 %s6139_s29, 9  ;;  %s5147_s27 = sshll.u32 %s6034_s24, 13 }
  0x43   : > { %p6241_p10 = pnand %p5696_p9, %p7873_p3  ;;  %s6248_s1 = scalar_lea.hbm %s7861_s0, %s5147_s27 }
  0x44   : > { %s242_s28 = scalar_lea.vmem [#allocation2], %s4653_s20  ;;  %s5913_s13 = scalar_lea.vmem %s225_s19, 32768 }
  0x45   : > { %s250_s23 = sshll.u32 %s242_s28, 4  ;;  %p5904_p0 = pneg %p6241_p10  ;;  %s6250_s23 = int_to_ptr.vmem [resolvable:$true] %s250_s23 }
  0x46   : > { %p5914_p11 = scmp.ne.s32.totalorder %s225_s19, %s5913_s13  ;;  %p5921_p5 = scmp.lt.s32.totalorder %s225_s19, %s225_s19 }
  0x47   : > { %p5922_p9 = scmp.lt.s32.totalorder %s5913_s13, %s5913_s13 }
  0x48   : > { %p5916_p13 = pnand %p5914_p11, %p5904_p0 }
  0x49   : > { %p5923_p3 = por %p5922_p9, %p5921_p5 }
  0x4a   : > { %p5917_p1 = pneg %p5916_p13 }
  0x4c   : > { %p5924_p4 = pnand %p5923_p3, %p5917_p1 }
  0x4e   : > { %5927 = shalt.err (!%p5924_p4)
}
  0x4f   : > { %s6040_s25 = smov 512   ;;  %s6041_s28 = smov 32  }
  0x50   : > { %5699 = dma.hbm_to_vmem [thread:$0]  (!%p6241_p10), %s7864_s3, 32768, %s225_s19, [#allocation9], %s6040_s25, %s6040_s25, %s6041_s28  }
  0x51   : > { %s239_s20 = scalar_lea.sflag [#allocation3], %s6139_s29  ;;  %s5928_s27 = scalar_lea.hbm %s6248_s1, 8192 }
  0x52   : > { %p5929_p3 = scmp.ne.s32.totalorder %s6248_s1, %s5928_s27  ;;  %s5933_s12 = scalar_lea.hbm %s7861_s0, 16384 }
  0x53   : > { %p5934_p11 = scmp.lt.s32.totalorder %s6248_s1, %s7861_s0  ;;  %p5935_p13 = scmp.lt.s32.totalorder %s5933_s12, %s5928_s27 }
  0x54   : > { %p5931_p4 = pnand %p5929_p3, %p6165_p8 }
  0x55   : > { %p5936_p1 = por %p5935_p13, %p5934_p11 }
  0x56   : > { %p5932_p0 = pneg %p5931_p4 }
  0x58   : > { %p5937_p5 = pnand %p5936_p1, %p5932_p0 }
  0x5a   : > { %5940 = shalt.err (!%p5937_p5)
}
  0x5b   : > { %s5941_s29 = scalar_lea.vmem %s6250_s23, 8192  ;;  %s6042_s11 = smov [#allocation2]  }
  0x5c   : > { %p5942_p10 = scmp.ne.s32.totalorder %s6250_s23, %s5941_s29  ;;  %s5946_s24 = sshll.u32 %s6042_s11, 4  ;;  %s5947_s24 = int_to_ptr.vmem [resolvable:$false] %s5946_s24 }
  0x5d   : > { %s5948_s19 = scalar_lea.vmem %s5947_s24, 16384  ;;  %p5949_p4 = scmp.lt.s32.totalorder %s6250_s23, %s5947_s24 }
  0x5e   : > { %p5944_p9 = pnand %p5942_p10, %p6165_p8  ;;  %p5950_p2 = scmp.lt.s32.totalorder %s5948_s19, %s5941_s29 }
  0x60   : > { %p5945_p3 = pneg %p5944_p9  ;;  %p5951_p12 = por %p5950_p2, %p5949_p4 }
  0x62   : > { %p5952_p7 = pnand %p5951_p12, %p5945_p3 }
  0x64   : > { %5955 = shalt.err (!%p5952_p7)
}
  0x65   : > { %5703 = dma.hbm_to_vmem [thread:$0]  (!%p6143_p6), %s6248_s1, 8192, %s6250_s23, %s239_s20, %s6040_s25, %s6040_s25, %s6041_s28  }
  0x66   : > { %s5956_s6 = scalar_lea.hbm %s6196_s26, 2048  ;;  %s5961_s16 = scalar_lea.hbm %s7863_s2, 4096 }
  0x67   : > { %p5957_p0 = scmp.ne.s32.totalorder %s6196_s26, %s5956_s6  ;;  %p5962_p12 = scmp.lt.s32.totalorder %s6196_s26, %s7863_s2 }
  0x68   : > { %p5963_p2 = scmp.lt.s32.totalorder %s5961_s16, %s5956_s6 }
  0x69   : > { %p5959_p11 = pnand %p5957_p0, %p6165_p8 }
  0x6a   : > { %p5964_p7 = por %p5963_p2, %p5962_p12 }
  0x6b   : > { %p5960_p13 = pneg %p5959_p11 }
  0x6d   : > { %p5965_p1 = pnand %p5964_p7, %p5960_p13 }
  0x6f   : > { %5968 = shalt.err (!%p5965_p1)
}
  0x70   : > { %s5969_s1 = scalar_lea.vmem %s6200_s30, 2048  ;;  %s6043_s23 = smov [#allocation7]  }
  0x71   : > { %p5970_p5 = scmp.ne.s32.totalorder %s6200_s30, %s5969_s1  ;;  %s5974_s25 = sshll.u32 %s6043_s23, 4  ;;  %s5975_s25 = int_to_ptr.vmem [resolvable:$false] %s5974_s25 }
  0x72   : > { %s5976_s28 = scalar_lea.vmem %s5975_s25, 4096  ;;  %p5977_p3 = scmp.lt.s32.totalorder %s6200_s30, %s5975_s25 }
  0x73   : > { %p5972_p10 = pnand %p5970_p5, %p6165_p8  ;;  %p5978_p4 = scmp.lt.s32.totalorder %s5976_s28, %s5969_s1 }
  0x75   : > { %p5973_p9 = pneg %p5972_p10  ;;  %p5979_p0 = por %p5978_p4, %p5977_p3 }
  0x77   : > { %p5980_p11 = pnand %p5979_p0, %p5973_p9 }
  0x79   : > { %5983 = shalt.err (!%p5980_p11)
}
  0x7a   : > { %s7957_s20 = smov 8   ;;  %s7958_s13 = smov 128  }
  0x7b   : > { %5709 = dma.hbm_to_vmem [thread:$0]  (!%p6143_p6), %s6196_s26, 2048, %s6200_s30, %s6159_s15, %s7958_s13, %s7958_s13, %s7957_s20  }
  0x7c   : > { %p7959_p8 = scmp.ne.s32.totalorder %s7955_s14, 0 }
  0x7e   : > { %304 = sbr.rel (%p7959_p8) target bundleno = 858 (0x35a), region = 36 }
  0x83   : > { %s6313_s17 = sand.u32 1, %s6026_s22   ;;  %p7960_p13 = scmp.ne.s32.totalorder %s7950_s7, 0 }
  0x84   : > { %s4664_s29 = sshll.u32 %s6313_s17, 9  ;;  %s307_s11 = scalar_lea.sflag [#allocation3], %s6313_s17 }
  0x85   : > { %s6317_s24 = scalar_lea.vmem [#allocation2], %s4664_s29 }
  0x86   : > { %6001 = dma.done.wait (%p7960_p13), %s307_s11, 8192  }
  0x87   : > { %6003 = vsyncadd (%p7960_p13), %s307_s11, 4294959104  ;;  %s315_s8 = sand.u32 1, %s6203_s10   ;;  %s6325_s15 = sshll.u32 %s6313_s17, 7 }
  0x88   : > { %s316_s26 = scalar_lea.sflag [#allocation6], %s315_s8  ;;  %s6330_s30 = scalar_lea.vmem [#allocation5], %s6325_s15 }
  0x89   : > { %6005 = dma.done.wait (%p7960_p13), %s316_s26, 4096  }
  0x8a   : > { %6007 = vsyncadd (%p7960_p13), %s316_s26, 4294963200  ;;  %s6337_s14 = scalar_lea.vmem [#allocation7], %s6325_s15  ;;  %p7961_p6 = scmp.eq.s32.totalorder %s6203_s10, 0 }
  0x8c   : > { %6009 = dma.done.wait (%p7961_p6), [#allocation9], 32768   ;;  %p7962_p12 = pmov %p7961_p6 }
  0x8d   : > { %v6344_v0 = vld [vmem:[%s6317_s24] sm:$0xff]  ;;  %v6347_v1 = vld [vmem:[%s6317_s24 + $0x8] sm:$0xff]  ;;  %v6350_v2 = vld [vmem:[%s6317_s24 + $0x10] sm:$0xff]  ;;  %s6044_s7 = smov 64   ;;  %s4668_s19 = sshll.u32 %s6313_s17, 8 }
  0x8e   : > { %6011 = vsyncadd (%p7962_p12), [#allocation9], 4294934528  ;;  %v6353_v3 = vld [vmem:[%s6317_s24 + $0x18] sm:$0xff]  ;;  %v451_v4 = vmul.f32 %v6344_v0, %v6344_v0  ;;  %v452_v5 = vmul.f32 %v6347_v1, %v6347_v1  ;;  %v453_v6 = vmul.f32 %v6350_v2, %v6350_v2  ;;  %v6362_v7 = vld [vmem:[%s6317_s24 + $0x20] sm:$0xff]  ;;  %s7228_s6 = scalar_lea.vmem [#allocation10], %s4668_s19  ;;  %s7581_s21 = scalar_lea.vmem [#allocation13], %s6325_s15 }
  0x8f   : > { %v6365_v8 = vld [vmem:[%s6317_s24 + $0x28] sm:$0xff]  ;;  %v6368_v9 = vld [vmem:[%s6317_s24 + $0x30] sm:$0xff]  ;;  %v6371_v10 = vld [vmem:[%s6317_s24 + $0x38] sm:$0xff]  ;;  %v455_v11 = vmul.f32 %v6362_v7, %v6362_v7  ;;  %v454_v14 = vmul.f32 %v6353_v3, %v6353_v3  ;;  %s7693_s12 = scalar_lea.vmem [#allocation11], %s6325_s15  ;;  %s4338_s16 = scalar_lea.sflag [#allocation4], %s6313_s17 }
  0x90   : > { %v456_v12 = vmul.f32 %v6365_v8, %v6365_v8  ;;  %v6378_v13 = vld [vmem:[%s6317_s24 + $0x40] sm:$0xff]  ;;  %v515_v15 = vadd.f32 %v452_v5, %v451_v4  ;;  %v457_v16 = vmul.f32 %v6368_v9, %v6368_v9  ;;  %v6385_v17 = vld [vmem:[%s6317_s24 + $0x48] sm:$0xff]  ;;  %v6388_v18 = vld [vmem:[%s6317_s24 + $0x50] sm:$0xff]  ;;  %v458_v21 = vmul.f32 %v6371_v10, %v6371_v10  ;;  %s7777_s18 = scalar_lea.sflag [#allocation12], %s315_s8 }
  0x91   : > { %v6391_v19 = vld [vmem:[%s6317_s24 + $0x58] sm:$0xff]  ;;  %v459_v20 = vmul.f32 %v6378_v13, %v6378_v13  ;;  %v460_v23 = vmul.f32 %v6385_v17, %v6385_v17  ;;  %v461_v24 = vmul.f32 %v6388_v18, %v6388_v18  ;;  %v6402_v25 = vld [vmem:[%s6317_s24 + $0x60] sm:$0xff]  ;;  %v6405_v26 = vld [vmem:[%s6317_s24 + $0x68] sm:$0xff] }
  0x92   : > { %v520_v22 = vadd.f32 %v456_v12, %v455_v11  ;;  %v6408_v27 = vld [vmem:[%s6317_s24 + $0x70] sm:$0xff]  ;;  %v516_v28 = vadd.f32 %v515_v15, %v453_v6  ;;  %v6411_v29 = vld [vmem:[%s6317_s24 + $0x78] sm:$0xff]  ;;  %v463_v30 = vmul.f32 %v6402_v25, %v6402_v25  ;;  %v464_v31 = vmul.f32 %v6405_v26, %v6405_v26  ;;  %v6420_v33 = vld [vmem:[%s6317_s24 + $0xa0] sm:$0xff] }
  0x93   : > { %v465_v32 = vmul.f32 %v6408_v27, %v6408_v27  ;;  %v6423_v34 = vld [vmem:[%s6317_s24 + $0xa8] sm:$0xff]  ;;  %v462_v36 = vmul.f32 %v6391_v19, %v6391_v19  ;;  %v525_v37 = vadd.f32 %v460_v23, %v459_v20  ;;  %v6428_v38 = vld [vmem:[%s6317_s24 + $0xb0] sm:$0xff]  ;;  %v6431_v39 = vld [vmem:[%s6317_s24 + $0xb8] sm:$0xff]  ;;  %v471_v40 = vmul.f32 %v6420_v33, %v6420_v33 }
  0x94   : > { %v521_v35 = vadd.f32 %v520_v22, %v457_v16  ;;  %v6436_v41 = vld [vmem:[%s6317_s24 + $0x80] sm:$0xff]  ;;  %v517_v42 = vadd.f32 %v516_v28, %v454_v14  ;;  %v530_v43 = vadd.f32 %v464_v31, %v463_v30  ;;  %v472_v44 = vmul.f32 %v6423_v34, %v6423_v34  ;;  %v6443_v46 = vld [vmem:[%s6317_s24 + $0x88] sm:$0xff]  ;;  %v6446_v47 = vld [vmem:[%s6317_s24 + $0x90] sm:$0xff] }
  0x95   : > { %v473_v45 = vmul.f32 %v6428_v38, %v6428_v38  ;;  %v6449_v48 = vld [vmem:[%s6317_s24 + $0x98] sm:$0xff]  ;;  %v526_v50 = vadd.f32 %v525_v37, %v461_v24  ;;  %v466_v51 = vmul.f32 %v6411_v29, %v6411_v29  ;;  %v467_v52 = vmul.f32 %v6436_v41, %v6436_v41  ;;  %v415_v53 = vld [vmem:[%s6317_s24 + $0xe0] sm:$0xff]  ;;  %v6457_v54 = vld [vmem:[%s6317_s24 + $0xe8] sm:$0xff] }
  0x96   : > { %v522_v49 = vadd.f32 %v521_v35, %v458_v21  ;;  %7963 = vst [vmem:[#allocation31_spill] sm:$0xff] %v6457_v54  ;;  %v417_v55 = vld [vmem:[%s6317_s24 + $0xf0] sm:$0xff]  ;;  %518 = vadd.xlane.f32.xlu0 %v517_v42  ;;  %v531_v56 = vadd.f32 %v530_v43, %v465_v32  ;;  %v540_v57 = vadd.f32 %v472_v44, %v471_v40  ;;  %v6465_v60 = vld [vmem:[%s6317_s24 + $0xc0] sm:$0xff]  ;;  %v6468_v61 = vld [vmem:[%s6317_s24 + $0xc8] sm:$0xff] }
  0x97   : > { %v468_v58 = vmul.f32 %v6443_v46, %v6443_v46  ;;  %v469_v59 = vmul.f32 %v6446_v47, %v6446_v47  ;;  %7964 = vst [vmem:[#allocation32_spill] sm:$0xff] %v6465_v60  ;;  %v527_v62 = vadd.f32 %v526_v50, %v462_v36  ;;  %v474_v63 = vmul.f32 %v6431_v39, %v6431_v39  ;;  %v6473_v4 = vld [vmem:[%s6317_s24 + $0xf8] sm:$0xff]  ;;  %v6478_v11 = vld [vmem:[%s6317_s24 + $0xd0] sm:$0xff]  ;;  %v423_v21 = vld [vmem:[%s6317_s24 + $0x120] sm:$0xff] }
  0x98   : > { %7965 = vst [vmem:[#allocation33_spill] sm:$0xff] %v6473_v4  ;;  %v479_v5 = vmul.f32 %v415_v53, %v415_v53  ;;  %v480_v6 = vmul.f32 %v6457_v54, %v6457_v54  ;;  %7966 = vst [vmem:[#allocation34_spill] sm:$0xff] %v6478_v11  ;;  %v541_v12 = vadd.f32 %v540_v57, %v473_v45  ;;  %v6483_v20 = vld [vmem:[%s6317_s24 + $0xd8] sm:$0xff]  ;;  %v424_v22 = vld [vmem:[%s6317_s24 + $0x128] sm:$0xff] }
  0x99   : > { %v470_v14 = vmul.f32 %v6449_v48, %v6449_v48  ;;  %v535_v15 = vadd.f32 %v468_v58, %v467_v52  ;;  %v481_v16 = vmul.f32 %v417_v55, %v417_v55  ;;  %7967 = vst [vmem:[#allocation35_spill] sm:$0xff] %v6483_v20  ;;  %528 = vadd.xlane.f32.xlu1 %v527_v62  ;;  %v419_v31 = vld [vmem:[%s6317_s24 + $0x100] sm:$0xff]  ;;  %v425_v37 = vld [vmem:[%s6317_s24 + $0x130] sm:$0xff]  ;;  %v6498_v40 = vld [vmem:[%s6317_s24 + $0x138] sm:$0xff] }
  0x9a   : > { %v532_v23 = vadd.f32 %v531_v56, %v466_v51  ;;  %v550_v24 = vadd.f32 %v480_v6, %v479_v5  ;;  %v475_v28 = vmul.f32 %v6465_v60, %v6465_v60  ;;  %v476_v30 = vmul.f32 %v6468_v61, %v6468_v61  ;;  %523 = vadd.xlane.f32.xlu0 %v522_v49  ;;  %v6501_v42 = vld [vmem:[%s6317_s24 + $0x108] sm:$0xff]  ;;  %v421_v50 = vld [vmem:[%s6317_s24 + $0x110] sm:$0xff]  ;;  %v431_v51 = vld [vmem:[%s6317_s24 + $0x160] sm:$0xff] }
  0x9b   : > { %v536_v32 = vadd.f32 %v535_v15, %v469_v59  ;;  %v482_v35 = vmul.f32 %v6473_v4, %v6473_v4  ;;  %v477_v36 = vmul.f32 %v6478_v11, %v6478_v11  ;;  %7968 = vst [vmem:[#allocation36_spill] sm:$0xff] %v6498_v40  ;;  %7969 = vst [vmem:[#allocation37_spill] sm:$0xff] %v6501_v42  ;;  %v432_v52 = vld [vmem:[%s6317_s24 + $0x168] sm:$0xff]  ;;  %v6509_v57 = vld [vmem:[%s6317_s24 + $0x118] sm:$0xff] }
  0x9c   : > { %v478_v43 = vmul.f32 %v6483_v20, %v6483_v20  ;;  %v545_v44 = vadd.f32 %v476_v30, %v475_v28  ;;  %v487_v45 = vmul.f32 %v423_v21, %v423_v21  ;;  %v488_v49 = vmul.f32 %v424_v22, %v424_v22  ;;  %7970 = vst [vmem:[#allocation38_spill] sm:$0xff] %v6509_v57  ;;  %v433_v59 = vld [vmem:[%s6317_s24 + $0x170] sm:$0xff]  ;;  %v427_v21 = vld [vmem:[%s6317_s24 + $0x140] sm:$0xff] }
  0x9d   : > { %v542_v53 = vadd.f32 %v541_v12, %v474_v63  ;;  %v537_v55 = vadd.f32 %v536_v32, %v470_v14  ;;  %v551_v56 = vadd.f32 %v550_v24, %v481_v16  ;;  %v483_v58 = vmul.f32 %v419_v31, %v419_v31  ;;  %533 = vadd.xlane.f32.xlu1 %v532_v23  ;;  %v428_v63 = vld [vmem:[%s6317_s24 + $0x148] sm:$0xff]  ;;  %v434_v16 = vld [vmem:[%s6317_s24 + $0x178] sm:$0xff]  ;;  %v429_v24 = vld [vmem:[%s6317_s24 + $0x150] sm:$0xff] }
  0x9e   : > { %v546_v62 = vadd.f32 %v545_v44, %v477_v36  ;;  %v489_v5 = vmul.f32 %v425_v37, %v425_v37  ;;  %v560_v6 = vadd.f32 %v488_v49, %v487_v45  ;;  %v484_v15 = vmul.f32 %v6501_v42, %v6501_v42  ;;  %v430_v36 = vld [vmem:[%s6317_s24 + $0x158] sm:$0xff]  ;;  %v439_v37 = vld [vmem:[%s6317_s24 + $0x1a0] sm:$0xff]  ;;  %v440_v44 = vld [vmem:[%s6317_s24 + $0x1a8] sm:$0xff] }
  0x9f   : > { %538 = vadd.xlane.f32.xlu0 %v537_v55  ;;  %v490_v12 = vmul.f32 %v6498_v40, %v6498_v40  ;;  %v485_v14 = vmul.f32 %v421_v50, %v421_v50  ;;  %v495_v22 = vmul.f32 %v431_v51, %v431_v51  ;;  %v496_v23 = vmul.f32 %v432_v52, %v432_v52  ;;  %v441_v51 = vld [vmem:[%s6317_s24 + $0x1b0] sm:$0xff]  ;;  %v435_v52 = vld [vmem:[%s6317_s24 + $0x180] sm:$0xff] }
  0xa0   : > { %v547_v28 = vadd.f32 %v546_v62, %v478_v43  ;;  %v486_v30 = vmul.f32 %v6509_v57, %v6509_v57  ;;  %v555_v31 = vadd.f32 %v484_v15, %v483_v58  ;;  %v497_v32 = vmul.f32 %v433_v59, %v433_v59  ;;  %v436_v59 = vld [vmem:[%s6317_s24 + $0x188] sm:$0xff]  ;;  %v445_v60 = vld [vmem:[%s6317_s24 + $0x1d0] sm:$0xff]  ;;  %v916_v54 = vld [vmem:[#allocation8 + $0x580] sm:$0xff] }
  0xa1   : > { %v552_v45 = vadd.f32 %v551_v56, %v482_v35  ;;  %v570_v49 = vadd.f32 %v496_v23, %v495_v22  ;;  %v491_v50 = vmul.f32 %v427_v21, %v427_v21  ;;  %v492_v55 = vmul.f32 %v428_v63, %v428_v63  ;;  %543 = vadd.xlane.f32.xlu1 %v542_v53  ;;  %v437_v63 = vld [vmem:[%s6317_s24 + $0x190] sm:$0xff]  ;;  %v447_v22 = vld [vmem:[%s6317_s24 + $0x1e0] sm:$0xff]  ;;  %v448_v23 = vld [vmem:[%s6317_s24 + $0x1e8] sm:$0xff] }
  0xa2   : > { %v561_v43 = vadd.f32 %v560_v6, %v489_v5  ;;  %v556_v62 = vadd.f32 %v555_v31, %v485_v14  ;;  %v498_v58 = vmul.f32 %v434_v16, %v434_v16  ;;  %v493_v15 = vmul.f32 %v429_v24, %v429_v24  ;;  %v442_v5 = vld [vmem:[%s6317_s24 + $0x1b8] sm:$0xff] }
  0xa3   : > { %548 = vadd.xlane.f32.xlu0 %v547_v28  ;;  %v494_v40 = vmul.f32 %v430_v36, %v430_v36  ;;  %v565_v35 = vadd.f32 %v492_v55, %v491_v50  ;;  %v503_v56 = vmul.f32 %v439_v37, %v439_v37  ;;  %v504_v21 = vmul.f32 %v440_v44, %v440_v44  ;;  %v438_v14 = vld [vmem:[%s6317_s24 + $0x198] sm:$0xff]  ;;  %v449_v36 = vld [vmem:[%s6317_s24 + $0x1f0] sm:$0xff]  ;;  %v443_v50 = vld [vmem:[%s6317_s24 + $0x1c0] sm:$0xff] }
  0xa4   : > { %v557_v57 = vadd.f32 %v556_v62, %v486_v30  ;;  %v571_v53 = vadd.f32 %v570_v49, %v497_v32  ;;  %v505_v6 = vmul.f32 %v441_v51, %v441_v51  ;;  %v499_v16 = vmul.f32 %v435_v52, %v435_v52  ;;  %v444_v55 = vld [vmem:[%s6317_s24 + $0x1c8] sm:$0xff]  ;;  %v446_v30 = vld [vmem:[%s6317_s24 + $0x1d8] sm:$0xff]  ;;  %v796_v32 = vld [vmem:[#allocation8 + $0x1c0] sm:$0xff] }
  0xa5   : > { %v566_v24 = vadd.f32 %v565_v35, %v493_v15  ;;  %v580_v28 = vadd.f32 %v504_v21, %v503_v56  ;;  %v500_v31 = vmul.f32 %v436_v59, %v436_v59  ;;  %553 = vadd.xlane.f32.xlu1 %v552_v45  ;;  %v562_v37 = vadd.f32 %v561_v43, %v490_v12  ;;  %v800_v52 = vld [vmem:[#allocation8 + $0x1e0] sm:$0xff] }
  0xa6   : > { %v501_v44 = vmul.f32 %v437_v63, %v437_v63  ;;  %v511_v42 = vmul.f32 %v447_v22, %v447_v22  ;;  %v512_v11 = vmul.f32 %v448_v23, %v448_v23  ;;  %v506_v62 = vmul.f32 %v442_v5, %v442_v5  ;;  %v924_v15 = vld [vmem:[#allocation8 + $0x5c0] sm:$0xff] }
  0xa7   : > { %558 = vadd.xlane.f32.xlu0 %v557_v57  ;;  %v567_v49 = vadd.f32 %v566_v24, %v494_v40  ;;  %v502_v51 = vmul.f32 %v438_v14, %v438_v14  ;;  %v575_v4 = vadd.f32 %v500_v31, %v499_v16  ;;  %v928_v59 = vld [vmem:[#allocation8 + $0x5e0] sm:$0xff]  ;;  %v572_v35 = vadd.f32 %v571_v53, %v498_v58  ;;  %v450_v40 = vld [vmem:[%s6317_s24 + $0x1f8] sm:$0xff] }
  0xa8   : > { %v581_v56 = vadd.f32 %v580_v28, %v505_v6  ;;  %v507_v21 = vmul.f32 %v443_v50, %v443_v50  ;;  %v508_v45 = vmul.f32 %v444_v55, %v444_v55  ;;  %v788_v12 = vld [vmem:[#allocation8 + $0x180] sm:$0xff]  ;;  %v513_v22 = vmul.f32 %v449_v36, %v449_v36 }
  0xa9   : > { %v792_v43 = vld [vmem:[#allocation8 + $0x1a0] sm:$0xff]  ;;  %v576_v63 = vadd.f32 %v575_v4, %v501_v44  ;;  %v590_v23 = vadd.f32 %v512_v11, %v511_v42  ;;  %v509_v20 = vmul.f32 %v445_v60, %v445_v60  ;;  %563 = vadd.xlane.f32.xlu1 %v562_v37  ;;  %v510_v5 = vmul.f32 %v446_v30, %v446_v30 }
  0xaa   : > { %v920_v57 = vld [vmem:[#allocation8 + $0x5a0] sm:$0xff]  ;;  %v585_v14 = vadd.f32 %v508_v45, %v507_v21  ;;  %v4728_v16 = vcombine.high %v796_v32, %v800_v52  ;;  %v4856_v24 = vcombine.high %v924_v15, %v928_v59  ;;  %v4727_v58 = vcombine.low %v796_v32, %v800_v52 }
  0xab   : > { %568 = vadd.xlane.f32.xlu0 %v567_v49  ;;  %v577_v31 = vadd.f32 %v576_v63, %v502_v51  ;;  %v4855_v53 = vcombine.low %v924_v15, %v928_v59  ;;  %v4720_v6 = vcombine.high %v788_v12, %v792_v43  ;;  %v780_v28 = vld [vmem:[#allocation8 + $0x140] sm:$0xff]  ;;  %v4848_v4 = vcombine.high %v916_v54, %v920_v57 }
  0xac   : > { %v784_v50 = vld [vmem:[#allocation8 + $0x160] sm:$0xff]  ;;  %v586_v55 = vadd.f32 %v585_v14, %v509_v20  ;;  %2276 = vmatprep.subr.bf16.mxu0 %v4728_v16  ;;  %2389 = vmatprep.subr.bf16.mxu1 %v4856_v24  ;;  %v514_v42 = vmul.f32 %v450_v40, %v450_v40  ;;  %v4719_v36 = vcombine.low %v788_v12, %v792_v43 }
  0xad   : > { %v908_v60 = vld [vmem:[#allocation8 + $0x540] sm:$0xff]  ;;  %2277 = vmatpush1.bf16.msra.mxu0 %v4727_v58  ;;  %2390 = vmatpush1.bf16.msra.mxu1 %v4855_v53  ;;  %v4847_v37 = vcombine.low %v916_v54, %v920_v57  ;;  %v582_v44 = vadd.f32 %v581_v56, %v506_v62  ;;  %v591_v30 = vadd.f32 %v590_v23, %v513_v22 }
  0xae   : > { %v912_v11 = vld [vmem:[#allocation8 + $0x560] sm:$0xff]  ;;  %573 = vadd.xlane.f32.xlu1 %v572_v35  ;;  %2278 = vmatprep.subr.bf16.mxu0 %v4720_v6  ;;  %v4712_v32 = vcombine.high %v780_v28, %v784_v50  ;;  %v587_v49 = vadd.f32 %v586_v55, %v510_v5  ;;  %v4711_v21 = vcombine.low %v780_v28, %v784_v50 }
  0xaf   : > { %578 = vadd.xlane.f32.xlu0 %v577_v31  ;;  %2391 = vmatprep.subr.bf16.mxu1 %v4848_v4  ;;  %v4840_v51 = vcombine.high %v908_v60, %v912_v11  ;;  %v772_v20 = vld [vmem:[#allocation8 + $0x100] sm:$0xff]  ;;  %v4839_v45 = vcombine.low %v908_v60, %v912_v11  ;;  %v592_v12 = vadd.f32 %v591_v30, %v514_v42  ;;  %v6539_v60 = vld [vmem:[#allocation8 + $0x1c8] sm:$0xff] }
  0xb0   : > { %v776_v52 = vld [vmem:[#allocation8 + $0x120] sm:$0xff]  ;;  %v6541_v11 = vld [vmem:[#allocation8 + $0x1e8] sm:$0xff] }
  0xb1   : > { %v900_v15 = vld [vmem:[#allocation8 + $0x500] sm:$0xff]  ;;  %2279 = vmatpush1.bf16.msra.mxu0 %v4719_v36  ;;  %2392 = vmatpush1.bf16.msra.mxu1 %v4847_v37  ;;  %v4704_v54 = vcombine.high %v772_v20, %v776_v52  ;;  %v4703_v22 = vcombine.low %v772_v20, %v776_v52  ;;  %v6543_v42 = vld [vmem:[#allocation8 + $0x5c8] sm:$0xff] }
  0xb2   : > { %v904_v59 = vld [vmem:[#allocation8 + $0x520] sm:$0xff]  ;;  %583 = vadd.xlane.f32.xlu1 %v582_v44  ;;  %2280 = vmatprep.subr.bf16.mxu0 %v4712_v32  ;;  %v6545_v36 = vld [vmem:[#allocation8 + $0x5e8] sm:$0xff] }
  0xb3   : > { %v764_v62 = vld [vmem:[#allocation8 + $0xc0] sm:$0xff]  ;;  %588 = vadd.xlane.f32.xlu0 %v587_v49  ;;  %2393 = vmatprep.subr.bf16.mxu1 %v4840_v51  ;;  %v4832_v35 = vcombine.high %v900_v15, %v904_v59  ;;  %v4831_v23 = vcombine.low %v900_v15, %v904_v59  ;;  %v4729_v51 = vcombine.low %v6539_v60, %v6541_v11 }
  0xb4   : > { %v768_v56 = vld [vmem:[#allocation8 + $0xe0] sm:$0xff]  ;;  %v4857_v59 = vcombine.low %v6543_v42, %v6545_v36 }
  0xb5   : > { %v892_v43 = vld [vmem:[#allocation8 + $0x4c0] sm:$0xff]  ;;  %2281 = vmatpush1.bf16.msra.mxu0 %v4711_v21  ;;  %2394 = vmatpush1.bf16.msra.mxu1 %v4839_v45  ;;  %v4696_v57 = vcombine.high %v764_v62, %v768_v56  ;;  %v4695_v31 = vcombine.low %v764_v62, %v768_v56 }
  0xb6   : > { %v896_v63 = vld [vmem:[#allocation8 + $0x4e0] sm:$0xff]  ;;  %593 = vadd.xlane.f32.xlu1 %v592_v12  ;;  %2282 = vmatprep.subr.bf16.mxu0 %v4704_v54 }
  0xb7   : > { %v4824_v40 = vcombine.high %v892_v43, %v896_v63  ;;  %v756_v5 = vld [vmem:[#allocation8 + $0x80] sm:$0xff]  ;;  %2395 = vmatprep.subr.bf16.mxu1 %v4832_v35  ;;  %v4823_v58 = vcombine.low %v892_v43, %v896_v63 }
  0xb8   : > { %v760_v14 = vld [vmem:[#allocation8 + $0xa0] sm:$0xff] }
  0xb9   : > { %v884_v16 = vld [vmem:[#allocation8 + $0x480] sm:$0xff]  ;;  %2283 = vmatpush1.bf16.msra.mxu0 %v4703_v22  ;;  %2396 = vmatpush1.bf16.msra.mxu1 %v4831_v23  ;;  %v4688_v53 = vcombine.high %v756_v5, %v760_v14  ;;  %v4687_v37 = vcombine.low %v756_v5, %v760_v14 }
  0xba   : > { %v888_v24 = vld [vmem:[#allocation8 + $0x4a0] sm:$0xff]  ;;  %2284 = vmatprep.subr.bf16.mxu0 %v4696_v57  ;;  %2397 = vmatprep.subr.bf16.mxu1 %v4824_v40 }
  0xbb   : > { %v4816_v6 = vcombine.high %v884_v16, %v888_v24  ;;  %v748_v28 = vld [vmem:[#allocation8 + $0x40] sm:$0xff]  ;;  %v4815_v44 = vcombine.low %v884_v16, %v888_v24 }
  0xbc   : > { %v752_v50 = vld [vmem:[#allocation8 + $0x60] sm:$0xff] }
  0xbd   : > { %v876_v55 = vld [vmem:[#allocation8 + $0x440] sm:$0xff]  ;;  %2285 = vmatpush1.bf16.msra.mxu0 %v4695_v31  ;;  %2398 = vmatpush1.bf16.msra.mxu1 %v4823_v58  ;;  %v4680_v30 = vcombine.high %v748_v28, %v752_v50  ;;  %v4679_v21 = vcombine.low %v748_v28, %v752_v50 }
  0xbe   : > { %v880_v4 = vld [vmem:[#allocation8 + $0x460] sm:$0xff]  ;;  %2286 = vmatprep.subr.bf16.mxu0 %v4688_v53  ;;  %2399 = vmatprep.subr.bf16.mxu1 %v4816_v6 }
  0xbf   : > { %v4808_v32 = vcombine.high %v876_v55, %v880_v4  ;;  %v740_v49 = vld [vmem:[#allocation8] sm:$0xff]  ;;  %v4807_v45 = vcombine.low %v876_v55, %v880_v4 }
  0xc0   : > { %v744_v20 = vld [vmem:[#allocation8 + $0x20] sm:$0xff] }
  0xc1   : > { %v868_v52 = vld [vmem:[#allocation8 + $0x400] sm:$0xff]  ;;  %2287 = vmatpush1.bf16.msra.mxu0 %v4687_v37  ;;  %2400 = vmatpush1.bf16.msra.mxu1 %v4815_v44  ;;  %v4672_v12 = vcombine.high %v740_v49, %v744_v20  ;;  %v4671_v63 = vcombine.low %v740_v49, %v744_v20 }
  0xc2   : > { %v872_v15 = vld [vmem:[#allocation8 + $0x420] sm:$0xff]  ;;  %2288 = vmatprep.subr.bf16.mxu0 %v4680_v30  ;;  %2401 = vmatprep.subr.bf16.mxu1 %v4808_v32 }
  0xc3   : > { %v4800_v54 = vcombine.high %v868_v52, %v872_v15  ;;  %v860_v62 = vld [vmem:[#allocation8 + $0x3c0] sm:$0xff]  ;;  %v4799_v22 = vcombine.low %v868_v52, %v872_v15 }
  0xc4   : > { %v864_v35 = vld [vmem:[#allocation8 + $0x3e0] sm:$0xff] }
  0xc5   : > { %v988_v56 = vld [vmem:[#allocation8 + $0x7c0] sm:$0xff]  ;;  %2289 = vmatpush1.bf16.msra.mxu0 %v4679_v21  ;;  %2402 = vmatpush1.bf16.msra.mxu1 %v4807_v45  ;;  %v4792_v23 = vcombine.high %v860_v62, %v864_v35  ;;  %v4791_v24 = vcombine.low %v860_v62, %v864_v35 }
  0xc6   : > { %v992_v43 = vld [vmem:[#allocation8 + $0x7e0] sm:$0xff]  ;;  %2290 = vmatprep.subr.bf16.mxu0 %v4672_v12  ;;  %2403 = vmatprep.subr.bf16.mxu1 %v4800_v54 }
  0xc7   : > { %v4920_v57 = vcombine.high %v988_v56, %v992_v43  ;;  %v852_v40 = vld [vmem:[#allocation8 + $0x380] sm:$0xff]  ;;  %v4919_v31 = vcombine.low %v988_v56, %v992_v43 }
  0xc8   : > { %v856_v5 = vld [vmem:[#allocation8 + $0x3a0] sm:$0xff] }
  0xc9   : > { %v980_v14 = vld [vmem:[#allocation8 + $0x780] sm:$0xff]  ;;  %2291 = vmatpush1.bf16.msra.mxu0 %v4671_v63  ;;  %2404 = vmatpush1.bf16.msra.mxu1 %v4799_v22  ;;  %v4784_v58 = vcombine.high %v852_v40, %v856_v5  ;;  %v4783_v4 = vcombine.low %v852_v40, %v856_v5 }
  0xca   : > { %v984_v16 = vld [vmem:[#allocation8 + $0x7a0] sm:$0xff]  ;;  %2292 = vmatprep.subr.bf16.mxu0 %v4792_v23  ;;  %2405 = vmatprep.subr.bf16.mxu1 %v4920_v57 }
  0xcb   : > { %v4912_v53 = vcombine.high %v980_v14, %v984_v16  ;;  %v844_v6 = vld [vmem:[#allocation8 + $0x340] sm:$0xff]  ;;  %v4911_v37 = vcombine.low %v980_v14, %v984_v16 }
  0xcc   : > { %v848_v28 = vld [vmem:[#allocation8 + $0x360] sm:$0xff] }
  0xcd   : > { %v972_v50 = vld [vmem:[#allocation8 + $0x740] sm:$0xff]  ;;  %2293 = vmatpush2.bf16.msra.mxu0 %v4791_v24  ;;  %2406 = vmatpush2.bf16.msra.mxu1 %v4919_v31  ;;  %v4776_v44 = vcombine.high %v844_v6, %v848_v28  ;;  %v4775_v15 = vcombine.low %v844_v6, %v848_v28 }
  0xce   : > { %v976_v55 = vld [vmem:[#allocation8 + $0x760] sm:$0xff]  ;;  %2294 = vmatprep.subr.bf16.mxu0 %v4784_v58  ;;  %2407 = vmatprep.subr.bf16.mxu1 %v4912_v53 }
  0xcf   : > { %v4904_v30 = vcombine.high %v972_v50, %v976_v55  ;;  %v836_v32 = vld [vmem:[#allocation8 + $0x300] sm:$0xff]  ;;  %v4903_v21 = vcombine.low %v972_v50, %v976_v55 }
  0xd0   : > { %v840_v49 = vld [vmem:[#allocation8 + $0x320] sm:$0xff] }
  0xd1   : > { %v964_v20 = vld [vmem:[#allocation8 + $0x700] sm:$0xff]  ;;  %2295 = vmatpush2.bf16.msra.mxu0 %v4783_v4  ;;  %2408 = vmatpush2.bf16.msra.mxu1 %v4911_v37  ;;  %v4768_v45 = vcombine.high %v836_v32, %v840_v49  ;;  %v4767_v43 = vcombine.low %v836_v32, %v840_v49 }
  0xd2   : > { %v968_v52 = vld [vmem:[#allocation8 + $0x720] sm:$0xff]  ;;  %2296 = vmatprep.subr.bf16.mxu0 %v4776_v44  ;;  %2409 = vmatprep.subr.bf16.mxu1 %v4904_v30 }
  0xd3   : > { %v4896_v12 = vcombine.high %v964_v20, %v968_v52  ;;  %v828_v54 = vld [vmem:[#allocation8 + $0x2c0] sm:$0xff]  ;;  %v4895_v63 = vcombine.low %v964_v20, %v968_v52 }
  0xd4   : > { %v832_v62 = vld [vmem:[#allocation8 + $0x2e0] sm:$0xff] }
  0xd5   : > { %v956_v35 = vld [vmem:[#allocation8 + $0x6c0] sm:$0xff]  ;;  %2297 = vmatpush2.bf16.msra.mxu0 %v4775_v15  ;;  %2410 = vmatpush2.bf16.msra.mxu1 %v4903_v21  ;;  %v4760_v22 = vcombine.high %v828_v54, %v832_v62  ;;  %v4759_v16 = vcombine.low %v828_v54, %v832_v62  ;;  %v4730_v62 = vcombine.high %v6539_v60, %v6541_v11 }
  0xd6   : > { %v960_v56 = vld [vmem:[#allocation8 + $0x6e0] sm:$0xff]  ;;  %2298 = vmatprep.subr.bf16.mxu0 %v4768_v45  ;;  %2411 = vmatprep.subr.bf16.mxu1 %v4896_v12 }
  0xd7   : > { %v4888_v23 = vcombine.high %v956_v35, %v960_v56  ;;  %v820_v57 = vld [vmem:[#allocation8 + $0x280] sm:$0xff]  ;;  %v4887_v24 = vcombine.low %v956_v35, %v960_v56  ;;  %v4858_v35 = vcombine.high %v6543_v42, %v6545_v36  ;;  %v777_v42 = vld [vmem:[#allocation8 + $0x128] sm:$0xff] }
  0xd8   : > { %v824_v40 = vld [vmem:[#allocation8 + $0x2a0] sm:$0xff]  ;;  %v901_v36 = vld [vmem:[#allocation8 + $0x508] sm:$0xff] }
  0xd9   : > { %v948_v5 = vld [vmem:[#allocation8 + $0x680] sm:$0xff]  ;;  %2299 = vmatpush2.bf16.msra.mxu0 %v4767_v43  ;;  %2412 = vmatpush2.bf16.msra.mxu1 %v4895_v63  ;;  %v4752_v31 = vcombine.high %v820_v57, %v824_v40  ;;  %v4751_v55 = vcombine.low %v820_v57, %v824_v40 }
  0xda   : > { %v952_v14 = vld [vmem:[#allocation8 + $0x6a0] sm:$0xff]  ;;  %2300 = vmatprep.subr.bf16.mxu0 %v4760_v22  ;;  %2413 = vmatprep.subr.bf16.mxu1 %v4888_v23 }
  0xdb   : > { %v4880_v58 = vcombine.high %v948_v5, %v952_v14  ;;  %v812_v53 = vld [vmem:[#allocation8 + $0x240] sm:$0xff]  ;;  %v4879_v4 = vcombine.low %v948_v5, %v952_v14 }
  0xdc   : > { %v816_v6 = vld [vmem:[#allocation8 + $0x260] sm:$0xff] }
  0xdd   : > { %v940_v28 = vld [vmem:[#allocation8 + $0x640] sm:$0xff]  ;;  %2301 = vmatpush2.bf16.msra.mxu0 %v4759_v16  ;;  %2414 = vmatpush2.bf16.msra.mxu1 %v4887_v24  ;;  %v4744_v37 = vcombine.high %v812_v53, %v816_v6  ;;  %v4743_v52 = vcombine.low %v812_v53, %v816_v6 }
  0xde   : > { %v944_v50 = vld [vmem:[#allocation8 + $0x660] sm:$0xff]  ;;  %2302 = vmatprep.subr.bf16.mxu0 %v4752_v31  ;;  %2415 = vmatprep.subr.bf16.mxu1 %v4880_v58 }
  0xdf   : > { %v4872_v44 = vcombine.high %v940_v28, %v944_v50  ;;  %v804_v30 = vld [vmem:[#allocation8 + $0x200] sm:$0xff]  ;;  %v4871_v15 = vcombine.low %v940_v28, %v944_v50 }
  0xe0   : > { %v808_v32 = vld [vmem:[#allocation8 + $0x220] sm:$0xff] }
  0xe1   : > { %v932_v49 = vld [vmem:[#allocation8 + $0x600] sm:$0xff]  ;;  %2303 = vmatpush2.bf16.msra.mxu0 %v4751_v55  ;;  %2416 = vmatpush2.bf16.msra.mxu1 %v4879_v4  ;;  %v4736_v21 = vcombine.high %v804_v30, %v808_v32  ;;  %v4735_v12 = vcombine.low %v804_v30, %v808_v32 }
  0xe2   : > { %v936_v20 = vld [vmem:[#allocation8 + $0x620] sm:$0xff]  ;;  %2304 = vmatprep.subr.bf16.mxu0 %v4744_v37  ;;  %2417 = vmatprep.subr.bf16.mxu1 %v4872_v44 }
  0xe3   : > { %v4864_v45 = vcombine.high %v932_v49, %v936_v20  ;;  %v4863_v54 = vcombine.low %v932_v49, %v936_v20 }
  0xe5   : > { %2305 = vmatpush2.bf16.msra.mxu0 %v4743_v52  ;;  %2418 = vmatpush2.bf16.msra.mxu1 %v4871_v15 }
  0xe6   : > { %2306 = vmatprep.subr.bf16.mxu0 %v4736_v21  ;;  %2419 = vmatprep.subr.bf16.mxu1 %v4864_v45 }
  0xe9   : > { %2307 = vmatpush2.bf16.msra.mxu0 %v4735_v12  ;;  %2420 = vmatpush2.bf16.msra.mxu1 %v4863_v54  ;;  %v6557_v54 = vld [vmem:[#allocation8 + $0x188] sm:$0xff] }
  0xea   : > { %2502 = vmatprep.subr.bf16.mxu0 %v4730_v62  ;;  %2615 = vmatprep.subr.bf16.mxu1 %v4858_v35  ;;  %v6559_v62 = vld [vmem:[#allocation8 + $0x1a8] sm:$0xff] }
 0x11f   : > { %v519_v56 = vpop.xlane.xlu0 %518 }
 0x120   : > { %v596_v43 = vmul.f32 0.001953125, %v519_v56 }
 0x122   : > { %v612_v63 = vadd.f32 1e-05, %v596_v43  ;;  %v529_v22 = vpop.xlane.xlu1 %528 }
 0x123   : > { %v524_v23 = vpop.xlane.xlu0 %523  ;;  %v598_v57 = vmul.f32 0.001953125, %v529_v22 }
 0x124   : > { %5783 = vrsqrt.f32 %v612_v63  ;;  %v597_v40 = vmul.f32 0.001953125, %v524_v23 }
 0x125   : > { %v614_v5 = vadd.f32 1e-05, %v598_v57 }
 0x126   : > { %v613_v14 = vadd.f32 1e-05, %v597_v40  ;;  %v534_v16 = vpop.xlane.xlu1 %533  ;;  %v917_v40 = vld [vmem:[#allocation8 + $0x588] sm:$0xff] }
 0x127   : > { %5785 = vrsqrt.f32 %v614_v5  ;;  %v599_v24 = vmul.f32 0.001953125, %v534_v16  ;;  %v921_v5 = vld [vmem:[#allocation8 + $0x5a8] sm:$0xff]  ;;  %v4722_v16 = vcombine.high %v6557_v54, %v6559_v62 }
 0x128   : > { %v539_v31 = vpop.xlane.xlu0 %538  ;;  %5787 = vrsqrt.f32 %v613_v14  ;;  %v4721_v14 = vcombine.low %v6557_v54, %v6559_v62 }
 0x129   : > { %v600_v58 = vmul.f32 0.001953125, %v539_v31  ;;  %v615_v53 = vadd.f32 1e-05, %v599_v24  ;;  %v6581_v31 = vld [vmem:[#allocation8 + $0x148] sm:$0xff] }
 0x12a   : > { %v544_v6 = vpop.xlane.xlu1 %543 }
 0x12b   : > { %v616_v28 = vadd.f32 1e-05, %v600_v58  ;;  %5789 = vrsqrt.f32 %v615_v53  ;;  %v601_v50 = vmul.f32 0.001953125, %v544_v6  ;;  %v4850_v58 = vcombine.high %v917_v40, %v921_v5 }
 0x12c   : > { %v549_v55 = vpop.xlane.xlu0 %548 }
 0x12d   : > { %v602_v4 = vmul.f32 0.001953125, %v549_v55  ;;  %v617_v37 = vadd.f32 1e-05, %v601_v50  ;;  %5791 = vrsqrt.f32 %v616_v28  ;;  %v6589_v50 = vld [vmem:[#allocation8 + $0x568] sm:$0xff] }
 0x12e   : > { %v554_v44 = vpop.xlane.xlu1 %553 }
 0x12f   : > { %5793 = vrsqrt.f32 %v617_v37  ;;  %v603_v30 = vmul.f32 0.001953125, %v554_v44  ;;  %v618_v32 = vadd.f32 1e-05, %v602_v4 }
 0x130   : > { %v559_v52 = vpop.xlane.xlu0 %558 }
 0x131   : > { %v5784_v49 = vpop.eup %5783  ;;  %v619_v20 = vadd.f32 1e-05, %v603_v30  ;;  %5795 = vrsqrt.f32 %v618_v32  ;;  %v604_v35 = vmul.f32 0.001953125, %v559_v52 }
 0x132   : > { %v564_v15 = vpop.xlane.xlu1 %563  ;;  %v645_v45 = vmul.f32 %v5784_v49, %v6347_v1  ;;  %v647_v12 = vmul.f32 %v5784_v49, %v6353_v3  ;;  %v644_v43 = vmul.f32 %v5784_v49, %v6344_v0  ;;  %v646_v63 = vmul.f32 %v5784_v49, %v6350_v2 }
 0x133   : > { %5797 = vrsqrt.f32 %v619_v20  ;;  %v605_v22 = vmul.f32 0.001953125, %v564_v15  ;;  %v620_v44 = vadd.f32 1e-05, %v604_v35 }
 0x134   : > { %v5786_v21 = vpop.eup %5785  ;;  %v569_v30 = vpop.xlane.xlu0 %568 }
 0x135   : > { %v5788_v56 = vpop.eup %5787  ;;  %v653_v0 = vmul.f32 %v5786_v21, %v6385_v17  ;;  %v655_v2 = vmul.f32 %v5786_v21, %v6391_v19  ;;  %v621_v28 = vadd.f32 1e-05, %v605_v22  ;;  %v6585_v17 = vld [vmem:[#allocation8 + $0x168] sm:$0xff]  ;;  %v652_v4 = vmul.f32 %v5786_v21, %v6378_v13 }
 0x136   : > { %v649_v23 = vmul.f32 %v5788_v56, %v6365_v8  ;;  %v651_v57 = vmul.f32 %v5788_v56, %v6371_v10  ;;  %v648_v1 = vmul.f32 %v5788_v56, %v6362_v7  ;;  %v650_v3 = vmul.f32 %v5788_v56, %v6368_v9  ;;  %v6587_v19 = vld [vmem:[#allocation8 + $0x548] sm:$0xff] }
 0x137   : > { %v4849_v13 = vcombine.low %v917_v40, %v921_v5  ;;  %5799 = vrsqrt.f32 %v621_v28  ;;  %v606_v11 = vmul.f32 0.001953125, %v569_v30  ;;  %v4841_v62 = vcombine.low %v6587_v19, %v6589_v50  ;;  %v6634_v56 = vld [vmem:[#allocation8 + $0xe8] sm:$0xff] }
 0x138   : > { %v5790_v24 = vpop.eup %5789  ;;  %v6573_v8 = vpack.c.bf16 %v649_v23, %v645_v45  ;;  %v6575_v10 = vpack.c.bf16 %v651_v57, %v647_v12  ;;  %v6577_v7 = vpack.c.bf16 %v648_v1, %v644_v43  ;;  %v6579_v9 = vpack.c.bf16 %v650_v3, %v646_v63  ;;  %v893_v40 = vld [vmem:[#allocation8 + $0x4c8] sm:$0xff] }
 0x139   : > { %v657_v53 = vmul.f32 %v5790_v24, %v6405_v26  ;;  %v659_v6 = vmul.f32 %v5790_v24, %v6411_v29  ;;  %v656_v37 = vmul.f32 %v5790_v24, %v6402_v25  ;;  %v654_v26 = vmul.f32 %v5786_v21, %v6388_v18  ;;  %v574_v29 = vpop.xlane.xlu1 %573  ;;  %v897_v5 = vld [vmem:[#allocation8 + $0x4e8] sm:$0xff] }
 0x13a   : > { %v5792_v55 = vpop.eup %5791  ;;  %2308 = vmatprep.mubr.bf16.mxu0 %v6573_v8  ;;  %2421 = vmatprep.mubr.bf16.mxu1 %v6575_v10  ;;  %v658_v20 = vmul.f32 %v5790_v24, %v6408_v27  ;;  %v4714_v18 = vcombine.high %v6581_v31, %v6585_v17  ;;  %v4842_v25 = vcombine.high %v6587_v19, %v6589_v50  ;;  %v6613_v27 = vld [vmem:[#allocation8 + $0x108] sm:$0xff]  ;;  %v607_v60 = vmul.f32 0.001953125, %v574_v29  ;;  %v7971_v19 = vld [vmem:[#allocation31_spill] sm:$0xff] }
 0x13b   : > { %2309 = vmatmul.mubr.bf16.vlgmr.msra.gmra.mxu0 %v6577_v7  ;;  %2422 = vmatmul.mubr.bf16.vlgmr.msra.gmra.mxu1 %v6579_v9  ;;  %v6598_v32 = vpack.c.bf16 %v657_v53, %v653_v0  ;;  %v6600_v49 = vpack.c.bf16 %v659_v6, %v655_v2  ;;  %v661_v15 = vmul.f32 %v5792_v55, %v6443_v46  ;;  %5801 = vrsqrt.f32 %v620_v44  ;;  %v6651_v6 = vld [vmem:[#allocation8 + $0x88] sm:$0xff] }
 0x13c   : > { %v5794_v52 = vpop.eup %5793  ;;  %2503 = vmatpush1.bf16.msra.mxu0 %v4729_v51  ;;  %2616 = vmatpush1.bf16.msra.mxu1 %v4857_v59  ;;  %v905_v51 = vld [vmem:[#allocation8 + $0x528] sm:$0xff]  ;;  %v663_v21 = vmul.f32 %v5792_v55, %v6449_v48  ;;  %v6621_v12 = vpack.c.bf16 %v656_v37, %v652_v4  ;;  %v6623_v54 = vpack.c.bf16 %v658_v20, %v654_v26  ;;  %v622_v43 = vadd.f32 1e-05, %v606_v11  ;;  %v7973_v37 = vld [vmem:[#allocation33_spill] sm:$0xff] }
 0x13d   : > { %2504 = vmatprep.subr.bf16.mxu0 %v4722_v16  ;;  %2617 = vmatprep.subr.bf16.mxu1 %v4850_v58  ;;  %v665_v59 = vmul.f32 %v5794_v52, %v6423_v34  ;;  %v667_v45 = vmul.f32 %v5794_v52, %v6431_v39  ;;  %v4713_v46 = vcombine.low %v6581_v31, %v6585_v17  ;;  %v6632_v39 = vld [vmem:[#allocation8 + $0xc8] sm:$0xff]  ;;  %v584_v63 = vpop.xlane.xlu1 %583  ;;  %v623_v1 = vadd.f32 1e-05, %v607_v60 }
 0x13e   : > { %2318 = vmatprep.mubr.bf16.mxu0 %v6598_v32  ;;  %2431 = vmatprep.mubr.bf16.mxu1 %v6600_v49  ;;  %v6629_v35 = vpop.eup %5795  ;;  %v4706_v34 = vcombine.high %v6613_v27, %v777_v42  ;;  %v4834_v48 = vcombine.high %v901_v36, %v905_v51  ;;  %v660_v3 = vmul.f32 %v5792_v55, %v6436_v41  ;;  %v609_v58 = vmul.f32 0.001953125, %v584_v63  ;;  %v885_v28 = vld [vmem:[#allocation8 + $0x488] sm:$0xff] }
 0x13f   : > { %v6638_v23 = vpack.c.bf16 %v665_v59, %v661_v15  ;;  %v6640_v57 = vpack.c.bf16 %v667_v45, %v663_v21  ;;  %v664_v16 = vmul.f32 %v5794_v52, %v6420_v33  ;;  %v662_v0 = vmul.f32 %v5792_v55, %v6446_v47  ;;  %v889_v17 = vld [vmem:[#allocation8 + $0x4a8] sm:$0xff]  ;;  %v7972_v55 = vld [vmem:[#allocation35_spill] sm:$0xff] }
 0x140   : > { %2505 = vmatpush1.bf16.msra.mxu0 %v4721_v14  ;;  %2618 = vmatpush1.bf16.msra.mxu1 %v4849_v13  ;;  %v6636_v22 = vpop.eup %5797  ;;  %v579_v14 = vpop.xlane.xlu0 %578  ;;  %v666_v2 = vmul.f32 %v5794_v52, %v6428_v38  ;;  %v4705_v24 = vcombine.low %v6613_v27, %v777_v42  ;;  %v4833_v31 = vcombine.low %v901_v36, %v905_v51  ;;  %5803 = vrsqrt.f32 %v622_v43  ;;  %v761_v38 = vld [vmem:[#allocation8 + $0xa8] sm:$0xff] }
 0x141   : > { %2506 = vmatprep.subr.bf16.mxu0 %v4714_v18  ;;  %2619 = vmatprep.subr.bf16.mxu1 %v4842_v25  ;;  %v4698_v41 = vcombine.high %v6632_v39, %v6634_v56  ;;  %v4826_v53 = vcombine.high %v893_v40, %v897_v5  ;;  %v669_v33 = vmul.f32 %v6629_v35, %v6468_v61  ;;  %v608_v47 = vmul.f32 0.001953125, %v579_v14  ;;  %v6670_v18 = vld [vmem:[#allocation8 + $0x48] sm:$0xff]  ;;  %v594_v21 = vpop.xlane.xlu1 %593 }
 0x142   : > { %5805 = vrsqrt.f32 %v623_v1  ;;  %v673_v50 = vmul.f32 %v6636_v22, %v7971_v19  ;;  %v671_v4 = vmul.f32 %v6629_v35, %v7972_v55  ;;  %v675_v26 = vmul.f32 %v6636_v22, %v7973_v37  ;;  %v6672_v25 = vld [vmem:[#allocation8 + $0x68] sm:$0xff] }
 0x143   : > { %2319 = vmatmul.mubr.bf16.gmra.mxu0 %v6621_v12  ;;  %2432 = vmatmul.mubr.bf16.gmra.mxu1 %v6623_v54  ;;  %v6663_v44 = vpack.c.bf16 %v664_v16, %v660_v3  ;;  %v6665_v61 = vpack.c.bf16 %v666_v2, %v662_v0  ;;  %v4697_v29 = vcombine.low %v6632_v39, %v6634_v56  ;;  %v625_v20 = vadd.f32 1e-05, %v609_v58  ;;  %v7974_v42 = vld [vmem:[#allocation32_spill] sm:$0xff]  ;;  %v5816_v39 = vld [vmem:[%s6317_s24 + $0xf0] sm:$0xff] }
 0x144   : > { %2507 = vmatpush1.bf16.msra.mxu0 %v4713_v46  ;;  %2620 = vmatpush1.bf16.msra.mxu1 %v4841_v62  ;;  %v4825_v30 = vcombine.low %v893_v40, %v897_v5  ;;  %v4690_v52 = vcombine.high %v6651_v6, %v761_v38  ;;  %v4818_v13 = vcombine.high %v885_v28, %v889_v17  ;;  %v624_v27 = vadd.f32 1e-05, %v608_v47  ;;  %v6674_v15 = vpop.eup %5799  ;;  %v6682_v51 = vld [vmem:[#allocation8 + $0x448] sm:$0xff]  ;;  %v5815_v46 = vld [vmem:[%s6317_s24 + $0xe0] sm:$0xff]  ;;  %v589_v43 = vpop.xlane.xlu0 %588 }
 0x145   : > { %2508 = vmatprep.subr.bf16.mxu0 %v4706_v34  ;;  %2621 = vmatprep.subr.bf16.mxu1 %v4834_v48  ;;  %v6676_v60 = vpack.c.bf16 %v673_v50, %v669_v33  ;;  %v6678_v11 = vpack.c.bf16 %v675_v26, %v671_v4  ;;  %v668_v36 = vmul.f32 %v6629_v35, %v7974_v42  ;;  %v6684_v59 = vld [vmem:[#allocation8 + $0x468] sm:$0xff]  ;;  %v7975_v34 = vld [vmem:[#allocation34_spill] sm:$0xff]  ;;  %5807 = vrsqrt.f32 %v625_v20  ;;  %v5819_v42 = vld [vmem:[%s6317_s24 + $0x100] sm:$0xff] }
 0x146   : > { %2328 = vmatprep.mubr.bf16.mxu0 %v6638_v23  ;;  %2441 = vmatprep.mubr.bf16.mxu1 %v6640_v57  ;;  %v672_v62 = vmul.f32 %v5815_v46, %v6636_v22  ;;  %v670_v48 = vmul.f32 %v6629_v35, %v7975_v34  ;;  %v674_v56 = vmul.f32 %v5816_v39, %v6636_v22  ;;  %5809 = vrsqrt.f32 %v624_v27  ;;  %v6699_v35 = vld [vmem:[#allocation8 + $0x8] sm:$0xff] }
 0x147   : > { %v4689_v63 = vcombine.low %v6651_v6, %v761_v38  ;;  %v4817_v1 = vcombine.low %v885_v28, %v889_v17  ;;  %v4682_v3 = vcombine.high %v6670_v18, %v6672_v25  ;;  %v4810_v40 = vcombine.high %v6682_v51, %v6684_v59  ;;  %v5817_v5 = vld [vmem:[%s6317_s24 + $0x128] sm:$0xff] }
 0x148   : > { %2509 = vmatpush1.bf16.msra.mxu0 %v4705_v24  ;;  %2622 = vmatpush1.bf16.msra.mxu1 %v4833_v31  ;;  %v5802_v45 = vpop.eup %5801  ;;  %v681_v22 = vmul.f32 %v5817_v5, %v6674_v15  ;;  %v611_v14 = vmul.f32 0.001953125, %v594_v21  ;;  %v6705_v16 = vld [vmem:[#allocation8 + $0x28] sm:$0xff]  ;;  %v7976_v24 = vld [vmem:[#allocation37_spill] sm:$0xff]  ;;  %v610_v33 = vmul.f32 0.001953125, %v589_v43  ;;  %v6713_v47 = vpack.c.bf16 %v672_v62, %v668_v36 }
 0x149   : > { %2510 = vmatprep.subr.bf16.mxu0 %v4698_v41  ;;  %2623 = vmatprep.subr.bf16.mxu1 %v4826_v53  ;;  %v6707_v0 = vld [vmem:[#allocation8 + $0x408] sm:$0xff]  ;;  %v677_v31 = vmul.f32 %v5802_v45, %v7976_v24  ;;  %v7977_v41 = vld [vmem:[#allocation38_spill] sm:$0xff]  ;;  %v6715_v38 = vpack.c.bf16 %v674_v56, %v670_v48  ;;  %v4681_v28 = vcombine.low %v6670_v18, %v6672_v25  ;;  %v5821_v21 = vld [vmem:[%s6317_s24 + $0x130] sm:$0xff] }
 0x14a   : > { %v873_v2 = vld [vmem:[#allocation8 + $0x428] sm:$0xff]  ;;  %v679_v58 = vmul.f32 %v5802_v45, %v7977_v41  ;;  %v4809_v17 = vcombine.low %v6682_v51, %v6684_v59  ;;  %v4674_v19 = vcombine.high %v6699_v35, %v6705_v16  ;;  %v627_v55 = vadd.f32 1e-05, %v611_v14  ;;  %v5820_v51 = vld [vmem:[%s6317_s24 + $0x110] sm:$0xff] }
 0x14b   : > { %2329 = vmatmul.mubr.bf16.gmra.mxu0 %v6663_v44  ;;  %2442 = vmatmul.mubr.bf16.gmra.mxu1 %v6665_v61  ;;  %v7978_v53 = vld [vmem:[#allocation36_spill] sm:$0xff]  ;;  %v4802_v50 = vcombine.high %v6707_v0, %v873_v2  ;;  %v6728_v26 = vpack.c.bf16 %v681_v22, %v677_v31  ;;  %v626_v25 = vadd.f32 1e-05, %v610_v33  ;;  %v676_v36 = vmul.f32 %v5819_v42, %v5802_v45  ;;  %v5825_v22 = vld [vmem:[%s6317_s24 + $0x178] sm:$0xff] }
 0x14c   : > { %2511 = vmatpush1.bf16.msra.mxu0 %v4697_v29  ;;  %2624 = vmatpush1.bf16.msra.mxu1 %v4825_v30  ;;  %v683_v6 = vmul.f32 %v6674_v15, %v7978_v53  ;;  %v6724_v4 = vld [vmem:[#allocation8 + $0x3c8] sm:$0xff]  ;;  %v5818_v30 = vld [vmem:[%s6317_s24 + $0x120] sm:$0xff]  ;;  %v678_v59 = vmul.f32 %v5820_v51, %v5802_v45  ;;  %v682_v46 = vmul.f32 %v5821_v21, %v6674_v15  ;;  %5811 = vrsqrt.f32 %v627_v55 }
 0x14d   : > { %2512 = vmatprep.subr.bf16.mxu0 %v4690_v52  ;;  %2625 = vmatprep.subr.bf16.mxu1 %v4818_v13  ;;  %v6726_v37 = vpop.eup %5803  ;;  %v680_v20 = vmul.f32 %v5818_v30, %v6674_v15  ;;  %v6734_v52 = vld [vmem:[#allocation8 + $0x3e8] sm:$0xff]  ;;  %v4673_v62 = vcombine.low %v6699_v35, %v6705_v16  ;;  %v4801_v34 = vcombine.low %v6707_v0, %v873_v2  ;;  %5813 = vrsqrt.f32 %v626_v25  ;;  %v5824_v35 = vld [vmem:[%s6317_s24 + $0x158] sm:$0xff]  ;;  %v5827_v30 = vld [vmem:[%s6317_s24 + $0x160] sm:$0xff] }
 0x14e   : > { %2338 = vmatprep.mubr.bf16.mxu0 %v6676_v60  ;;  %2451 = vmatprep.mubr.bf16.mxu1 %v6678_v11  ;;  %v6730_v29 = vpack.c.bf16 %v683_v6, %v679_v58  ;;  %v6736_v13 = vld [vmem:[#allocation8 + $0x7c8] sm:$0xff]  ;;  %v4794_v48 = vcombine.high %v6724_v4, %v6734_v52  ;;  %v687_v5 = vmul.f32 %v5824_v35, %v6726_v37 }
 0x14f   : > { %v6738_v18 = vld [vmem:[#allocation8 + $0x7e8] sm:$0xff]  ;;  %v5806_v27 = vpop.eup %5805  ;;  %v6763_v16 = vpack.c.bf16 %v680_v20, %v676_v36  ;;  %v6765_v0 = vpack.c.bf16 %v682_v46, %v678_v59  ;;  %v4793_v2 = vcombine.low %v6724_v4, %v6734_v52  ;;  %v5828_v52 = vld [vmem:[%s6317_s24 + $0x150] sm:$0xff] }
 0x150   : > { %2513 = vmatpush1.bf16.msra.mxu0 %v4689_v63  ;;  %2626 = vmatpush1.bf16.msra.mxu1 %v4817_v1  ;;  %v4922_v45 = vcombine.high %v6736_v13, %v6738_v18  ;;  %v6753_v15 = vld [vmem:[#allocation8 + $0x388] sm:$0xff]  ;;  %v691_v14 = vmul.f32 %v5825_v22, %v5806_v27  ;;  %v4921_v24 = vcombine.low %v6736_v13, %v6738_v18  ;;  %v5829_v18 = vld [vmem:[%s6317_s24 + $0x170] sm:$0xff] }
 0x151   : > { %2514 = vmatprep.subr.bf16.mxu0 %v4682_v3  ;;  %2627 = vmatprep.subr.bf16.mxu1 %v4810_v40  ;;  %v5822_v39 = vld [vmem:[%s6317_s24 + $0x148] sm:$0xff]  ;;  %v688_v20 = vmul.f32 %v5827_v30, %v5806_v27  ;;  %v686_v13 = vmul.f32 %v5828_v52, %v6726_v37  ;;  %v690_v25 = vmul.f32 %v5829_v18, %v5806_v27  ;;  %v5836_v30 = vld [vmem:[%s6317_s24 + $0x190] sm:$0xff] }
 0x152   : > { %v685_v56 = vmul.f32 %v5822_v39, %v6726_v37  ;;  %v857_v43 = vld [vmem:[#allocation8 + $0x3a8] sm:$0xff]  ;;  %v6771_v31 = vpop.eup %5807  ;;  %v5837_v52 = vld [vmem:[%s6317_s24 + $0x1b0] sm:$0xff] }
 0x153   : > { %2339 = vmatmul.mubr.bf16.gmra.mxu0 %v6713_v47  ;;  %2452 = vmatmul.mubr.bf16.gmra.mxu1 %v6715_v38  ;;  %v981_v63 = vld [vmem:[#allocation8 + $0x788] sm:$0xff]  ;;  %v4786_v41 = vcombine.high %v6753_v15, %v857_v43  ;;  %v6776_v6 = vpop.eup %5809  ;;  %v4785_v42 = vcombine.low %v6753_v15, %v857_v43  ;;  %v5832_v15 = vld [vmem:[%s6317_s24 + $0x198] sm:$0xff] }
 0x154   : > { %2515 = vmatpush1.bf16.msra.mxu0 %v4681_v28  ;;  %2628 = vmatpush1.bf16.msra.mxu1 %v4809_v17  ;;  %v985_v1 = vld [vmem:[#allocation8 + $0x7a8] sm:$0xff]  ;;  %v6780_v28 = vpack.c.bf16 %v691_v14, %v687_v5  ;;  %v5826_v17 = vld [vmem:[%s6317_s24 + $0x140] sm:$0xff]  ;;  %v695_v39 = vmul.f32 %v5832_v15, %v6776_v6 }
 0x155   : > { %2516 = vmatprep.subr.bf16.mxu0 %v4674_v19  ;;  %2629 = vmatprep.subr.bf16.mxu1 %v4802_v50  ;;  %v5823_v3 = vld [vmem:[%s6317_s24 + $0x168] sm:$0xff]  ;;  %v4914_v58 = vcombine.high %v981_v63, %v985_v1  ;;  %v684_v19 = vmul.f32 %v5826_v17, %v6726_v37  ;;  %v4913_v36 = vcombine.low %v981_v63, %v985_v1 }
 0x156   : > { %2348 = vmatprep.mubr.bf16.mxu0 %v6728_v26  ;;  %2461 = vmatprep.mubr.bf16.mxu1 %v6730_v29  ;;  %v689_v40 = vmul.f32 %v5823_v3, %v5806_v27  ;;  %v6774_v53 = vld [vmem:[#allocation8 + $0x348] sm:$0xff]  ;;  %v6806_v1 = vpack.c.bf16 %v690_v25, %v686_v13  ;;  %v698_v13 = vmul.f32 %v5837_v52, %v6771_v31  ;;  %v5845_v52 = vld [vmem:[%s6317_s24 + $0x1f0] sm:$0xff] }
 0x157   : > { %v849_v50 = vld [vmem:[#allocation8 + $0x368] sm:$0xff]  ;;  %v6804_v63 = vpack.c.bf16 %v688_v20, %v684_v19  ;;  %v694_v20 = vmul.f32 %v5836_v30, %v6776_v6 }
 0x158   : > { %2517 = vmatpush1.bf16.msra.mxu0 %v4673_v62  ;;  %2630 = vmatpush1.bf16.msra.mxu1 %v4801_v34  ;;  %v6778_v33 = vpack.c.bf16 %v689_v40, %v685_v56  ;;  %v973_v55 = vld [vmem:[#allocation8 + $0x748] sm:$0xff]  ;;  %v4778_v51 = vcombine.high %v6774_v53, %v849_v50  ;;  %v5833_v56 = vld [vmem:[%s6317_s24 + $0x1b8] sm:$0xff]  ;;  %v4777_v3 = vcombine.low %v6774_v53, %v849_v50 }
 0x159   : > { %2518 = vmatprep.subr.bf16.mxu0 %v4794_v48  ;;  %2631 = vmatprep.subr.bf16.mxu1 %v4922_v45  ;;  %v977_v4 = vld [vmem:[#allocation8 + $0x768] sm:$0xff]  ;;  %v699_v43 = vmul.f32 %v5833_v56, %v6771_v31  ;;  %v6812_v14 = vpop.eup %5811 }
 0x15a   : > { %v4906_v59 = vcombine.high %v973_v55, %v977_v4  ;;  %v6792_v21 = vld [vmem:[#allocation8 + $0x308] sm:$0xff]  ;;  %v4905_v40 = vcombine.low %v973_v55, %v977_v4  ;;  %v5814_v50 = vpop.eup %5813  ;;  %v5835_v55 = vld [vmem:[%s6317_s24 + $0x180] sm:$0xff] }
 0x15b   : > { %2349 = vmatmul.mubr.bf16.gmra.mxu0 %v6763_v16  ;;  %2462 = vmatmul.mubr.bf16.gmra.mxu1 %v6765_v0  ;;  %v5830_v46 = vld [vmem:[%s6317_s24 + $0x1a8] sm:$0xff]  ;;  %v692_v4 = vmul.f32 %v5835_v55, %v6776_v6 }
 0x15c   : > { %2519 = vmatpush2.bf16.msra.mxu0 %v4793_v2  ;;  %2632 = vmatpush2.bf16.msra.mxu1 %v4921_v24  ;;  %v697_v37 = vmul.f32 %v5830_v46, %v6771_v31  ;;  %v841_v27 = vld [vmem:[#allocation8 + $0x328] sm:$0xff]  ;;  %v6816_v24 = vpack.c.bf16 %v699_v43, %v695_v39  ;;  %v6840_v39 = vpack.c.bf16 %v698_v13, %v694_v20 }
 0x15d   : > { %2520 = vmatprep.subr.bf16.mxu0 %v4786_v41  ;;  %2633 = vmatprep.subr.bf16.mxu1 %v4914_v58  ;;  %v965_v62 = vld [vmem:[#allocation8 + $0x708] sm:$0xff]  ;;  %v4770_v35 = vcombine.high %v6792_v21, %v841_v27  ;;  %v5834_v41 = vld [vmem:[%s6317_s24 + $0x1a0] sm:$0xff]  ;;  %v4769_v18 = vcombine.low %v6792_v21, %v841_v27  ;;  %v706_v13 = vmul.f32 %v5845_v52, %v6812_v14  ;;  %v910_v52 = vld [vmem:[#allocation8 + $0x550] sm:$0xff] }
 0x15e   : > { %2358 = vmatprep.mubr.bf16.mxu0 %v6778_v33  ;;  %2471 = vmatprep.mubr.bf16.mxu1 %v6780_v28  ;;  %v969_v34 = vld [vmem:[#allocation8 + $0x728] sm:$0xff]  ;;  %v696_v58 = vmul.f32 %v5834_v41, %v6771_v31 }
 0x15f   : > { %v5831_v48 = vld [vmem:[%s6317_s24 + $0x188] sm:$0xff]  ;;  %v4898_v5 = vcombine.high %v965_v62, %v969_v34  ;;  %v4897_v25 = vcombine.low %v965_v62, %v969_v34  ;;  %v5840_v62 = vld [vmem:[%s6317_s24 + $0x1d8] sm:$0xff] }
 0x160   : > { %v693_v45 = vmul.f32 %v5831_v48, %v6776_v6  ;;  %2521 = vmatpush2.bf16.msra.mxu0 %v4785_v42  ;;  %2634 = vmatpush2.bf16.msra.mxu1 %v4913_v36  ;;  %v6810_v22 = vld [vmem:[#allocation8 + $0x2c8] sm:$0xff]  ;;  %v703_v34 = vmul.f32 %v5840_v62, %v5814_v50  ;;  %v5841_v48 = vld [vmem:[%s6317_s24 + $0x1f8] sm:$0xff]  ;;  %v6838_v15 = vpack.c.bf16 %v696_v58, %v692_v4  ;;  %v5842_v58 = vld [vmem:[%s6317_s24 + $0x1e0] sm:$0xff] }
 0x161   : > { %2522 = vmatprep.subr.bf16.mxu0 %v4778_v51  ;;  %2635 = vmatprep.subr.bf16.mxu1 %v4906_v59  ;;  %v833_v53 = vld [vmem:[#allocation8 + $0x2e8] sm:$0xff]  ;;  %v704_v55 = vmul.f32 %v5842_v58, %v6812_v14  ;;  %v798_v62 = vld [vmem:[#allocation8 + $0x1d0] sm:$0xff] }
 0x162   : > { %v6814_v2 = vpack.c.bf16 %v697_v37, %v693_v45  ;;  %v957_v17 = vld [vmem:[#allocation8 + $0x6c8] sm:$0xff]  ;;  %v4762_v42 = vcombine.high %v6810_v22, %v833_v53  ;;  %v707_v45 = vmul.f32 %v5841_v48, %v6812_v14  ;;  %v4761_v56 = vcombine.low %v6810_v22, %v833_v53  ;;  %v5843_v22 = vld [vmem:[%s6317_s24 + $0x1c0] sm:$0xff]  ;;  %v926_v48 = vld [vmem:[#allocation8 + $0x5d0] sm:$0xff] }
 0x163   : > { %v961_v19 = vld [vmem:[#allocation8 + $0x6e8] sm:$0xff]  ;;  %2359 = vmatmul.mubr.bf16.gmra.mxu0 %v6804_v63  ;;  %2472 = vmatmul.mubr.bf16.gmra.mxu1 %v6806_v1  ;;  %v700_v53 = vmul.f32 %v5843_v22, %v5814_v50  ;;  %v794_v58 = vld [vmem:[#allocation8 + $0x1b0] sm:$0xff] }
 0x164   : > { %2523 = vmatpush2.bf16.msra.mxu0 %v4777_v3  ;;  %2636 = vmatpush2.bf16.msra.mxu1 %v4905_v40  ;;  %v4890_v36 = vcombine.high %v957_v17, %v961_v19  ;;  %v821_v51 = vld [vmem:[#allocation8 + $0x288] sm:$0xff]  ;;  %v4889_v43 = vcombine.low %v957_v17, %v961_v19  ;;  %v6845_v41 = vpack.c.bf16 %v707_v45, %v703_v34  ;;  %v5844_v17 = vld [vmem:[%s6317_s24 + $0x1d0] sm:$0xff] }
 0x165   : > { %2524 = vmatprep.subr.bf16.mxu0 %v4770_v35  ;;  %2637 = vmatprep.subr.bf16.mxu1 %v4898_v5  ;;  %v5838_v59 = vld [vmem:[%s6317_s24 + $0x1e8] sm:$0xff]  ;;  %v702_v19 = vmul.f32 %v5844_v17, %v5814_v50  ;;  %v802_v34 = vld [vmem:[#allocation8 + $0x1f0] sm:$0xff] }
 0x166   : > { %v705_v6 = vmul.f32 %v5838_v59, %v6812_v14  ;;  %2368 = vmatprep.mubr.bf16.mxu0 %v6814_v2  ;;  %2481 = vmatprep.mubr.bf16.mxu1 %v6816_v24  ;;  %v825_v31 = vld [vmem:[#allocation8 + $0x2a8] sm:$0xff]  ;;  %v930_v45 = vld [vmem:[#allocation8 + $0x5f0] sm:$0xff] }
 0x167   : > { %v949_v46 = vld [vmem:[#allocation8 + $0x688] sm:$0xff]  ;;  %v4754_v3 = vcombine.high %v821_v51, %v825_v31  ;;  %v782_v17 = vld [vmem:[#allocation8 + $0x150] sm:$0xff] }
 0x168   : > { %v953_v37 = vld [vmem:[#allocation8 + $0x6a8] sm:$0xff]  ;;  %2525 = vmatpush2.bf16.msra.mxu0 %v4769_v18  ;;  %2638 = vmatpush2.bf16.msra.mxu1 %v4897_v25  ;;  %v4753_v18 = vcombine.low %v821_v51, %v825_v31 }
 0x169   : > { %v5839_v21 = vld [vmem:[%s6317_s24 + $0x1c8] sm:$0xff]  ;;  %2526 = vmatprep.subr.bf16.mxu0 %v4762_v42  ;;  %2639 = vmatprep.subr.bf16.mxu1 %v4890_v36  ;;  %v4882_v40 = vcombine.high %v949_v46, %v953_v37  ;;  %v4881_v25 = vcombine.low %v949_v46, %v953_v37 }
 0x16a   : > { %v701_v27 = vmul.f32 %v5839_v21, %v5814_v50  ;;  %v813_v35 = vld [vmem:[#allocation8 + $0x248] sm:$0xff]  ;;  %v6859_v21 = vpack.c.bf16 %v706_v13, %v702_v19  ;;  %v786_v19 = vld [vmem:[#allocation8 + $0x170] sm:$0xff] }
 0x16b   : > { %v817_v4 = vld [vmem:[#allocation8 + $0x268] sm:$0xff]  ;;  %2369 = vmatmul.mubr.bf16.gmra.mxu0 %v6838_v15  ;;  %2482 = vmatmul.mubr.bf16.gmra.mxu1 %v6840_v39  ;;  %v914_v13 = vld [vmem:[#allocation8 + $0x570] sm:$0xff] }
 0x16c   : > { %v6843_v5 = vpack.c.bf16 %v705_v6, %v701_v27  ;;  %v941_v30 = vld [vmem:[#allocation8 + $0x648] sm:$0xff]  ;;  %2527 = vmatpush2.bf16.msra.mxu0 %v4761_v56  ;;  %2640 = vmatpush2.bf16.msra.mxu1 %v4889_v43  ;;  %v4746_v42 = vcombine.high %v813_v35, %v817_v4  ;;  %v6857_v6 = vpack.c.bf16 %v704_v55, %v700_v53  ;;  %v918_v55 = vld [vmem:[#allocation8 + $0x590] sm:$0xff] }
 0x16d   : > { %v945_v20 = vld [vmem:[#allocation8 + $0x668] sm:$0xff]  ;;  %2528 = vmatprep.subr.bf16.mxu0 %v4754_v3  ;;  %2641 = vmatprep.subr.bf16.mxu1 %v4882_v40  ;;  %v4745_v51 = vcombine.low %v813_v35, %v817_v4  ;;  %v4732_v3 = vcombine.high %v798_v62, %v802_v34  ;;  %v4860_v40 = vcombine.high %v926_v48, %v930_v45  ;;  %v790_v35 = vld [vmem:[#allocation8 + $0x190] sm:$0xff] }
 0x16e   : > { %v4874_v36 = vcombine.high %v941_v30, %v945_v20  ;;  %2378 = vmatprep.mubr.bf16.mxu0 %v6843_v5  ;;  %2491 = vmatprep.mubr.bf16.mxu1 %v6845_v41  ;;  %v805_v59 = vld [vmem:[#allocation8 + $0x208] sm:$0xff]  ;;  %v4873_v31 = vcombine.low %v941_v30, %v945_v20  ;;  %v922_v4 = vld [vmem:[#allocation8 + $0x5b0] sm:$0xff]  ;;  %v4731_v30 = vcombine.low %v798_v62, %v802_v34 }
 0x16f   : > { %v809_v50 = vld [vmem:[#allocation8 + $0x228] sm:$0xff]  ;;  %v4859_v20 = vcombine.low %v926_v48, %v930_v45  ;;  %v4724_v22 = vcombine.high %v790_v35, %v794_v58  ;;  %v4852_v53 = vcombine.high %v918_v55, %v922_v4  ;;  %v766_v62 = vld [vmem:[#allocation8 + $0xd0] sm:$0xff] }
 0x170   : > { %v933_v27 = vld [vmem:[#allocation8 + $0x608] sm:$0xff]  ;;  %2529 = vmatpush2.bf16.msra.mxu0 %v4753_v18  ;;  %2642 = vmatpush2.bf16.msra.mxu1 %v4881_v25  ;;  %v4738_v46 = vcombine.high %v805_v59, %v809_v50  ;;  %v4737_v56 = vcombine.low %v805_v59, %v809_v50  ;;  %v4723_v18 = vcombine.low %v790_v35, %v794_v58  ;;  %v774_v59 = vld [vmem:[#allocation8 + $0x110] sm:$0xff] }
 0x171   : > { %v937_v14 = vld [vmem:[#allocation8 + $0x628] sm:$0xff]  ;;  %2530 = vmatprep.subr.bf16.mxu0 %v4746_v42  ;;  %2643 = vmatprep.subr.bf16.mxu1 %v4874_v36  ;;  %v4851_v25 = vcombine.low %v918_v55, %v922_v4  ;;  %v4716_v42 = vcombine.high %v782_v17, %v786_v19  ;;  %v4844_v36 = vcombine.high %v910_v52, %v914_v13  ;;  %v778_v50 = vld [vmem:[#allocation8 + $0x130] sm:$0xff] }
 0x172   : > { %v4866_v37 = vcombine.high %v933_v27, %v937_v14  ;;  %v4865_v43 = vcombine.low %v933_v27, %v937_v14  ;;  %v902_v27 = vld [vmem:[#allocation8 + $0x510] sm:$0xff] }
 0x173   : > { %2379 = vmatmul.mubr.bf16.gmra.mxu0 %v6857_v6  ;;  %2492 = vmatmul.mubr.bf16.gmra.mxu1 %v6859_v21  ;;  %v906_v14 = vld [vmem:[#allocation8 + $0x530] sm:$0xff] }
 0x174   : > { %2531 = vmatpush2.bf16.msra.mxu0 %v4745_v51  ;;  %2534 = vmatprep.mubr.bf16.mxu0 %v6573_v8  ;;  %v4715_v51 = vcombine.low %v782_v17, %v786_v19  ;;  %v770_v34 = vld [vmem:[#allocation8 + $0xf0] sm:$0xff] }
 0x175   : > { %2644 = vmatpush2.bf16.msra.mxu1 %v4873_v31  ;;  %2647 = vmatprep.mubr.bf16.mxu1 %v6575_v10  ;;  %v4843_v31 = vcombine.low %v910_v52, %v914_v13  ;;  %v894_v48 = vld [vmem:[#allocation8 + $0x4d0] sm:$0xff] }
 0x176   : > { %2532 = vmatprep.subr.bf16.mxu0 %v4738_v46  ;;  %2645 = vmatprep.subr.bf16.mxu1 %v4866_v37  ;;  %v4708_v46 = vcombine.high %v774_v59, %v778_v50  ;;  %v4836_v37 = vcombine.high %v902_v27, %v906_v14  ;;  %v898_v45 = vld [vmem:[#allocation8 + $0x4f0] sm:$0xff] }
 0x177   : > { %v758_v35 = vld [vmem:[#allocation8 + $0x90] sm:$0xff] }
 0x178   : > { %2533 = vmatpush2.bf16.msra.mxu0 %v4737_v56  ;;  %v4707_v56 = vcombine.low %v774_v59, %v778_v50  ;;  %v762_v58 = vld [vmem:[#allocation8 + $0xb0] sm:$0xff] }
 0x179   : > { %2646 = vmatpush2.bf16.msra.mxu1 %v4865_v43  ;;  %2728 = vmatprep.subr.bf16.mxu0 %v4732_v3  ;;  %v4835_v43 = vcombine.low %v902_v27, %v906_v14  ;;  %v4700_v3 = vcombine.high %v766_v62, %v770_v34  ;;  %v886_v55 = vld [vmem:[#allocation8 + $0x490] sm:$0xff] }
 0x17a   : > { %2841 = vmatprep.subr.bf16.mxu1 %v4860_v40  ;;  %v4828_v40 = vcombine.high %v894_v48, %v898_v45  ;;  %v890_v4 = vld [vmem:[#allocation8 + $0x4b0] sm:$0xff] }
 0x17b   : > { %2535 = vmatmul.mubr.bf16.vlgmr.msra.gmra.mxu0 %v6577_v7  ;;  %v750_v17 = vld [vmem:[#allocation8 + $0x50] sm:$0xff] }
 0x17c   : > { %2648 = vmatmul.mubr.bf16.vlgmr.msra.gmra.mxu1 %v6579_v9  ;;  %2544 = vmatprep.mubr.bf16.mxu0 %v6598_v32  ;;  %v754_v19 = vld [vmem:[#allocation8 + $0x70] sm:$0xff] }
 0x17d   : > { %2657 = vmatprep.mubr.bf16.mxu1 %v6600_v49  ;;  %2729 = vmatpush1.bf16.msra.mxu0 %v4731_v30  ;;  %v4699_v30 = vcombine.low %v766_v62, %v770_v34  ;;  %v878_v52 = vld [vmem:[#allocation8 + $0x450] sm:$0xff] }
 0x17e   : > { %2842 = vmatpush1.bf16.msra.mxu1 %v4859_v20  ;;  %2730 = vmatprep.subr.bf16.mxu0 %v4724_v22  ;;  %v4827_v20 = vcombine.low %v894_v48, %v898_v45  ;;  %v4692_v22 = vcombine.high %v758_v35, %v762_v58  ;;  %v882_v13 = vld [vmem:[#allocation8 + $0x470] sm:$0xff] }
 0x17f   : > { %2843 = vmatprep.subr.bf16.mxu1 %v4852_v53  ;;  %v4820_v53 = vcombine.high %v886_v55, %v890_v4  ;;  %v742_v59 = vld [vmem:[#allocation8 + $0x10] sm:$0xff] }
 0x180   : > { %v746_v50 = vld [vmem:[#allocation8 + $0x30] sm:$0xff] }
 0x181   : > { %2731 = vmatpush1.bf16.msra.mxu0 %v4723_v18  ;;  %v4691_v18 = vcombine.low %v758_v35, %v762_v58  ;;  %v870_v27 = vld [vmem:[#allocation8 + $0x410] sm:$0xff] }
 0x182   : > { %2844 = vmatpush1.bf16.msra.mxu1 %v4851_v25  ;;  %2732 = vmatprep.subr.bf16.mxu0 %v4716_v42  ;;  %v4819_v25 = vcombine.low %v886_v55, %v890_v4  ;;  %v4684_v42 = vcombine.high %v750_v17, %v754_v19  ;;  %v874_v14 = vld [vmem:[#allocation8 + $0x430] sm:$0xff] }
 0x183   : > { %2545 = vmatmul.mubr.bf16.gmra.mxu0 %v6621_v12  ;;  %2845 = vmatprep.subr.bf16.mxu1 %v4844_v36  ;;  %v4812_v36 = vcombine.high %v878_v52, %v882_v13  ;;  %v862_v62 = vld [vmem:[#allocation8 + $0x3d0] sm:$0xff] }
 0x184   : > { %2658 = vmatmul.mubr.bf16.gmra.mxu1 %v6623_v54  ;;  %2554 = vmatprep.mubr.bf16.mxu0 %v6638_v23  ;;  %v866_v34 = vld [vmem:[#allocation8 + $0x3f0] sm:$0xff] }
 0x185   : > { %2667 = vmatprep.mubr.bf16.mxu1 %v6640_v57  ;;  %2733 = vmatpush1.bf16.msra.mxu0 %v4715_v51  ;;  %v4683_v51 = vcombine.low %v750_v17, %v754_v19  ;;  %v990_v48 = vld [vmem:[#allocation8 + $0x7d0] sm:$0xff] }
 0x186   : > { %2846 = vmatpush1.bf16.msra.mxu1 %v4843_v31  ;;  %2734 = vmatprep.subr.bf16.mxu0 %v4708_v46  ;;  %v4811_v31 = vcombine.low %v878_v52, %v882_v13  ;;  %v4676_v46 = vcombine.high %v742_v59, %v746_v50  ;;  %v994_v45 = vld [vmem:[#allocation8 + $0x7f0] sm:$0xff] }
 0x187   : > { %2847 = vmatprep.subr.bf16.mxu1 %v4836_v37  ;;  %v4804_v37 = vcombine.high %v870_v27, %v874_v14  ;;  %v854_v35 = vld [vmem:[#allocation8 + $0x390] sm:$0xff] }
 0x188   : > { %v858_v58 = vld [vmem:[#allocation8 + $0x3b0] sm:$0xff] }
 0x189   : > { %2735 = vmatpush1.bf16.msra.mxu0 %v4707_v56  ;;  %v4675_v56 = vcombine.low %v742_v59, %v746_v50  ;;  %v982_v55 = vld [vmem:[#allocation8 + $0x790] sm:$0xff] }
 0x18a   : > { %2848 = vmatpush1.bf16.msra.mxu1 %v4835_v43  ;;  %2736 = vmatprep.subr.bf16.mxu0 %v4700_v3  ;;  %v4803_v43 = vcombine.low %v870_v27, %v874_v14  ;;  %v4796_v3 = vcombine.high %v862_v62, %v866_v34  ;;  %v986_v4 = vld [vmem:[#allocation8 + $0x7b0] sm:$0xff] }
 0x18b   : > { %2555 = vmatmul.mubr.bf16.gmra.mxu0 %v6663_v44  ;;  %2849 = vmatprep.subr.bf16.mxu1 %v4828_v40  ;;  %v4924_v40 = vcombine.high %v990_v48, %v994_v45  ;;  %v846_v17 = vld [vmem:[#allocation8 + $0x350] sm:$0xff] }
 0x18c   : > { %2668 = vmatmul.mubr.bf16.gmra.mxu1 %v6665_v61  ;;  %2564 = vmatprep.mubr.bf16.mxu0 %v6676_v60  ;;  %v850_v19 = vld [vmem:[#allocation8 + $0x370] sm:$0xff] }
 0x18d   : > { %2677 = vmatprep.mubr.bf16.mxu1 %v6678_v11  ;;  %2737 = vmatpush1.bf16.msra.mxu0 %v4699_v30  ;;  %v4795_v30 = vcombine.low %v862_v62, %v866_v34  ;;  %v974_v52 = vld [vmem:[#allocation8 + $0x750] sm:$0xff] }
 0x18e   : > { %2850 = vmatpush1.bf16.msra.mxu1 %v4827_v20  ;;  %2738 = vmatprep.subr.bf16.mxu0 %v4692_v22  ;;  %v4923_v20 = vcombine.low %v990_v48, %v994_v45  ;;  %v4788_v22 = vcombine.high %v854_v35, %v858_v58  ;;  %v978_v13 = vld [vmem:[#allocation8 + $0x770] sm:$0xff] }
 0x18f   : > { %2851 = vmatprep.subr.bf16.mxu1 %v4820_v53  ;;  %v4916_v53 = vcombine.high %v982_v55, %v986_v4  ;;  %v838_v59 = vld [vmem:[#allocation8 + $0x310] sm:$0xff] }
 0x190   : > { %v842_v50 = vld [vmem:[#allocation8 + $0x330] sm:$0xff] }
 0x191   : > { %2739 = vmatpush1.bf16.msra.mxu0 %v4691_v18  ;;  %v4787_v18 = vcombine.low %v854_v35, %v858_v58  ;;  %v966_v27 = vld [vmem:[#allocation8 + $0x710] sm:$0xff] }
 0x192   : > { %2852 = vmatpush1.bf16.msra.mxu1 %v4819_v25  ;;  %2740 = vmatprep.subr.bf16.mxu0 %v4684_v42  ;;  %v4915_v25 = vcombine.low %v982_v55, %v986_v4  ;;  %v4780_v42 = vcombine.high %v846_v17, %v850_v19  ;;  %v970_v14 = vld [vmem:[#allocation8 + $0x730] sm:$0xff] }
 0x193   : > { %2565 = vmatmul.mubr.bf16.gmra.mxu0 %v6713_v47  ;;  %2853 = vmatprep.subr.bf16.mxu1 %v4812_v36  ;;  %v4908_v36 = vcombine.high %v974_v52, %v978_v13  ;;  %v830_v62 = vld [vmem:[#allocation8 + $0x2d0] sm:$0xff] }
 0x194   : > { %2678 = vmatmul.mubr.bf16.gmra.mxu1 %v6715_v38  ;;  %2574 = vmatprep.mubr.bf16.mxu0 %v6728_v26  ;;  %v834_v34 = vld [vmem:[#allocation8 + $0x2f0] sm:$0xff] }
 0x195   : > { %2687 = vmatprep.mubr.bf16.mxu1 %v6730_v29  ;;  %2741 = vmatpush1.bf16.msra.mxu0 %v4683_v51  ;;  %v4779_v51 = vcombine.low %v846_v17, %v850_v19  ;;  %v958_v48 = vld [vmem:[#allocation8 + $0x6d0] sm:$0xff] }
 0x196   : > { %2854 = vmatpush1.bf16.msra.mxu1 %v4811_v31  ;;  %2742 = vmatprep.subr.bf16.mxu0 %v4676_v46  ;;  %v4907_v31 = vcombine.low %v974_v52, %v978_v13  ;;  %v4772_v46 = vcombine.high %v838_v59, %v842_v50  ;;  %v962_v45 = vld [vmem:[#allocation8 + $0x6f0] sm:$0xff] }
 0x197   : > { %2855 = vmatprep.subr.bf16.mxu1 %v4804_v37  ;;  %v4900_v37 = vcombine.high %v966_v27, %v970_v14  ;;  %v822_v35 = vld [vmem:[#allocation8 + $0x290] sm:$0xff] }
 0x198   : > { %v826_v58 = vld [vmem:[#allocation8 + $0x2b0] sm:$0xff] }
 0x199   : > { %2743 = vmatpush1.bf16.msra.mxu0 %v4675_v56  ;;  %v4771_v56 = vcombine.low %v838_v59, %v842_v50  ;;  %v950_v55 = vld [vmem:[#allocation8 + $0x690] sm:$0xff] }
 0x19a   : > { %2856 = vmatpush1.bf16.msra.mxu1 %v4803_v43  ;;  %2744 = vmatprep.subr.bf16.mxu0 %v4796_v3  ;;  %v4899_v43 = vcombine.low %v966_v27, %v970_v14  ;;  %v4764_v3 = vcombine.high %v830_v62, %v834_v34  ;;  %v954_v4 = vld [vmem:[#allocation8 + $0x6b0] sm:$0xff] }
 0x19b   : > { %2575 = vmatmul.mubr.bf16.gmra.mxu0 %v6763_v16  ;;  %2857 = vmatprep.subr.bf16.mxu1 %v4924_v40  ;;  %v4892_v40 = vcombine.high %v958_v48, %v962_v45  ;;  %v814_v17 = vld [vmem:[#allocation8 + $0x250] sm:$0xff] }
 0x19c   : > { %2688 = vmatmul.mubr.bf16.gmra.mxu1 %v6765_v0  ;;  %2584 = vmatprep.mubr.bf16.mxu0 %v6778_v33  ;;  %v818_v19 = vld [vmem:[#allocation8 + $0x270] sm:$0xff] }
 0x19d   : > { %2697 = vmatprep.mubr.bf16.mxu1 %v6780_v28  ;;  %2745 = vmatpush2.bf16.msra.mxu0 %v4795_v30  ;;  %v4763_v30 = vcombine.low %v830_v62, %v834_v34  ;;  %v942_v52 = vld [vmem:[#allocation8 + $0x650] sm:$0xff]  ;;  %v799_v62 = vld [vmem:[#allocation8 + $0x1d8] sm:$0xff] }
 0x19e   : > { %2858 = vmatpush2.bf16.msra.mxu1 %v4923_v20  ;;  %2746 = vmatprep.subr.bf16.mxu0 %v4788_v22  ;;  %v4891_v20 = vcombine.low %v958_v48, %v962_v45  ;;  %v4756_v22 = vcombine.high %v822_v35, %v826_v58  ;;  %v946_v13 = vld [vmem:[#allocation8 + $0x670] sm:$0xff]  ;;  %v803_v34 = vld [vmem:[#allocation8 + $0x1f8] sm:$0xff] }
 0x19f   : > { %2859 = vmatprep.subr.bf16.mxu1 %v4916_v53  ;;  %v4884_v53 = vcombine.high %v950_v55, %v954_v4  ;;  %v806_v59 = vld [vmem:[#allocation8 + $0x210] sm:$0xff]  ;;  %v927_v48 = vld [vmem:[#allocation8 + $0x5d8] sm:$0xff] }
 0x1a0   : > { %v810_v50 = vld [vmem:[#allocation8 + $0x230] sm:$0xff]  ;;  %v931_v45 = vld [vmem:[#allocation8 + $0x5f8] sm:$0xff] }
 0x1a1   : > { %2747 = vmatpush2.bf16.msra.mxu0 %v4787_v18  ;;  %v4755_v18 = vcombine.low %v822_v35, %v826_v58  ;;  %v934_v27 = vld [vmem:[#allocation8 + $0x610] sm:$0xff]  ;;  %v791_v35 = vld [vmem:[#allocation8 + $0x198] sm:$0xff] }
 0x1a2   : > { %2860 = vmatpush2.bf16.msra.mxu1 %v4915_v25  ;;  %2748 = vmatprep.subr.bf16.mxu0 %v4780_v42  ;;  %v4883_v25 = vcombine.low %v950_v55, %v954_v4  ;;  %v4748_v42 = vcombine.high %v814_v17, %v818_v19  ;;  %v938_v14 = vld [vmem:[#allocation8 + $0x630] sm:$0xff]  ;;  %v795_v58 = vld [vmem:[#allocation8 + $0x1b8] sm:$0xff] }
 0x1a3   : > { %2585 = vmatmul.mubr.bf16.gmra.mxu0 %v6804_v63  ;;  %2861 = vmatprep.subr.bf16.mxu1 %v4908_v36  ;;  %v4876_v36 = vcombine.high %v942_v52, %v946_v13  ;;  %v919_v55 = vld [vmem:[#allocation8 + $0x598] sm:$0xff] }
 0x1a4   : > { %2698 = vmatmul.mubr.bf16.gmra.mxu1 %v6806_v1  ;;  %2594 = vmatprep.mubr.bf16.mxu0 %v6814_v2  ;;  %v923_v4 = vld [vmem:[#allocation8 + $0x5b8] sm:$0xff] }
 0x1a5   : > { %2707 = vmatprep.mubr.bf16.mxu1 %v6816_v24  ;;  %2749 = vmatpush2.bf16.msra.mxu0 %v4779_v51  ;;  %v4747_v51 = vcombine.low %v814_v17, %v818_v19  ;;  %v783_v17 = vld [vmem:[#allocation8 + $0x158] sm:$0xff] }
 0x1a6   : > { %2862 = vmatpush2.bf16.msra.mxu1 %v4907_v31  ;;  %2750 = vmatprep.subr.bf16.mxu0 %v4772_v46  ;;  %v4875_v31 = vcombine.low %v942_v52, %v946_v13  ;;  %v4740_v46 = vcombine.high %v806_v59, %v810_v50  ;;  %v787_v19 = vld [vmem:[#allocation8 + $0x178] sm:$0xff] }
 0x1a7   : > { %2863 = vmatprep.subr.bf16.mxu1 %v4900_v37  ;;  %v4868_v37 = vcombine.high %v934_v27, %v938_v14  ;;  %v911_v52 = vld [vmem:[#allocation8 + $0x558] sm:$0xff] }
 0x1a8   : > { %v915_v13 = vld [vmem:[#allocation8 + $0x578] sm:$0xff] }
 0x1a9   : > { %2751 = vmatpush2.bf16.msra.mxu0 %v4771_v56  ;;  %v4739_v56 = vcombine.low %v806_v59, %v810_v50  ;;  %v775_v59 = vld [vmem:[#allocation8 + $0x118] sm:$0xff] }
 0x1aa   : > { %2864 = vmatpush2.bf16.msra.mxu1 %v4899_v43  ;;  %2752 = vmatprep.subr.bf16.mxu0 %v4764_v3  ;;  %v4867_v43 = vcombine.low %v934_v27, %v938_v14  ;;  %v4734_v3 = vcombine.high %v799_v62, %v803_v34  ;;  %v779_v50 = vld [vmem:[#allocation8 + $0x138] sm:$0xff] }
 0x1ab   : > { %2595 = vmatmul.mubr.bf16.gmra.mxu0 %v6838_v15  ;;  %2865 = vmatprep.subr.bf16.mxu1 %v4892_v40  ;;  %v4862_v40 = vcombine.high %v927_v48, %v931_v45  ;;  %v903_v27 = vld [vmem:[#allocation8 + $0x518] sm:$0xff] }
 0x1ac   : > { %2708 = vmatmul.mubr.bf16.gmra.mxu1 %v6840_v39  ;;  %2604 = vmatprep.mubr.bf16.mxu0 %v6843_v5  ;;  %v907_v14 = vld [vmem:[#allocation8 + $0x538] sm:$0xff] }
 0x1ad   : > { %2717 = vmatprep.mubr.bf16.mxu1 %v6845_v41  ;;  %2753 = vmatpush2.bf16.msra.mxu0 %v4763_v30  ;;  %v4733_v30 = vcombine.low %v799_v62, %v803_v34  ;;  %v767_v62 = vld [vmem:[#allocation8 + $0xd8] sm:$0xff] }
 0x1ae   : > { %2866 = vmatpush2.bf16.msra.mxu1 %v4891_v20  ;;  %2754 = vmatprep.subr.bf16.mxu0 %v4756_v22  ;;  %v4861_v20 = vcombine.low %v927_v48, %v931_v45  ;;  %v4726_v22 = vcombine.high %v791_v35, %v795_v58  ;;  %v771_v34 = vld [vmem:[#allocation8 + $0xf8] sm:$0xff] }
 0x1af   : > { %2867 = vmatprep.subr.bf16.mxu1 %v4884_v53  ;;  %v4854_v53 = vcombine.high %v919_v55, %v923_v4  ;;  %v895_v48 = vld [vmem:[#allocation8 + $0x4d8] sm:$0xff] }
 0x1b0   : > { %v899_v45 = vld [vmem:[#allocation8 + $0x4f8] sm:$0xff] }
 0x1b1   : > { %2755 = vmatpush2.bf16.msra.mxu0 %v4755_v18  ;;  %v4725_v18 = vcombine.low %v791_v35, %v795_v58  ;;  %v759_v35 = vld [vmem:[#allocation8 + $0x98] sm:$0xff] }
 0x1b2   : > { %2868 = vmatpush2.bf16.msra.mxu1 %v4883_v25  ;;  %2756 = vmatprep.subr.bf16.mxu0 %v4748_v42  ;;  %v4853_v25 = vcombine.low %v919_v55, %v923_v4  ;;  %v4718_v42 = vcombine.high %v783_v17, %v787_v19  ;;  %v763_v58 = vld [vmem:[#allocation8 + $0xb8] sm:$0xff] }
 0x1b3   : > { %2605 = vmatmul.mubr.bf16.gmra.mxu0 %v6857_v6  ;;  %2869 = vmatprep.subr.bf16.mxu1 %v4876_v36  ;;  %v4846_v36 = vcombine.high %v911_v52, %v915_v13  ;;  %v887_v55 = vld [vmem:[#allocation8 + $0x498] sm:$0xff] }
 0x1b4   : > { %2718 = vmatmul.mubr.bf16.gmra.mxu1 %v6859_v21  ;;  %2760 = vmatprep.mubr.bf16.mxu0 %v6573_v8  ;;  %v891_v4 = vld [vmem:[#allocation8 + $0x4b8] sm:$0xff] }
 0x1b5   : > { %2757 = vmatpush2.bf16.msra.mxu0 %v4747_v51  ;;  %2873 = vmatprep.mubr.bf16.mxu1 %v6575_v10  ;;  %v4717_v51 = vcombine.low %v783_v17, %v787_v19  ;;  %v751_v17 = vld [vmem:[#allocation8 + $0x58] sm:$0xff] }
 0x1b6   : > { %2870 = vmatpush2.bf16.msra.mxu1 %v4875_v31  ;;  %2758 = vmatprep.subr.bf16.mxu0 %v4740_v46  ;;  %v4845_v31 = vcombine.low %v911_v52, %v915_v13  ;;  %v4710_v46 = vcombine.high %v775_v59, %v779_v50  ;;  %v755_v19 = vld [vmem:[#allocation8 + $0x78] sm:$0xff] }
 0x1b7   : > { %2871 = vmatprep.subr.bf16.mxu1 %v4868_v37  ;;  %v4838_v37 = vcombine.high %v903_v27, %v907_v14  ;;  %v879_v52 = vld [vmem:[#allocation8 + $0x458] sm:$0xff] }
 0x1b8   : > { %v883_v13 = vld [vmem:[#allocation8 + $0x478] sm:$0xff] }
 0x1b9   : > { %2759 = vmatpush2.bf16.msra.mxu0 %v4739_v56  ;;  %v4709_v56 = vcombine.low %v775_v59, %v779_v50  ;;  %v743_v59 = vld [vmem:[#allocation8 + $0x18] sm:$0xff] }
 0x1ba   : > { %2872 = vmatpush2.bf16.msra.mxu1 %v4867_v43  ;;  %2954 = vmatprep.subr.bf16.mxu0 %v4734_v3  ;;  %v4837_v43 = vcombine.low %v903_v27, %v907_v14  ;;  %v4702_v3 = vcombine.high %v767_v62, %v771_v34  ;;  %v747_v50 = vld [vmem:[#allocation8 + $0x38] sm:$0xff] }
 0x1bb   : > { %3067 = vmatprep.subr.bf16.mxu1 %v4862_v40  ;;  %v4830_v40 = vcombine.high %v895_v48, %v899_v45  ;;  %v871_v27 = vld [vmem:[#allocation8 + $0x418] sm:$0xff] }
 0x1bc   : > { %2761 = vmatmul.mubr.bf16.vlgmr.msra.gmra.mxu0 %v6577_v7  ;;  %v875_v14 = vld [vmem:[#allocation8 + $0x438] sm:$0xff] }
 0x1bd   : > { %2874 = vmatmul.mubr.bf16.vlgmr.msra.gmra.mxu1 %v6579_v9  ;;  %2770 = vmatprep.mubr.bf16.mxu0 %v6598_v32 }
 0x1be   : > { %2883 = vmatprep.mubr.bf16.mxu1 %v6600_v49  ;;  %2955 = vmatpush1.bf16.msra.mxu0 %v4733_v30  ;;  %v4701_v30 = vcombine.low %v767_v62, %v771_v34  ;;  %v863_v62 = vld [vmem:[#allocation8 + $0x3d8] sm:$0xff] }
 0x1bf   : > { %3068 = vmatpush1.bf16.msra.mxu1 %v4861_v20  ;;  %2956 = vmatprep.subr.bf16.mxu0 %v4726_v22  ;;  %v4829_v20 = vcombine.low %v895_v48, %v899_v45  ;;  %v4694_v22 = vcombine.high %v759_v35, %v763_v58  ;;  %v867_v34 = vld [vmem:[#allocation8 + $0x3f8] sm:$0xff] }
 0x1c0   : > { %3069 = vmatprep.subr.bf16.mxu1 %v4854_v53  ;;  %v4822_v53 = vcombine.high %v887_v55, %v891_v4  ;;  %v991_v48 = vld [vmem:[#allocation8 + $0x7d8] sm:$0xff] }
 0x1c1   : > { %v995_v45 = vld [vmem:[#allocation8 + $0x7f8] sm:$0xff] }
 0x1c2   : > { %2957 = vmatpush1.bf16.msra.mxu0 %v4725_v18  ;;  %v4693_v18 = vcombine.low %v759_v35, %v763_v58  ;;  %v855_v35 = vld [vmem:[#allocation8 + $0x398] sm:$0xff] }
 0x1c3   : > { %3070 = vmatpush1.bf16.msra.mxu1 %v4853_v25  ;;  %2958 = vmatprep.subr.bf16.mxu0 %v4718_v42  ;;  %v4821_v25 = vcombine.low %v887_v55, %v891_v4  ;;  %v4686_v42 = vcombine.high %v751_v17, %v755_v19  ;;  %v859_v58 = vld [vmem:[#allocation8 + $0x3b8] sm:$0xff] }
 0x1c4   : > { %2771 = vmatmul.mubr.bf16.gmra.mxu0 %v6621_v12  ;;  %3071 = vmatprep.subr.bf16.mxu1 %v4846_v36  ;;  %v4814_v36 = vcombine.high %v879_v52, %v883_v13  ;;  %v983_v55 = vld [vmem:[#allocation8 + $0x798] sm:$0xff] }
 0x1c5   : > { %2884 = vmatmul.mubr.bf16.gmra.mxu1 %v6623_v54  ;;  %2780 = vmatprep.mubr.bf16.mxu0 %v6638_v23  ;;  %v987_v4 = vld [vmem:[#allocation8 + $0x7b8] sm:$0xff] }
 0x1c6   : > { %2893 = vmatprep.mubr.bf16.mxu1 %v6640_v57  ;;  %2959 = vmatpush1.bf16.msra.mxu0 %v4717_v51  ;;  %v4685_v51 = vcombine.low %v751_v17, %v755_v19  ;;  %v847_v17 = vld [vmem:[#allocation8 + $0x358] sm:$0xff] }
 0x1c7   : > { %3072 = vmatpush1.bf16.msra.mxu1 %v4845_v31  ;;  %2960 = vmatprep.subr.bf16.mxu0 %v4710_v46  ;;  %v4813_v31 = vcombine.low %v879_v52, %v883_v13  ;;  %v4678_v46 = vcombine.high %v743_v59, %v747_v50  ;;  %v851_v19 = vld [vmem:[#allocation8 + $0x378] sm:$0xff] }
 0x1c8   : > { %3073 = vmatprep.subr.bf16.mxu1 %v4838_v37  ;;  %v4806_v37 = vcombine.high %v871_v27, %v875_v14  ;;  %v975_v52 = vld [vmem:[#allocation8 + $0x758] sm:$0xff] }
 0x1c9   : > { %v979_v13 = vld [vmem:[#allocation8 + $0x778] sm:$0xff] }
 0x1ca   : > { %2961 = vmatpush1.bf16.msra.mxu0 %v4709_v56  ;;  %v4677_v56 = vcombine.low %v743_v59, %v747_v50  ;;  %v839_v59 = vld [vmem:[#allocation8 + $0x318] sm:$0xff] }
 0x1cb   : > { %3074 = vmatpush1.bf16.msra.mxu1 %v4837_v43  ;;  %2962 = vmatprep.subr.bf16.mxu0 %v4702_v3  ;;  %v4805_v43 = vcombine.low %v871_v27, %v875_v14  ;;  %v4798_v3 = vcombine.high %v863_v62, %v867_v34  ;;  %v843_v50 = vld [vmem:[#allocation8 + $0x338] sm:$0xff] }
 0x1cc   : > { %2781 = vmatmul.mubr.bf16.gmra.mxu0 %v6663_v44  ;;  %3075 = vmatprep.subr.bf16.mxu1 %v4830_v40  ;;  %v4926_v40 = vcombine.high %v991_v48, %v995_v45  ;;  %v967_v27 = vld [vmem:[#allocation8 + $0x718] sm:$0xff] }
 0x1cd   : > { %2894 = vmatmul.mubr.bf16.gmra.mxu1 %v6665_v61  ;;  %2790 = vmatprep.mubr.bf16.mxu0 %v6676_v60  ;;  %v971_v14 = vld [vmem:[#allocation8 + $0x738] sm:$0xff] }
 0x1ce   : > { %2903 = vmatprep.mubr.bf16.mxu1 %v6678_v11  ;;  %2963 = vmatpush1.bf16.msra.mxu0 %v4701_v30  ;;  %v4797_v30 = vcombine.low %v863_v62, %v867_v34  ;;  %v831_v62 = vld [vmem:[#allocation8 + $0x2d8] sm:$0xff] }
 0x1cf   : > { %3076 = vmatpush1.bf16.msra.mxu1 %v4829_v20  ;;  %2964 = vmatprep.subr.bf16.mxu0 %v4694_v22  ;;  %v4925_v20 = vcombine.low %v991_v48, %v995_v45  ;;  %v4790_v22 = vcombine.high %v855_v35, %v859_v58  ;;  %v835_v34 = vld [vmem:[#allocation8 + $0x2f8] sm:$0xff] }
 0x1d0   : > { %3077 = vmatprep.subr.bf16.mxu1 %v4822_v53  ;;  %v4918_v53 = vcombine.high %v983_v55, %v987_v4  ;;  %v959_v48 = vld [vmem:[#allocation8 + $0x6d8] sm:$0xff] }
 0x1d1   : > { %v963_v45 = vld [vmem:[#allocation8 + $0x6f8] sm:$0xff] }
 0x1d2   : > { %2965 = vmatpush1.bf16.msra.mxu0 %v4693_v18  ;;  %v4789_v18 = vcombine.low %v855_v35, %v859_v58  ;;  %v823_v35 = vld [vmem:[#allocation8 + $0x298] sm:$0xff] }
 0x1d3   : > { %3078 = vmatpush1.bf16.msra.mxu1 %v4821_v25  ;;  %2966 = vmatprep.subr.bf16.mxu0 %v4686_v42  ;;  %v4917_v25 = vcombine.low %v983_v55, %v987_v4  ;;  %v4782_v42 = vcombine.high %v847_v17, %v851_v19  ;;  %v827_v58 = vld [vmem:[#allocation8 + $0x2b8] sm:$0xff] }
 0x1d4   : > { %2791 = vmatmul.mubr.bf16.gmra.mxu0 %v6713_v47  ;;  %3079 = vmatprep.subr.bf16.mxu1 %v4814_v36  ;;  %v4910_v36 = vcombine.high %v975_v52, %v979_v13  ;;  %v951_v55 = vld [vmem:[#allocation8 + $0x698] sm:$0xff] }
 0x1d5   : > { %2904 = vmatmul.mubr.bf16.gmra.mxu1 %v6715_v38  ;;  %2800 = vmatprep.mubr.bf16.mxu0 %v6728_v26  ;;  %v955_v4 = vld [vmem:[#allocation8 + $0x6b8] sm:$0xff] }
 0x1d6   : > { %2913 = vmatprep.mubr.bf16.mxu1 %v6730_v29  ;;  %2967 = vmatpush1.bf16.msra.mxu0 %v4685_v51  ;;  %v4781_v51 = vcombine.low %v847_v17, %v851_v19  ;;  %v815_v17 = vld [vmem:[#allocation8 + $0x258] sm:$0xff] }
 0x1d7   : > { %3080 = vmatpush1.bf16.msra.mxu1 %v4813_v31  ;;  %2968 = vmatprep.subr.bf16.mxu0 %v4678_v46  ;;  %v4909_v31 = vcombine.low %v975_v52, %v979_v13  ;;  %v4774_v46 = vcombine.high %v839_v59, %v843_v50  ;;  %v819_v19 = vld [vmem:[#allocation8 + $0x278] sm:$0xff] }
 0x1d8   : > { %3081 = vmatprep.subr.bf16.mxu1 %v4806_v37  ;;  %v4902_v37 = vcombine.high %v967_v27, %v971_v14  ;;  %v943_v52 = vld [vmem:[#allocation8 + $0x658] sm:$0xff] }
 0x1d9   : > { %v947_v13 = vld [vmem:[#allocation8 + $0x678] sm:$0xff] }
 0x1da   : > { %2969 = vmatpush1.bf16.msra.mxu0 %v4677_v56  ;;  %v4773_v56 = vcombine.low %v839_v59, %v843_v50  ;;  %v807_v59 = vld [vmem:[#allocation8 + $0x218] sm:$0xff] }
 0x1db   : > { %3082 = vmatpush1.bf16.msra.mxu1 %v4805_v43  ;;  %2970 = vmatprep.subr.bf16.mxu0 %v4798_v3  ;;  %v4901_v43 = vcombine.low %v967_v27, %v971_v14  ;;  %v4766_v3 = vcombine.high %v831_v62, %v835_v34  ;;  %v811_v50 = vld [vmem:[#allocation8 + $0x238] sm:$0xff] }
 0x1dc   : > { %2801 = vmatmul.mubr.bf16.gmra.mxu0 %v6763_v16  ;;  %3083 = vmatprep.subr.bf16.mxu1 %v4926_v40  ;;  %v4894_v40 = vcombine.high %v959_v48, %v963_v45  ;;  %v935_v27 = vld [vmem:[#allocation8 + $0x618] sm:$0xff] }
 0x1dd   : > { %2914 = vmatmul.mubr.bf16.gmra.mxu1 %v6765_v0  ;;  %2810 = vmatprep.mubr.bf16.mxu0 %v6778_v33  ;;  %v939_v14 = vld [vmem:[#allocation8 + $0x638] sm:$0xff] }
 0x1de   : > { %2923 = vmatprep.mubr.bf16.mxu1 %v6780_v28  ;;  %2971 = vmatpush2.bf16.msra.mxu0 %v4797_v30  ;;  %v4765_v30 = vcombine.low %v831_v62, %v835_v34  ;;  %v4741_v62 = vcombine.low %v807_v59, %v811_v50  ;;  %v4869_v34 = vcombine.low %v935_v27, %v939_v14 }
 0x1df   : > { %3084 = vmatpush2.bf16.msra.mxu1 %v4925_v20  ;;  %2972 = vmatprep.subr.bf16.mxu0 %v4790_v22  ;;  %v4893_v20 = vcombine.low %v959_v48, %v963_v45  ;;  %v4758_v22 = vcombine.high %v823_v35, %v827_v58 }
 0x1e0   : > { %3085 = vmatprep.subr.bf16.mxu1 %v4918_v53  ;;  %v4886_v53 = vcombine.high %v951_v55, %v955_v4 }
 0x1e2   : > { %2973 = vmatpush2.bf16.msra.mxu0 %v4789_v18  ;;  %v4757_v18 = vcombine.low %v823_v35, %v827_v58 }
 0x1e3   : > { %3086 = vmatpush2.bf16.msra.mxu1 %v4917_v25  ;;  %2974 = vmatprep.subr.bf16.mxu0 %v4782_v42  ;;  %v4885_v25 = vcombine.low %v951_v55, %v955_v4  ;;  %v4750_v42 = vcombine.high %v815_v17, %v819_v19 }
 0x1e4   : > { %2811 = vmatmul.mubr.bf16.gmra.mxu0 %v6804_v63  ;;  %3087 = vmatprep.subr.bf16.mxu1 %v4910_v36  ;;  %v4878_v36 = vcombine.high %v943_v52, %v947_v13 }
 0x1e5   : > { %2924 = vmatmul.mubr.bf16.gmra.mxu1 %v6806_v1  ;;  %2820 = vmatprep.mubr.bf16.mxu0 %v6814_v2 }
 0x1e6   : > { %2933 = vmatprep.mubr.bf16.mxu1 %v6816_v24  ;;  %2975 = vmatpush2.bf16.msra.mxu0 %v4781_v51  ;;  %v4749_v51 = vcombine.low %v815_v17, %v819_v19 }
 0x1e7   : > { %3088 = vmatpush2.bf16.msra.mxu1 %v4909_v31  ;;  %2976 = vmatprep.subr.bf16.mxu0 %v4774_v46  ;;  %v4877_v31 = vcombine.low %v943_v52, %v947_v13  ;;  %v4742_v46 = vcombine.high %v807_v59, %v811_v50 }
 0x1e8   : > { %3089 = vmatprep.subr.bf16.mxu1 %v4902_v37  ;;  %v4870_v37 = vcombine.high %v935_v27, %v939_v14 }
 0x1ea   : > { %2977 = vmatpush2.bf16.msra.mxu0 %v4773_v56 }
 0x1eb   : > { %3090 = vmatpush2.bf16.msra.mxu1 %v4901_v43  ;;  %2978 = vmatprep.subr.bf16.mxu0 %v4766_v3 }
 0x1ec   : > { %2821 = vmatmul.mubr.bf16.gmra.mxu0 %v6838_v15  ;;  %3091 = vmatprep.subr.bf16.mxu1 %v4894_v40 }
 0x1ed   : > { %2934 = vmatmul.mubr.bf16.gmra.mxu1 %v6840_v39  ;;  %2830 = vmatprep.mubr.bf16.mxu0 %v6843_v5 }
 0x1ee   : > { %2943 = vmatprep.mubr.bf16.mxu1 %v6845_v41  ;;  %2979 = vmatpush2.bf16.msra.mxu0 %v4765_v30 }
 0x1ef   : > { %3092 = vmatpush2.bf16.msra.mxu1 %v4893_v20  ;;  %2980 = vmatprep.subr.bf16.mxu0 %v4758_v22 }
 0x1f0   : > { %3093 = vmatprep.subr.bf16.mxu1 %v4886_v53 }
 0x1f2   : > { %2981 = vmatpush2.bf16.msra.mxu0 %v4757_v18 }
 0x1f3   : > { %3094 = vmatpush2.bf16.msra.mxu1 %v4885_v25  ;;  %2982 = vmatprep.subr.bf16.mxu0 %v4750_v42 }
 0x1f4   : > { %2831 = vmatmul.mubr.bf16.gmra.mxu0 %v6857_v6  ;;  %3095 = vmatprep.subr.bf16.mxu1 %v4878_v36 }
 0x1f5   : > { %2944 = vmatmul.mubr.bf16.gmra.mxu1 %v6859_v21  ;;  %2986 = vmatprep.mubr.bf16.mxu0 %v6573_v8 }
 0x1f6   : > { %2983 = vmatpush2.bf16.msra.mxu0 %v4749_v51  ;;  %3099 = vmatprep.mubr.bf16.mxu1 %v6575_v10 }
 0x1f7   : > { %3096 = vmatpush2.bf16.msra.mxu1 %v4877_v31  ;;  %2984 = vmatprep.subr.bf16.mxu0 %v4742_v46 }
 0x1f8   : > { %3097 = vmatprep.subr.bf16.mxu1 %v4870_v37 }
 0x1fa   : > { %2985 = vmatpush2.bf16.msra.mxu0 %v4741_v62 }
 0x1fb   : > { %3098 = vmatpush2.bf16.msra.mxu1 %v4869_v34  ;;  %v2310_v48 = vpop.f32.mrf.mxu0  ;;  %v2423_v45 = vpop.f32.mrf.mxu1 }
 0x1fc   : > { %v6929_v56 = vadd.f32 %v2423_v45, %v2310_v48 }
 0x1fd   : > { %2987 = vmatmul.mubr.bf16.vlgmr.msra.gmra.mxu0 %v6577_v7  ;;  %v2312_v43 = vpop.f32.mrf.mxu0  ;;  %v2425_v3 = vpop.f32.mrf.mxu1 }
 0x1fe   : > { %3100 = vmatmul.mubr.bf16.vlgmr.msra.gmra.mxu1 %v6579_v9  ;;  %2996 = vmatprep.mubr.bf16.mxu0 %v6598_v32  ;;  %v6939_v35 = vadd.f32 %v2425_v3, %v2312_v43 }
 0x1ff   : > { %3109 = vmatprep.mubr.bf16.mxu1 %v6600_v49  ;;  %3228 = vrot.lane.b32.xlu0 %v6929_v56, %s6044_s7  ;;  %v2314_v8 = vpop.f32.mrf.mxu0  ;;  %v2427_v10 = vpop.f32.mrf.mxu1 }
 0x200   : > { %v6937_v40 = vadd.f32 %v2427_v10, %v2314_v8 }
 0x201   : > { %v2316_v58 = vpop.f32.mrf.mxu0  ;;  %v2429_v7 = vpop.f32.mrf.mxu1 }
 0x202   : > { %3230 = vrot.lane.b32.xlu1 %v6937_v40, %s6044_s7  ;;  %v6945_v49 = vadd.f32 %v2429_v7, %v2316_v58 }
 0x203   : > { %3388 = vrot.lane.b32.xlu0 %v6939_v35, %s6044_s7  ;;  %v2320_v9 = vpop.f32.mrf.mxu0  ;;  %v2433_v32 = vpop.f32.mrf.mxu1 }
 0x204   : > { %v6957_v53 = vadd.f32 %v2433_v32, %v2320_v9 }
 0x205   : > { %2997 = vmatmul.mubr.bf16.gmra.mxu0 %v6621_v12  ;;  %v2322_v55 = vpop.f32.mrf.mxu0  ;;  %v2435_v4 = vpop.f32.mrf.mxu1 }
 0x206   : > { %3110 = vmatmul.mubr.bf16.gmra.mxu1 %v6623_v54  ;;  %3006 = vmatprep.mubr.bf16.mxu0 %v6638_v23  ;;  %v6950_v30 = vadd.f32 %v2435_v4, %v2322_v55 }
 0x207   : > { %3119 = vmatprep.mubr.bf16.mxu1 %v6640_v57  ;;  %3390 = vrot.lane.b32.xlu1 %v6945_v49, %s6044_s7  ;;  %v2324_v20 = vpop.f32.mrf.mxu0  ;;  %v2437_v22 = vpop.f32.mrf.mxu1 }
 0x208   : > { %3392 = vrot.lane.b32.xlu0 %v6950_v30, %s6044_s7  ;;  %v6963_v57 = vadd.f32 %v2437_v22, %v2324_v20 }
 0x209   : > { %v2326_v12 = vpop.f32.mrf.mxu0  ;;  %v2439_v17 = vpop.f32.mrf.mxu1 }
 0x20a   : > { %v6975_v36 = vadd.f32 %v2439_v17, %v2326_v12 }
 0x20b   : > { %3232 = vrot.lane.b32.xlu1 %v6957_v53, %s6044_s7  ;;  %v2330_v54 = vpop.f32.mrf.mxu0  ;;  %v2443_v23 = vpop.f32.mrf.mxu1 }
 0x20c   : > { %v6961_v19 = vadd.f32 %v2443_v23, %v2330_v54 }
 0x20d   : > { %3007 = vmatmul.mubr.bf16.gmra.mxu0 %v6663_v44  ;;  %v2332_v52 = vpop.f32.mrf.mxu0  ;;  %v2445_v13 = vpop.f32.mrf.mxu1 }
 0x20e   : > { %3120 = vmatmul.mubr.bf16.gmra.mxu1 %v6665_v61  ;;  %3016 = vmatprep.mubr.bf16.mxu0 %v6676_v60  ;;  %v6971_v42 = vadd.f32 %v2445_v13, %v2332_v52 }
 0x20f   : > { %3129 = vmatprep.mubr.bf16.mxu1 %v6678_v11  ;;  %3234 = vrot.lane.b32.xlu1 %v6963_v57, %s6044_s7  ;;  %v2334_v18 = vpop.f32.mrf.mxu0  ;;  %v2447_v25 = vpop.f32.mrf.mxu1 }
 0x210   : > { %3236 = vrot.lane.b32.xlu0 %v6961_v19, %s6044_s7  ;;  %v6983_v50 = vadd.f32 %v2447_v25, %v2334_v18 }
 0x211   : > { %v2336_v44 = vpop.f32.mrf.mxu0  ;;  %v2449_v59 = vpop.f32.mrf.mxu1 }
 0x212   : > { %v6995_v37 = vadd.f32 %v2449_v59, %v2336_v44 }
 0x213   : > { %3394 = vrot.lane.b32.xlu1 %v6975_v36, %s6044_s7  ;;  %v2340_v61 = vpop.f32.mrf.mxu0  ;;  %v2453_v60 = vpop.f32.mrf.mxu1 }
 0x214   : > { %3396 = vrot.lane.b32.xlu0 %v6971_v42, %s6044_s7  ;;  %v6981_v11 = vadd.f32 %v2453_v60, %v2340_v61 }
 0x215   : > { %3017 = vmatmul.mubr.bf16.gmra.mxu0 %v6713_v47  ;;  %v2342_v27 = vpop.f32.mrf.mxu0  ;;  %v2455_v14 = vpop.f32.mrf.mxu1 }
 0x216   : > { %3130 = vmatmul.mubr.bf16.gmra.mxu1 %v6715_v38  ;;  %3026 = vmatprep.mubr.bf16.mxu0 %v6728_v26  ;;  %v6991_v46 = vadd.f32 %v2455_v14, %v2342_v27 }
 0x217   : > { %3139 = vmatprep.mubr.bf16.mxu1 %v6730_v29  ;;  %3238 = vrot.lane.b32.xlu1 %v6983_v50, %s6044_s7  ;;  %v2344_v51 = vpop.f32.mrf.mxu0  ;;  %v2457_v31 = vpop.f32.mrf.mxu1 }
 0x218   : > { %3240 = vrot.lane.b32.xlu0 %v6981_v11, %s6044_s7  ;;  %v7003_v34 = vadd.f32 %v2457_v31, %v2344_v51 }
 0x219   : > { %v2346_v47 = vpop.f32.mrf.mxu0  ;;  %v2459_v62 = vpop.f32.mrf.mxu1 }
 0x21a   : > { %v7015_v10 = vadd.f32 %v2459_v62, %v2346_v47 }
 0x21b   : > { %3398 = vrot.lane.b32.xlu1 %v6995_v37, %s6044_s7  ;;  %v2350_v38 = vpop.f32.mrf.mxu0  ;;  %v2463_v26 = vpop.f32.mrf.mxu1 }
 0x21c   : > { %3400 = vrot.lane.b32.xlu0 %v6991_v46, %s6044_s7  ;;  %v7001_v29 = vadd.f32 %v2463_v26, %v2350_v38 }
 0x21d   : > { %3027 = vmatmul.mubr.bf16.gmra.mxu0 %v6763_v16  ;;  %v2352_v48 = vpop.f32.mrf.mxu0  ;;  %v2465_v45 = vpop.f32.mrf.mxu1 }
 0x21e   : > { %3140 = vmatmul.mubr.bf16.gmra.mxu1 %v6765_v0  ;;  %3036 = vmatprep.mubr.bf16.mxu0 %v6778_v33  ;;  %v7011_v8 = vadd.f32 %v2465_v45, %v2352_v48 }
 0x21f   : > { %3149 = vmatprep.mubr.bf16.mxu1 %v6780_v28  ;;  %3242 = vrot.lane.b32.xlu1 %v7003_v34, %s6044_s7  ;;  %v2354_v43 = vpop.f32.mrf.mxu0  ;;  %v2467_v3 = vpop.f32.mrf.mxu1 }
 0x220   : > { %3244 = vrot.lane.b32.xlu0 %v7001_v29, %s6044_s7  ;;  %v7023_v7 = vadd.f32 %v2467_v3, %v2354_v43 }
 0x221   : > { %v2356_v16 = vpop.f32.mrf.mxu0  ;;  %v2469_v58 = vpop.f32.mrf.mxu1 }
 0x222   : > { %v7035_v22 = vadd.f32 %v2469_v58, %v2356_v16 }
 0x223   : > { %3402 = vrot.lane.b32.xlu1 %v7015_v10, %s6044_s7  ;;  %v2360_v0 = vpop.f32.mrf.mxu0  ;;  %v2473_v33 = vpop.f32.mrf.mxu1 }
 0x224   : > { %3404 = vrot.lane.b32.xlu0 %v7011_v8, %s6044_s7  ;;  %v7021_v28 = vadd.f32 %v2473_v33, %v2360_v0 }
 0x225   : > { %3037 = vmatmul.mubr.bf16.gmra.mxu0 %v6804_v63  ;;  %v2362_v9 = vpop.f32.mrf.mxu0  ;;  %v2475_v32 = vpop.f32.mrf.mxu1 }
 0x226   : > { %3150 = vmatmul.mubr.bf16.gmra.mxu1 %v6806_v1  ;;  %3046 = vmatprep.mubr.bf16.mxu0 %v6814_v2  ;;  %v7031_v20 = vadd.f32 %v2475_v32, %v2362_v9 }
 0x227   : > { %3159 = vmatprep.mubr.bf16.mxu1 %v6816_v24  ;;  %3246 = vrot.lane.b32.xlu1 %v7023_v7, %s6044_s7  ;;  %v2364_v55 = vpop.f32.mrf.mxu0  ;;  %v2477_v4 = vpop.f32.mrf.mxu1 }
 0x228   : > { %3248 = vrot.lane.b32.xlu0 %v7021_v28, %s6044_s7  ;;  %v7043_v17 = vadd.f32 %v2477_v4, %v2364_v55 }
 0x229   : > { %v2366_v63 = vpop.f32.mrf.mxu0  ;;  %v2479_v12 = vpop.f32.mrf.mxu1 }
 0x22a   : > { %v7055_v25 = vadd.f32 %v2479_v12, %v2366_v63 }
 0x22b   : > { %3406 = vrot.lane.b32.xlu1 %v7035_v22, %s6044_s7  ;;  %v2370_v1 = vpop.f32.mrf.mxu0  ;;  %v2483_v2 = vpop.f32.mrf.mxu1 }
 0x22c   : > { %3408 = vrot.lane.b32.xlu0 %v7031_v20, %s6044_s7  ;;  %v7041_v24 = vadd.f32 %v2483_v2, %v2370_v1 }
 0x22d   : > { %3047 = vmatmul.mubr.bf16.gmra.mxu0 %v6838_v15  ;;  %v2372_v54 = vpop.f32.mrf.mxu0  ;;  %v2485_v23 = vpop.f32.mrf.mxu1 }
 0x22e   : > { %3160 = vmatmul.mubr.bf16.gmra.mxu1 %v6840_v39  ;;  %3056 = vmatprep.mubr.bf16.mxu0 %v6843_v5  ;;  %v7051_v18 = vadd.f32 %v2485_v23, %v2372_v54 }
 0x22f   : > { %3169 = vmatprep.mubr.bf16.mxu1 %v6845_v41  ;;  %3250 = vrot.lane.b32.xlu1 %v7043_v17, %s6044_s7  ;;  %v2374_v52 = vpop.f32.mrf.mxu0  ;;  %v2487_v13 = vpop.f32.mrf.mxu1 }
 0x230   : > { %3252 = vrot.lane.b32.xlu0 %v7041_v24, %s6044_s7  ;;  %v7063_v59 = vadd.f32 %v2487_v13, %v2374_v52 }
 0x231   : > { %v2376_v15 = vpop.f32.mrf.mxu0  ;;  %v2489_v44 = vpop.f32.mrf.mxu1 }
 0x232   : > { %v7073_v31 = vadd.f32 %v2489_v44, %v2376_v15 }
 0x233   : > { %3410 = vrot.lane.b32.xlu1 %v7055_v25, %s6044_s7  ;;  %v2380_v39 = vpop.f32.mrf.mxu0  ;;  %v2493_v5 = vpop.f32.mrf.mxu1 }
 0x234   : > { %3412 = vrot.lane.b32.xlu0 %v7051_v18, %s6044_s7  ;;  %v7061_v41 = vadd.f32 %v2493_v5, %v2380_v39 }
 0x235   : > { %3057 = vmatmul.mubr.bf16.gmra.mxu0 %v6857_v6  ;;  %v2382_v61 = vpop.f32.mrf.mxu0  ;;  %v2495_v60 = vpop.f32.mrf.mxu1 }
 0x236   : > { %3170 = vmatmul.mubr.bf16.gmra.mxu1 %v6859_v21  ;;  %v7069_v51 = vadd.f32 %v2495_v60, %v2382_v61 }
 0x237   : > { %3254 = vrot.lane.b32.xlu1 %v7063_v59, %s6044_s7  ;;  %v2384_v27 = vpop.f32.mrf.mxu0  ;;  %v2497_v14 = vpop.f32.mrf.mxu1 }
 0x238   : > { %3256 = vrot.lane.b32.xlu0 %v7061_v41, %s6044_s7  ;;  %v7079_v38 = vadd.f32 %v2497_v14, %v2384_v27 }
 0x239   : > { %v2386_v47 = vpop.f32.mrf.mxu0  ;;  %v2499_v62 = vpop.f32.mrf.mxu1 }
 0x23a   : > { %v7087_v16 = vadd.f32 %v2499_v62, %v2386_v47 }
 0x23b   : > { %3414 = vrot.lane.b32.xlu1 %v7073_v31, %s6044_s7  ;;  %v2536_v6 = vpop.f32.mrf.mxu0 }
 0x23c   : > { %3416 = vrot.lane.b32.xlu0 %v7069_v51, %s6044_s7  ;;  %v2649_v21 = vpop.f32.mrf.mxu1 }
 0x23d   : > { %v7081_v26 = vadd.f32 %v2649_v21, %v2536_v6  ;;  %v2538_v48 = vpop.f32.mrf.mxu0 }
 0x23e   : > { %v2651_v45 = vpop.f32.mrf.mxu1 }
 0x23f   : > { %3258 = vrot.lane.b32.xlu1 %v7079_v38, %s6044_s7  ;;  %v2540_v43 = vpop.f32.mrf.mxu0  ;;  %v7089_v0 = vadd.f32 %v2651_v45, %v2538_v48 }
 0x240   : > { %3549 = vrot.lane.b32.xlu0 %v7081_v26, %s6044_s7  ;;  %v2653_v3 = vpop.f32.mrf.mxu1 }
 0x241   : > { %v2542_v58 = vpop.f32.mrf.mxu0  ;;  %v7095_v55 = vadd.f32 %v2653_v3, %v2540_v43 }
 0x242   : > { %v2655_v33 = vpop.f32.mrf.mxu1 }
 0x243   : > { %3418 = vrot.lane.b32.xlu1 %v7087_v16, %s6044_s7  ;;  %v2546_v9 = vpop.f32.mrf.mxu0  ;;  %v7103_v54 = vadd.f32 %v2655_v33, %v2542_v58 }
 0x244   : > { %3710 = vrot.lane.b32.xlu0 %v7089_v0, %s6044_s7  ;;  %v2659_v32 = vpop.f32.mrf.mxu1 }
 0x245   : > { %v7097_v4 = vadd.f32 %v2659_v32, %v2546_v9  ;;  %v2548_v63 = vpop.f32.mrf.mxu0 }
 0x246   : > { %v2661_v12 = vpop.f32.mrf.mxu1 }
 0x247   : > { %3551 = vrot.lane.b32.xlu1 %v7095_v55, %s6044_s7  ;;  %v2550_v1 = vpop.f32.mrf.mxu0  ;;  %v7105_v52 = vadd.f32 %v2661_v12, %v2548_v63 }
 0x248   : > { %3553 = vrot.lane.b32.xlu0 %v7097_v4, %s6044_s7  ;;  %v2663_v2 = vpop.f32.mrf.mxu1 }
 0x249   : > { %v2552_v23 = vpop.f32.mrf.mxu0  ;;  %v7111_v39 = vadd.f32 %v2663_v2, %v2550_v1 }
 0x24a   : > { %v2665_v13 = vpop.f32.mrf.mxu1 }
 0x24b   : > { %3712 = vrot.lane.b32.xlu1 %v7103_v54, %s6044_s7  ;;  %v2556_v15 = vpop.f32.mrf.mxu0  ;;  %v7119_v47 = vadd.f32 %v2665_v13, %v2552_v23 }
 0x24c   : > { %3714 = vrot.lane.b32.xlu0 %v7105_v52, %s6044_s7  ;;  %v2669_v44 = vpop.f32.mrf.mxu1 }
 0x24d   : > { %v7113_v5 = vadd.f32 %v2669_v44, %v2556_v15  ;;  %v2558_v61 = vpop.f32.mrf.mxu0  ;;  %7980 = vst [vmem:[#allocation35_spill] sm:$0xff] %v7119_v47 }
 0x24e   : > { %v2671_v60 = vpop.f32.mrf.mxu1 }
 0x24f   : > { %7979 = vst [vmem:[#allocation31_spill] sm:$0xff] %v7113_v5  ;;  %3555 = vrot.lane.b32.xlu1 %v7111_v39, %s6044_s7  ;;  %v2560_v27 = vpop.f32.mrf.mxu0  ;;  %v7121_v6 = vadd.f32 %v2671_v60, %v2558_v61 }
 0x250   : > { %3557 = vrot.lane.b32.xlu0 %v7113_v5, %s6044_s7  ;;  %v2673_v14 = vpop.f32.mrf.mxu1 }
 0x251   : > { %v2562_v62 = vpop.f32.mrf.mxu0  ;;  %7981 = vst [vmem:[#allocation33_spill] sm:$0xff] %v7121_v6  ;;  %v7127_v43 = vadd.f32 %v2673_v14, %v2560_v27 }
 0x252   : > { %v2675_v21 = vpop.f32.mrf.mxu1 }
 0x253   : > { %3716 = vrot.lane.b32.xlu1 %v7119_v47, %s6044_s7  ;;  %v2566_v48 = vpop.f32.mrf.mxu0  ;;  %7982 = vst [vmem:[#allocation32_spill] sm:$0xff] %v7127_v43  ;;  %v7135_v63 = vadd.f32 %v2675_v21, %v2562_v62 }
 0x254   : > { %3718 = vrot.lane.b32.xlu0 %v7121_v6, %s6044_s7  ;;  %v2679_v45 = vpop.f32.mrf.mxu1 }
 0x255   : > { %v7129_v3 = vadd.f32 %v2679_v45, %v2566_v48  ;;  %v2568_v58 = vpop.f32.mrf.mxu0  ;;  %7984 = vst [vmem:[#allocation37_spill] sm:$0xff] %v7135_v63 }
 0x256   : > { %v2681_v33 = vpop.f32.mrf.mxu1 }
 0x257   : > { %7983 = vst [vmem:[#allocation34_spill] sm:$0xff] %v7129_v3  ;;  %3559 = vrot.lane.b32.xlu1 %v7127_v43, %s6044_s7  ;;  %v2570_v9 = vpop.f32.mrf.mxu0  ;;  %v7137_v1 = vadd.f32 %v2681_v33, %v2568_v58 }
 0x258   : > { %3561 = vrot.lane.b32.xlu0 %v7129_v3, %s6044_s7  ;;  %v2683_v32 = vpop.f32.mrf.mxu1 }
 0x259   : > { %v2572_v12 = vpop.f32.mrf.mxu0  ;;  %7985 = vst [vmem:[#allocation38_spill] sm:$0xff] %v7137_v1  ;;  %v7143_v15 = vadd.f32 %v2683_v32, %v2570_v9 }
 0x25a   : > { %v2685_v2 = vpop.f32.mrf.mxu1 }
 0x25b   : > { %3720 = vrot.lane.b32.xlu1 %v7135_v63, %s6044_s7  ;;  %v2576_v23 = vpop.f32.mrf.mxu0  ;;  %7986 = vst [vmem:[#allocation36_spill] sm:$0xff] %v7143_v15  ;;  %v7151_v62 = vadd.f32 %v2685_v2, %v2572_v12 }
 0x25c   : > { %3722 = vrot.lane.b32.xlu0 %v7137_v1, %s6044_s7  ;;  %v2689_v13 = vpop.f32.mrf.mxu1 }
 0x25d   : > { %v7145_v44 = vadd.f32 %v2689_v13, %v2576_v23  ;;  %v2578_v61 = vpop.f32.mrf.mxu0  ;;  %7988 = vst [vmem:[#allocation40_spill] sm:$0xff] %v7151_v62 }
 0x25e   : > { %v2691_v60 = vpop.f32.mrf.mxu1 }
 0x25f   : > { %7987 = vst [vmem:[#allocation39_spill] sm:$0xff] %v7145_v44  ;;  %3563 = vrot.lane.b32.xlu1 %v7143_v15, %s6044_s7  ;;  %v2580_v27 = vpop.f32.mrf.mxu0  ;;  %v7153_v48 = vadd.f32 %v2691_v60, %v2578_v61 }
 0x260   : > { %3565 = vrot.lane.b32.xlu0 %v7145_v44, %s6044_s7  ;;  %v2693_v14 = vpop.f32.mrf.mxu1 }
 0x261   : > { %v2582_v21 = vpop.f32.mrf.mxu0  ;;  %7989 = vst [vmem:[#allocation41_spill] sm:$0xff] %v7153_v48  ;;  %v7159_v9 = vadd.f32 %v2693_v14, %v2580_v27 }
 0x262   : > { %v2695_v45 = vpop.f32.mrf.mxu1 }
 0x263   : > { %3724 = vrot.lane.b32.xlu1 %v7151_v62, %s6044_s7  ;;  %v2586_v58 = vpop.f32.mrf.mxu0  ;;  %7990 = vst [vmem:[#allocation42_spill] sm:$0xff] %v7159_v9  ;;  %v7167_v61 = vadd.f32 %v2695_v45, %v2582_v21 }
 0x264   : > { %3726 = vrot.lane.b32.xlu0 %v7153_v48, %s6044_s7  ;;  %v2699_v33 = vpop.f32.mrf.mxu1 }
 0x265   : > { %v7161_v32 = vadd.f32 %v2699_v33, %v2586_v58  ;;  %v2588_v23 = vpop.f32.mrf.mxu0  ;;  %7992 = vst [vmem:[#allocation44_spill] sm:$0xff] %v7167_v61 }
 0x266   : > { %v2701_v13 = vpop.f32.mrf.mxu1 }
 0x267   : > { %7991 = vst [vmem:[#allocation43_spill] sm:$0xff] %v7161_v32  ;;  %3567 = vrot.lane.b32.xlu1 %v7159_v9, %s6044_s7  ;;  %v2590_v12 = vpop.f32.mrf.mxu0  ;;  %v7169_v48 = vadd.f32 %v2701_v13, %v2588_v23  ;;  %v7187_v9 = vld [vmem:[%s6330_s30] sm:$0xff] }
 0x268   : > { %3569 = vrot.lane.b32.xlu0 %v7161_v32, %s6044_s7  ;;  %v2703_v2 = vpop.f32.mrf.mxu1 }
 0x269   : > { %v2592_v60 = vpop.f32.mrf.mxu0  ;;  %7993 = vst [vmem:[#allocation45_spill] sm:$0xff] %v7169_v48  ;;  %v7175_v33 = vadd.f32 %v2703_v2, %v2590_v12 }
 0x26a   : > { %v2705_v27 = vpop.f32.mrf.mxu1 }
 0x26b   : > { %3728 = vrot.lane.b32.xlu1 %v7167_v61, %s6044_s7  ;;  %v2596_v14 = vpop.f32.mrf.mxu0  ;;  %7994 = vst [vmem:[#allocation46_spill] sm:$0xff] %v7175_v33  ;;  %v7184_v61 = vld [vmem:[%s6337_s14] sm:$0xff] }
 0x26c   : > { %3730 = vrot.lane.b32.xlu0 %v7169_v48, %s6044_s7  ;;  %v2709_v58 = vpop.f32.mrf.mxu1  ;;  %v7189_v48 = vadd.f32 %v2705_v27, %v2592_v60  ;;  %v3212_v60 = vmul.f32 %v7187_v9, %v6929_v56 }
 0x26d   : > { %v7177_v21 = vadd.f32 %v2709_v58, %v2596_v14  ;;  %v2598_v45 = vpop.f32.mrf.mxu0  ;;  %v7192_v14 = vld [vmem:[%s6330_s30 + $0x8] sm:$0xff] }
 0x26e   : > { %v2711_v32 = vpop.f32.mrf.mxu1  ;;  %7996 = vst [vmem:[#allocation48_spill] sm:$0xff] %v7189_v48 }
 0x26f   : > { %7995 = vst [vmem:[#allocation47_spill] sm:$0xff] %v7177_v21  ;;  %3571 = vrot.lane.b32.xlu1 %v7175_v33, %s6044_s7  ;;  %v2600_v23 = vpop.f32.mrf.mxu0  ;;  %v7194_v58 = vadd.f32 %v2711_v32, %v2598_v45  ;;  %v7197_v33 = vld [vmem:[%s6337_s14 + $0x8] sm:$0xff]  ;;  %v3213_v32 = vmul.f32 %v7192_v14, %v6937_v40 }
 0x270   : > { %3573 = vrot.lane.b32.xlu0 %v7177_v21, %s6044_s7  ;;  %v2713_v13 = vpop.f32.mrf.mxu1 }
 0x271   : > { %v3229_v12 = vpop.permute.xlu0 %3228  ;;  %v2602_v2 = vpop.f32.mrf.mxu0  ;;  %7997 = vst [vmem:[#allocation49_spill] sm:$0xff] %v7194_v58  ;;  %v7208_v45 = vadd.f32 %v2713_v13, %v2600_v23 }
 0x272   : > { %v2715_v44 = vpop.f32.mrf.mxu1  ;;  %v3260_v62 = vmul.f32 %v3229_v12, %v7184_v61 }
 0x273   : > { %3732 = vrot.lane.b32.xlu1 %v7189_v48, %s6044_s7  ;;  %v2606_v21 = vpop.f32.mrf.mxu0  ;;  %7998 = vst [vmem:[#allocation50_spill] sm:$0xff] %v7208_v45 }
 0x274   : > { %3734 = vrot.lane.b32.xlu0 %v7194_v58, %s6044_s7  ;;  %v2719_v27 = vpop.f32.mrf.mxu1  ;;  %v3231_v1 = vpop.permute.xlu1 %3230  ;;  %v3276_v6 = vadd.f32 %v3260_v62, %v3212_v60  ;;  %v3372_v62 = vmul.f32 %v7187_v9, %v6939_v35  ;;  %v3373_v60 = vmul.f32 %v7192_v14, %v6945_v49 }
 0x275   : > { %v7210_v15 = vadd.f32 %v2719_v27, %v2606_v21  ;;  %v3261_v12 = vmul.f32 %v3231_v1, %v7197_v33  ;;  %v3389_v48 = vpop.permute.xlu0 %3388  ;;  %v2608_v3 = vpop.f32.mrf.mxu0  ;;  %v7219_v21 = vadd.f32 %v2715_v44, %v2602_v2  ;;  %v7238_v2 = vld [vmem:[%s6330_s30 + $0x10] sm:$0xff] }
 0x276   : > { %v2721_v63 = vpop.f32.mrf.mxu1  ;;  %v3420_v43 = vmul.f32 %v3389_v48, %v7184_v61 }
 0x277   : > { %7999 = vst [vmem:[#allocation51_spill] sm:$0xff] %v7210_v15  ;;  %v3277_v56 = vadd.f32 %v3261_v12, %v3213_v32  ;;  %3575 = vrot.lane.b32.xlu1 %v7208_v45, %s6044_s7  ;;  %v2610_v58 = vpop.f32.mrf.mxu0  ;;  %8000 = vst [vmem:[#allocation52_spill] sm:$0xff] %v7219_v21  ;;  %v7225_v27 = vadd.f32 %v2721_v63, %v2608_v3 }
 0x278   : > { %3577 = vrot.lane.b32.xlu0 %v7210_v15, %s6044_s7  ;;  %v2723_v40 = vpop.f32.mrf.mxu1  ;;  %v7243_v15 = vld [vmem:[%s6330_s30 + $0x18] sm:$0xff] }
 0x279   : > { %v5284_v23 = vpack.c.bf16 %v3277_v56, %v3276_v6  ;;  %v3391_v13 = vpop.permute.xlu1 %3390  ;;  %v2612_v1 = vpop.f32.mrf.mxu0  ;;  %8001 = vst [vmem:[#allocation53_spill] sm:$0xff] %v7225_v27  ;;  %v3436_v6 = vadd.f32 %v3420_v43, %v3372_v62  ;;  %v7235_v3 = vadd.f32 %v2723_v40, %v2610_v58  ;;  %v7246_v43 = vld [vmem:[%s6337_s14 + $0x10] sm:$0xff] }
 0x27a   : > { %v3421_v48 = vmul.f32 %v3391_v13, %v7197_v33  ;;  %v2725_v32 = vpop.f32.mrf.mxu1  ;;  %v3393_v56 = vpop.permute.xlu0 %3392 }
 0x27b   : > { %5285 = vst [vmem:[%s7228_s6] sm:$0xff] %v5284_v23   ;;  %3736 = vrot.lane.b32.xlu1 %v7219_v21, %s6044_s7  ;;  %8002 = vst [vmem:[#allocation54_spill] sm:$0xff] %v7235_v3 }
 0x27c   : > { %v3437_v35 = vadd.f32 %v3421_v48, %v3373_v60  ;;  %3738 = vrot.lane.b32.xlu0 %v7225_v27, %s6044_s7  ;;  %v2762_v49 = vpop.f32.mrf.mxu0  ;;  %v7251_v60 = vld [vmem:[%s6337_s14 + $0x18] sm:$0xff]  ;;  %v7257_v48 = vadd.f32 %v2725_v32, %v2612_v1  ;;  %v3422_v1 = vmul.f32 %v3393_v56, %v7246_v43  ;;  %v3375_v56 = vmul.f32 %v7243_v15, %v6975_v36 }
 0x27d   : > { %v2875_v63 = vpop.f32.mrf.mxu1  ;;  %v3233_v44 = vpop.permute.xlu1 %3232 }
 0x27e   : > { %v5324_v12 = vpack.c.bf16 %v3437_v35, %v3436_v6  ;;  %v7240_v23 = vadd.f32 %v2875_v63, %v2762_v49  ;;  %v2764_v13 = vpop.f32.mrf.mxu0  ;;  %v3262_v58 = vmul.f32 %v3233_v44, %v7246_v43  ;;  %8004 = vst [vmem:[#allocation56_spill] sm:$0xff] %v7257_v48  ;;  %v3214_v49 = vmul.f32 %v7238_v2, %v6957_v53 }
 0x27f   : > { %v2877_v62 = vpop.f32.mrf.mxu1  ;;  %3579 = vrot.lane.b32.xlu1 %v7235_v3, %s6044_s7  ;;  %v3215_v63 = vmul.f32 %v7243_v15, %v6963_v57  ;;  %v3374_v57 = vmul.f32 %v7238_v2, %v6950_v30  ;;  %v7287_v30 = vld [vmem:[%s6330_s30 + $0x28] sm:$0xff] }
 0x280   : > { %8003 = vst [vmem:[#allocation55_spill] sm:$0xff] %v7240_v23  ;;  %5608 = vst [vmem:[%s7228_s6 + $0x40] sm:$0xff] %v5324_v12   ;;  %3871 = vrot.lane.b32.xlu0 %v7240_v23, %s6044_s7  ;;  %v2766_v40 = vpop.f32.mrf.mxu0  ;;  %v7263_v27 = vadd.f32 %v2877_v62, %v2764_v13  ;;  %v3278_v32 = vadd.f32 %v3262_v58, %v3214_v49  ;;  %v7276_v62 = vld [vmem:[%s6337_s14 + $0x20] sm:$0xff] }
 0x281   : > { %v2879_v6 = vpop.f32.mrf.mxu1  ;;  %v3235_v35 = vpop.permute.xlu1 %3234  ;;  %v7281_v58 = vld [vmem:[%s6330_s30 + $0x20] sm:$0xff]  ;;  %v3438_v5 = vadd.f32 %v3422_v1, %v3374_v57 }
 0x282   : > { %8005 = vst [vmem:[#allocation57_spill] sm:$0xff] %v7263_v27  ;;  %v3263_v12 = vmul.f32 %v3235_v35, %v7251_v60  ;;  %v3237_v44 = vpop.permute.xlu0 %3236  ;;  %v2768_v3 = vpop.f32.mrf.mxu0  ;;  %v7273_v13 = vadd.f32 %v2879_v6, %v2766_v40  ;;  %v7292_v6 = vld [vmem:[%s6337_s14 + $0x28] sm:$0xff] }
 0x283   : > { %v2881_v23 = vpop.f32.mrf.mxu1  ;;  %3740 = vrot.lane.b32.xlu1 %v7257_v48, %s6044_s7  ;;  %v3264_v36 = vmul.f32 %v3237_v44, %v7276_v62 }
 0x284   : > { %v3279_v21 = vadd.f32 %v3263_v12, %v3215_v63  ;;  %4031 = vrot.lane.b32.xlu0 %v7263_v27, %s6044_s7  ;;  %v2772_v53 = vpop.f32.mrf.mxu0  ;;  %8006 = vst [vmem:[#allocation58_spill] sm:$0xff] %v7273_v13 }
 0x285   : > { %v2885_v35 = vpop.f32.mrf.mxu1  ;;  %v3395_v48 = vpop.permute.xlu1 %3394 }
 0x286   : > { %v5289_v49 = vpack.c.bf16 %v3279_v21, %v3278_v32  ;;  %v7283_v63 = vadd.f32 %v2885_v35, %v2772_v53  ;;  %v3423_v12 = vmul.f32 %v3395_v48, %v7251_v60  ;;  %v3397_v27 = vpop.permute.xlu0 %3396  ;;  %v2774_v45 = vpop.f32.mrf.mxu0  ;;  %v3216_v48 = vmul.f32 %v7281_v58, %v6961_v19 }
 0x287   : > { %v2887_v40 = vpop.f32.mrf.mxu1  ;;  %3873 = vrot.lane.b32.xlu1 %v7273_v13, %s6044_s7  ;;  %v7300_v32 = vadd.f32 %v2881_v23, %v2768_v3  ;;  %v3217_v13 = vmul.f32 %v7287_v30, %v6983_v50  ;;  %v3424_v3 = vmul.f32 %v3397_v27, %v7276_v62  ;;  %v3377_v27 = vmul.f32 %v7287_v30, %v6995_v37 }
 0x288   : > { %8007 = vst [vmem:[#allocation59_spill] sm:$0xff] %v7283_v63  ;;  %5601 = vst [vmem:[%s7228_s6 + $0x8] sm:$0xff] %v5289_v49   ;;  %v3439_v47 = vadd.f32 %v3423_v12, %v3375_v56  ;;  %3875 = vrot.lane.b32.xlu0 %v7283_v63, %s6044_s7  ;;  %v2776_v21 = vpop.f32.mrf.mxu0  ;;  %v7304_v57 = vadd.f32 %v2887_v40, %v2774_v45  ;;  %v3280_v19 = vadd.f32 %v3264_v36, %v3216_v48  ;;  %v7318_v45 = vld [vmem:[%s6337_s14 + $0x30] sm:$0xff] }
 0x289   : > { %8008 = vst [vmem:[#allocation60_spill] sm:$0xff] %v7300_v32  ;;  %v2889_v53 = vpop.f32.mrf.mxu1  ;;  %v3239_v35 = vpop.permute.xlu1 %3238  ;;  %v7323_v48 = vld [vmem:[%s6330_s30 + $0x30] sm:$0xff] }
 0x28a   : > { %v5329_v1 = vpack.c.bf16 %v3439_v47, %v3438_v5  ;;  %8009 = vst [vmem:[#allocation61_spill] sm:$0xff] %v7304_v57  ;;  %v3265_v44 = vmul.f32 %v3239_v35, %v7292_v6  ;;  %v3241_v56 = vpop.permute.xlu0 %3240  ;;  %v2778_v49 = vpop.f32.mrf.mxu0  ;;  %v3376_v5 = vmul.f32 %v7281_v58, %v6971_v42  ;;  %v7315_v47 = vadd.f32 %v2889_v53, %v2776_v21  ;;  %v7329_v42 = vld [vmem:[%s6330_s30 + $0x38] sm:$0xff] }
 0x28b   : > { %v2891_v12 = vpop.f32.mrf.mxu1  ;;  %4033 = vrot.lane.b32.xlu1 %v7300_v32, %s6044_s7  ;;  %v7334_v53 = vld [vmem:[%s6337_s14 + $0x38] sm:$0xff]  ;;  %v3266_v37 = vmul.f32 %v3241_v56, %v7318_v45 }
 0x28c   : > { %5609 = vst [vmem:[%s7228_s6 + $0x48] sm:$0xff] %v5329_v1   ;;  %v3281_v23 = vadd.f32 %v3265_v44, %v3217_v13  ;;  %4035 = vrot.lane.b32.xlu0 %v7304_v57, %s6044_s7  ;;  %v2782_v50 = vpop.f32.mrf.mxu0  ;;  %8010 = vst [vmem:[#allocation62_spill] sm:$0xff] %v7315_v47  ;;  %v3440_v63 = vadd.f32 %v3424_v3, %v3376_v5 }
 0x28d   : > { %v2895_v40 = vpop.f32.mrf.mxu1  ;;  %v3399_v36 = vpop.permute.xlu1 %3398 }
 0x28e   : > { %v5294_v13 = vpack.c.bf16 %v3281_v23, %v3280_v19  ;;  %v7325_v35 = vadd.f32 %v2895_v40, %v2782_v50  ;;  %v3425_v1 = vmul.f32 %v3399_v36, %v7292_v6  ;;  %v3401_v44 = vpop.permute.xlu0 %3400  ;;  %v2784_v57 = vpop.f32.mrf.mxu0  ;;  %v3218_v23 = vmul.f32 %v7323_v48, %v6981_v11 }
 0x28f   : > { %v2897_v21 = vpop.f32.mrf.mxu1  ;;  %3877 = vrot.lane.b32.xlu1 %v7315_v47, %s6044_s7  ;;  %v7342_v50 = vadd.f32 %v2891_v12, %v2778_v49  ;;  %v3219_v47 = vmul.f32 %v7329_v42, %v7003_v34  ;;  %v3426_v49 = vmul.f32 %v3401_v44, %v7318_v45  ;;  %v3379_v44 = vmul.f32 %v7329_v42, %v7015_v10 }
 0x290   : > { %8011 = vst [vmem:[#allocation63_spill] sm:$0xff] %v7325_v35  ;;  %5602 = vst [vmem:[%s7228_s6 + $0x10] sm:$0xff] %v5294_v13   ;;  %v3441_v32 = vadd.f32 %v3425_v1, %v3377_v27  ;;  %3879 = vrot.lane.b32.xlu0 %v7325_v35, %s6044_s7  ;;  %v2786_v19 = vpop.f32.mrf.mxu0  ;;  %v7346_v5 = vadd.f32 %v2897_v21, %v2784_v57  ;;  %v3282_v11 = vadd.f32 %v3266_v37, %v3218_v23  ;;  %v7360_v57 = vld [vmem:[%s6337_s14 + $0x40] sm:$0xff] }
 0x291   : > { %8012 = vst [vmem:[#allocation64_spill] sm:$0xff] %v7342_v50  ;;  %v2899_v40 = vpop.f32.mrf.mxu1  ;;  %v3243_v36 = vpop.permute.xlu1 %3242  ;;  %v7365_v23 = vld [vmem:[%s6330_s30 + $0x40] sm:$0xff] }
 0x292   : > { %v5334_v3 = vpack.c.bf16 %v3441_v32, %v3440_v63  ;;  %8013 = vst [vmem:[#allocation65_spill] sm:$0xff] %v7346_v5  ;;  %v3267_v56 = vmul.f32 %v3243_v36, %v7334_v53  ;;  %v3245_v27 = vpop.permute.xlu0 %3244  ;;  %v2788_v13 = vpop.f32.mrf.mxu0  ;;  %v3378_v63 = vmul.f32 %v7323_v48, %v6991_v46  ;;  %v7357_v32 = vadd.f32 %v2899_v40, %v2786_v19  ;;  %v7371_v46 = vld [vmem:[%s6330_s30 + $0x48] sm:$0xff] }
 0x293   : > { %v2901_v1 = vpop.f32.mrf.mxu1  ;;  %4037 = vrot.lane.b32.xlu1 %v7342_v50, %s6044_s7  ;;  %v7376_v40 = vld [vmem:[%s6337_s14 + $0x48] sm:$0xff]  ;;  %v3268_v10 = vmul.f32 %v3245_v27, %v7360_v57 }
 0x294   : > { %5610 = vst [vmem:[%s7228_s6 + $0x50] sm:$0xff] %v5334_v3   ;;  %v3283_v12 = vadd.f32 %v3267_v56, %v3219_v47  ;;  %4039 = vrot.lane.b32.xlu0 %v7346_v5, %s6044_s7  ;;  %v2792_v34 = vpop.f32.mrf.mxu0  ;;  %8014 = vst [vmem:[#allocation66_spill] sm:$0xff] %v7357_v32  ;;  %v3442_v35 = vadd.f32 %v3426_v49, %v3378_v63 }
 0x295   : > { %v2905_v21 = vpop.f32.mrf.mxu1  ;;  %v3403_v37 = vpop.permute.xlu1 %3402 }
 0x296   : > { %v5299_v47 = vpack.c.bf16 %v3283_v12, %v3282_v11  ;;  %v7367_v36 = vadd.f32 %v2905_v21, %v2792_v34  ;;  %v3427_v3 = vmul.f32 %v3403_v37, %v7334_v53  ;;  %v3405_v56 = vpop.permute.xlu0 %3404  ;;  %v2794_v5 = vpop.f32.mrf.mxu0  ;;  %v3220_v12 = vmul.f32 %v7365_v23, %v7001_v29 }
 0x297   : > { %v2907_v19 = vpop.f32.mrf.mxu1  ;;  %3881 = vrot.lane.b32.xlu1 %v7357_v32, %s6044_s7  ;;  %v7384_v34 = vadd.f32 %v2901_v1, %v2788_v13  ;;  %v3221_v32 = vmul.f32 %v7371_v46, %v7023_v7  ;;  %v3428_v13 = vmul.f32 %v3405_v56, %v7360_v57  ;;  %v3381_v56 = vmul.f32 %v7371_v46, %v7035_v22 }
 0x298   : > { %8015 = vst [vmem:[#allocation67_spill] sm:$0xff] %v7367_v36  ;;  %5603 = vst [vmem:[%s7228_s6 + $0x18] sm:$0xff] %v5299_v47   ;;  %v3443_v50 = vadd.f32 %v3427_v3, %v3379_v44  ;;  %3883 = vrot.lane.b32.xlu0 %v7367_v36, %s6044_s7  ;;  %v2796_v11 = vpop.f32.mrf.mxu0  ;;  %v7388_v63 = vadd.f32 %v2907_v19, %v2794_v5  ;;  %v3284_v29 = vadd.f32 %v3268_v10, %v3220_v12  ;;  %v7402_v5 = vld [vmem:[%s6337_s14 + $0x50] sm:$0xff] }
 0x299   : > { %8016 = vst [vmem:[#allocation68_spill] sm:$0xff] %v7384_v34  ;;  %v2909_v21 = vpop.f32.mrf.mxu1  ;;  %v3247_v37 = vpop.permute.xlu1 %3246  ;;  %v7407_v12 = vld [vmem:[%s6330_s30 + $0x50] sm:$0xff] }
 0x29a   : > { %v5339_v49 = vpack.c.bf16 %v3443_v50, %v3442_v35  ;;  %8017 = vst [vmem:[#allocation69_spill] sm:$0xff] %v7388_v63  ;;  %v3269_v27 = vmul.f32 %v3247_v37, %v7376_v40  ;;  %v3249_v44 = vpop.permute.xlu0 %3248  ;;  %v2798_v47 = vpop.f32.mrf.mxu0  ;;  %v3380_v35 = vmul.f32 %v7365_v23, %v7011_v8  ;;  %v7399_v50 = vadd.f32 %v2909_v21, %v2796_v11  ;;  %v7413_v8 = vld [vmem:[%s6330_s30 + $0x58] sm:$0xff] }
 0x29b   : > { %v2911_v3 = vpop.f32.mrf.mxu1  ;;  %4041 = vrot.lane.b32.xlu1 %v7384_v34, %s6044_s7  ;;  %v7418_v21 = vld [vmem:[%s6337_s14 + $0x58] sm:$0xff]  ;;  %v3270_v22 = vmul.f32 %v3249_v44, %v7402_v5 }
 0x29c   : > { %5611 = vst [vmem:[%s7228_s6 + $0x58] sm:$0xff] %v5339_v49   ;;  %v3285_v1 = vadd.f32 %v3269_v27, %v3221_v32  ;;  %4043 = vrot.lane.b32.xlu0 %v7388_v63, %s6044_s7  ;;  %v2802_v7 = vpop.f32.mrf.mxu0  ;;  %8018 = vst [vmem:[#allocation70_spill] sm:$0xff] %v7399_v50  ;;  %v3444_v36 = vadd.f32 %v3428_v13, %v3380_v35 }
 0x29d   : > { %v2915_v19 = vpop.f32.mrf.mxu1  ;;  %v3407_v10 = vpop.permute.xlu1 %3406 }
 0x29e   : > { %v5304_v32 = vpack.c.bf16 %v3285_v1, %v3284_v29  ;;  %v7409_v37 = vadd.f32 %v2915_v19, %v2802_v7  ;;  %v3429_v49 = vmul.f32 %v3407_v10, %v7376_v40  ;;  %v3409_v27 = vpop.permute.xlu0 %3408  ;;  %v2804_v63 = vpop.f32.mrf.mxu0  ;;  %v3222_v1 = vmul.f32 %v7407_v12, %v7021_v28 }
 0x29f   : > { %v2917_v11 = vpop.f32.mrf.mxu1  ;;  %3885 = vrot.lane.b32.xlu1 %v7399_v50, %s6044_s7  ;;  %v7426_v7 = vadd.f32 %v2911_v3, %v2798_v47  ;;  %v3223_v50 = vmul.f32 %v7413_v8, %v7043_v17  ;;  %v3430_v47 = vmul.f32 %v3409_v27, %v7402_v5  ;;  %v3383_v27 = vmul.f32 %v7413_v8, %v7055_v25 }
 0x2a0   : > { %8019 = vst [vmem:[#allocation71_spill] sm:$0xff] %v7409_v37  ;;  %5604 = vst [vmem:[%s7228_s6 + $0x20] sm:$0xff] %v5304_v32   ;;  %v3445_v34 = vadd.f32 %v3429_v49, %v3381_v56  ;;  %3887 = vrot.lane.b32.xlu0 %v7409_v37, %s6044_s7  ;;  %v2806_v29 = vpop.f32.mrf.mxu0  ;;  %v7430_v35 = vadd.f32 %v2917_v11, %v2804_v63  ;;  %v3286_v28 = vadd.f32 %v3270_v22, %v3222_v1  ;;  %v7444_v63 = vld [vmem:[%s6337_s14 + $0x60] sm:$0xff] }
 0x2a1   : > { %8020 = vst [vmem:[#allocation72_spill] sm:$0xff] %v7426_v7  ;;  %v2919_v19 = vpop.f32.mrf.mxu1  ;;  %v3251_v10 = vpop.permute.xlu1 %3250  ;;  %v7449_v1 = vld [vmem:[%s6330_s30 + $0x60] sm:$0xff] }
 0x2a2   : > { %v5344_v13 = vpack.c.bf16 %v3445_v34, %v3444_v36  ;;  %8021 = vst [vmem:[#allocation73_spill] sm:$0xff] %v7430_v35  ;;  %v3271_v44 = vmul.f32 %v3251_v10, %v7418_v21  ;;  %v3253_v56 = vpop.permute.xlu0 %3252  ;;  %v2808_v32 = vpop.f32.mrf.mxu0  ;;  %v3382_v36 = vmul.f32 %v7407_v12, %v7031_v20  ;;  %v7441_v34 = vadd.f32 %v2919_v19, %v2806_v29  ;;  %v7455_v20 = vld [vmem:[%s6330_s30 + $0x68] sm:$0xff] }
 0x2a3   : > { %v2921_v49 = vpop.f32.mrf.mxu1  ;;  %4045 = vrot.lane.b32.xlu1 %v7426_v7, %s6044_s7  ;;  %v7460_v19 = vld [vmem:[%s6337_s14 + $0x68] sm:$0xff]  ;;  %v3272_v25 = vmul.f32 %v3253_v56, %v7444_v63 }
 0x2a4   : > { %5612 = vst [vmem:[%s7228_s6 + $0x60] sm:$0xff] %v5344_v13   ;;  %v3287_v3 = vadd.f32 %v3271_v44, %v3223_v50  ;;  %4047 = vrot.lane.b32.xlu0 %v7430_v35, %s6044_s7  ;;  %v2812_v17 = vpop.f32.mrf.mxu0  ;;  %8022 = vst [vmem:[#allocation74_spill] sm:$0xff] %v7441_v34  ;;  %v3446_v37 = vadd.f32 %v3430_v47, %v3382_v36 }
 0x2a5   : > { %v2925_v11 = vpop.f32.mrf.mxu1  ;;  %v3411_v22 = vpop.permute.xlu1 %3410 }
 0x2a6   : > { %v5309_v50 = vpack.c.bf16 %v3287_v3, %v3286_v28  ;;  %v7451_v10 = vadd.f32 %v2925_v11, %v2812_v17  ;;  %v3431_v13 = vmul.f32 %v3411_v22, %v7418_v21  ;;  %v3413_v44 = vpop.permute.xlu0 %3412  ;;  %v2814_v35 = vpop.f32.mrf.mxu0  ;;  %v3224_v3 = vmul.f32 %v7449_v1, %v7041_v24 }
 0x2a7   : > { %v2927_v29 = vpop.f32.mrf.mxu1  ;;  %3889 = vrot.lane.b32.xlu1 %v7441_v34, %s6044_s7  ;;  %v7468_v17 = vadd.f32 %v2921_v49, %v2808_v32  ;;  %v3225_v34 = vmul.f32 %v7455_v20, %v7063_v59  ;;  %v3432_v32 = vmul.f32 %v3413_v44, %v7444_v63  ;;  %v3385_v44 = vmul.f32 %v7455_v20, %v7073_v31 }
 0x2a8   : > { %8023 = vst [vmem:[#allocation75_spill] sm:$0xff] %v7451_v10  ;;  %5605 = vst [vmem:[%s7228_s6 + $0x28] sm:$0xff] %v5309_v50   ;;  %v3447_v7 = vadd.f32 %v3431_v13, %v3383_v27  ;;  %3891 = vrot.lane.b32.xlu0 %v7451_v10, %s6044_s7  ;;  %v2816_v28 = vpop.f32.mrf.mxu0  ;;  %v7472_v36 = vadd.f32 %v2927_v29, %v2814_v35  ;;  %v3288_v24 = vadd.f32 %v3272_v25, %v3224_v3  ;;  %v7486_v35 = vld [vmem:[%s6337_s14 + $0x70] sm:$0xff] }
 0x2a9   : > { %8024 = vst [vmem:[#allocation76_spill] sm:$0xff] %v7468_v17  ;;  %v2929_v11 = vpop.f32.mrf.mxu1  ;;  %v3255_v22 = vpop.permute.xlu1 %3254  ;;  %v7491_v3 = vld [vmem:[%s6330_s30 + $0x70] sm:$0xff] }
 0x2aa   : > { %v5349_v47 = vpack.c.bf16 %v3447_v7, %v3446_v37  ;;  %8025 = vst [vmem:[#allocation77_spill] sm:$0xff] %v7472_v36  ;;  %v3273_v56 = vmul.f32 %v3255_v22, %v7460_v19  ;;  %v3257_v27 = vpop.permute.xlu0 %3256  ;;  %v2818_v50 = vpop.f32.mrf.mxu0  ;;  %v3384_v37 = vmul.f32 %v7449_v1, %v7051_v18  ;;  %v7483_v7 = vadd.f32 %v2929_v11, %v2816_v28  ;;  %v7497_v18 = vld [vmem:[%s6330_s30 + $0x78] sm:$0xff] }
 0x2ab   : > { %v2931_v13 = vpop.f32.mrf.mxu1  ;;  %4049 = vrot.lane.b32.xlu1 %v7468_v17, %s6044_s7  ;;  %v7502_v11 = vld [vmem:[%s6337_s14 + $0x78] sm:$0xff]  ;;  %v3274_v31 = vmul.f32 %v3257_v27, %v7486_v35 }
 0x2ac   : > { %5613 = vst [vmem:[%s7228_s6 + $0x68] sm:$0xff] %v5349_v47   ;;  %v3289_v49 = vadd.f32 %v3273_v56, %v3225_v34  ;;  %4051 = vrot.lane.b32.xlu0 %v7472_v36, %s6044_s7  ;;  %v2822_v59 = vpop.f32.mrf.mxu0  ;;  %8026 = vst [vmem:[#allocation78_spill] sm:$0xff] %v7483_v7  ;;  %v3448_v10 = vadd.f32 %v3432_v32, %v3384_v37 }
 0x2ad   : > { %v2935_v29 = vpop.f32.mrf.mxu1  ;;  %v3415_v25 = vpop.permute.xlu1 %3414 }
 0x2ae   : > { %v5314_v34 = vpack.c.bf16 %v3289_v49, %v3288_v24  ;;  %v7493_v22 = vadd.f32 %v2935_v29, %v2822_v59  ;;  %v3433_v47 = vmul.f32 %v3415_v25, %v7460_v19  ;;  %v3417_v56 = vpop.permute.xlu0 %3416  ;;  %v2824_v36 = vpop.f32.mrf.mxu0  ;;  %v3226_v49 = vmul.f32 %v7491_v3, %v7061_v41 }
 0x2af   : > { %v2937_v28 = vpop.f32.mrf.mxu1  ;;  %3893 = vrot.lane.b32.xlu1 %v7483_v7, %s6044_s7  ;;  %v7510_v59 = vadd.f32 %v2931_v13, %v2818_v50  ;;  %v3227_v7 = vmul.f32 %v7497_v18, %v7079_v38  ;;  %v3434_v41 = vmul.f32 %v3417_v56, %v7486_v35 }
 0x2b0   : > { %8027 = vst [vmem:[#allocation79_spill] sm:$0xff] %v7493_v22  ;;  %5606 = vst [vmem:[%s7228_s6 + $0x30] sm:$0xff] %v5314_v34   ;;  %v3449_v17 = vadd.f32 %v3433_v47, %v3385_v44  ;;  %3895 = vrot.lane.b32.xlu0 %v7493_v22, %s6044_s7  ;;  %v2826_v24 = vpop.f32.mrf.mxu0  ;;  %v7514_v37 = vadd.f32 %v2937_v28, %v2824_v36  ;;  %v3290_v22 = vadd.f32 %v3274_v31, %v3226_v49 }
 0x2b1   : > { %v2939_v29 = vpop.f32.mrf.mxu1  ;;  %v3259_v25 = vpop.permute.xlu1 %3258  ;;  %v3387_v28 = vmul.f32 %v7497_v18, %v7087_v16 }
 0x2b2   : > { %v5354_v32 = vpack.c.bf16 %v3449_v17, %v3448_v10  ;;  %v3275_v27 = vmul.f32 %v3259_v25, %v7502_v11  ;;  %v3550_v44 = vpop.permute.xlu0 %3549  ;;  %v2828_v34 = vpop.f32.mrf.mxu0  ;;  %v3386_v10 = vmul.f32 %v7491_v3, %v7069_v51  ;;  %v7525_v17 = vadd.f32 %v2939_v29, %v2826_v24 }
 0x2b3   : > { %v2941_v47 = vpop.f32.mrf.mxu1  ;;  %4053 = vrot.lane.b32.xlu1 %v7510_v59, %s6044_s7  ;;  %v3581_v51 = vmul.f32 %v3550_v44, %v7184_v61 }
 0x2b4   : > { %5614 = vst [vmem:[%s7228_s6 + $0x70] sm:$0xff] %v5354_v32   ;;  %v3291_v50 = vadd.f32 %v3275_v27, %v3227_v7  ;;  %4055 = vrot.lane.b32.xlu0 %v7514_v37, %s6044_s7  ;;  %v2832_v38 = vpop.f32.mrf.mxu0  ;;  %v3450_v27 = vadd.f32 %v3434_v41, %v3386_v10  ;;  %v7540_v29 = vadd.f32 %v2941_v47, %v2828_v34 }
 0x2b5   : > { %v2945_v36 = vpop.f32.mrf.mxu1  ;;  %v3419_v13 = vpop.permute.xlu1 %3418 }
 0x2b6   : > { %v5319_v31 = vpack.c.bf16 %v3291_v50, %v3290_v22  ;;  %v7529_v49 = vadd.f32 %v2945_v36, %v2832_v38  ;;  %v3435_v7 = vmul.f32 %v3419_v13, %v7502_v11  ;;  %v3711_v56 = vpop.permute.xlu0 %3710  ;;  %v2834_v25 = vpop.f32.mrf.mxu0  ;;  %v3533_v22 = vmul.f32 %v7187_v9, %v7081_v26 }
 0x2b7   : > { %v2947_v32 = vpop.f32.mrf.mxu1  ;;  %3897 = vrot.lane.b32.xlu1 %v7525_v17, %s6044_s7  ;;  %v3534_v36 = vmul.f32 %v7192_v14, %v7095_v55  ;;  %v3742_v26 = vmul.f32 %v3711_v56, %v7184_v61 }
 0x2b8   : > { %5607 = vst [vmem:[%s7228_s6 + $0x38] sm:$0xff] %v5319_v31   ;;  %v3451_v24 = vadd.f32 %v3435_v7, %v3387_v28  ;;  %3899 = vrot.lane.b32.xlu0 %v7529_v49, %s6044_s7  ;;  %v2836_v16 = vpop.f32.mrf.mxu0  ;;  %v7544_v10 = vadd.f32 %v2947_v32, %v2834_v25  ;;  %v3597_v7 = vadd.f32 %v3581_v51, %v3533_v22 }
 0x2b9   : > { %v2949_v50 = vpop.f32.mrf.mxu1  ;;  %v3552_v38 = vpop.permute.xlu1 %3551  ;;  %v3694_v32 = vmul.f32 %v7187_v9, %v7089_v0 }
 0x2ba   : > { %v5359_v41 = vpack.c.bf16 %v3451_v24, %v3450_v27  ;;  %v3582_v44 = vmul.f32 %v3552_v38, %v7197_v33  ;;  %v3554_v13 = vpop.permute.xlu0 %3553  ;;  %v2838_v28 = vpop.f32.mrf.mxu0  ;;  %v7553_v55 = vadd.f32 %v2949_v50, %v2836_v16  ;;  %v3695_v27 = vmul.f32 %v7192_v14, %v7103_v54 }
 0x2bb   : > { %v2951_v31 = vpop.f32.mrf.mxu1  ;;  %4057 = vrot.lane.b32.xlu1 %v7540_v29, %s6044_s7  ;;  %v3758_v56 = vadd.f32 %v3742_v26, %v3694_v32  ;;  %v3583_v16 = vmul.f32 %v3554_v13, %v7246_v43  ;;  %v3535_v14 = vmul.f32 %v7238_v2, %v7097_v4 }
 0x2bc   : > { %5615 = vst [vmem:[%s7228_s6 + $0x78] sm:$0xff] %v5359_v41   ;;  %v3598_v34 = vadd.f32 %v3582_v44, %v3534_v36  ;;  %4059 = vrot.lane.b32.xlu0 %v7544_v10, %s6044_s7  ;;  %v7564_v0 = vadd.f32 %v2951_v31, %v2838_v28 }
 0x2bd   : > { %v2988_v47 = vpop.f32.mrf.mxu0  ;;  %v3713_v25 = vpop.permute.xlu1 %3712  ;;  %v3599_v28 = vadd.f32 %v3583_v16, %v3535_v14 }
 0x2be   : > { %v5364_v24 = vpack.c.bf16 %v3598_v34, %v3597_v7  ;;  %v3101_v51 = vpop.f32.mrf.mxu1  ;;  %v3743_v22 = vmul.f32 %v3713_v25, %v7197_v33  ;;  %v3715_v38 = vpop.permute.xlu0 %3714  ;;  %v3536_v33 = vmul.f32 %v7243_v15, %v7111_v39 }
 0x2bf   : > { %v2990_v61 = vpop.f32.mrf.mxu0  ;;  %3901 = vrot.lane.b32.xlu1 %v7553_v55, %s6044_s7  ;;  %v3102_v34 = vadd.f32 %v3101_v51, %v2988_v47  ;;  %v3744_v31 = vmul.f32 %v3715_v38, %v7246_v43  ;;  %v3696_v47 = vmul.f32 %v7238_v2, %v7105_v52  ;;  %v8028_v51 = vld [vmem:[#allocation35_spill] sm:$0xff] }
 0x2c0   : > { %5616 = vst [vmem:[%s7228_s6 + $0x80] sm:$0xff] %v5364_v24   ;;  %v3759_v50 = vadd.f32 %v3743_v22, %v3695_v27  ;;  %v3103_v36 = vpop.f32.mrf.mxu1 }
 0x2c1   : > { %v2992_v9 = vpop.f32.mrf.mxu0  ;;  %v3556_v54 = vpop.permute.xlu1 %3555  ;;  %v3104_v27 = vadd.f32 %v3103_v36, %v2990_v61  ;;  %v3760_v61 = vadd.f32 %v3744_v31, %v3696_v47 }
 0x2c2   : > { %v5404_v41 = vpack.c.bf16 %v3759_v50, %v3758_v56  ;;  %v3105_v44 = vpop.f32.mrf.mxu1  ;;  %v3584_v7 = vmul.f32 %v3556_v54, %v7251_v60  ;;  %v3558_v26 = vpop.permute.xlu0 %3557  ;;  %v3697_v50 = vmul.f32 %v7243_v15, %v8028_v51 }
 0x2c3   : > { %v3106_v13 = vadd.f32 %v3105_v44, %v2992_v9  ;;  %v2994_v25 = vpop.f32.mrf.mxu0  ;;  %4061 = vrot.lane.b32.xlu1 %v7564_v0, %s6044_s7  ;;  %v3585_v36 = vmul.f32 %v3558_v26, %v7276_v62  ;;  %v8030_v44 = vld [vmem:[#allocation32_spill] sm:$0xff] }
 0x2c4   : > { %5624 = vst [vmem:[%s7228_s6 + $0xc0] sm:$0xff] %v5404_v41   ;;  %v3600_v4 = vadd.f32 %v3584_v7, %v3536_v33  ;;  %v3107_v32 = vpop.f32.mrf.mxu1  ;;  %v8029_v41 = vld [vmem:[#allocation31_spill] sm:$0xff]  ;;  %v3538_v7 = vmul.f32 %v7287_v30, %v8030_v44  ;;  %v8033_v44 = vld [vmem:[#allocation34_spill] sm:$0xff] }
 0x2c5   : > { %v5524_v39 = vpack.c.bf16 %v3106_v13, %v3102_v34  ;;  %v3108_v24 = vadd.f32 %v3107_v32, %v2994_v25  ;;  %v2998_v22 = vpop.f32.mrf.mxu0  ;;  %v3717_v56 = vpop.permute.xlu1 %3716 }
 0x2c6   : > { %v5369_v9 = vpack.c.bf16 %v3600_v4, %v3599_v28  ;;  %v3111_v16 = vpop.f32.mrf.mxu1  ;;  %v3745_v54 = vmul.f32 %v3717_v56, %v7251_v60  ;;  %v3719_v14 = vpop.permute.xlu0 %3718  ;;  %v3537_v60 = vmul.f32 %v7281_v58, %v8029_v41 }
 0x2c7   : > { %5525 = vst [vmem:[%s7581_s21] sm:$0xff] %v5524_v39   ;;  %v5564_v43 = vpack.c.bf16 %v3108_v24, %v3104_v27  ;;  %v3000_v38 = vpop.f32.mrf.mxu0  ;;  %v3112_v31 = vadd.f32 %v3111_v16, %v2998_v22  ;;  %v3746_v27 = vmul.f32 %v3719_v14, %v7276_v62  ;;  %v8032_v22 = vld [vmem:[#allocation37_spill] sm:$0xff] }
 0x2c8   : > { %5617 = vst [vmem:[%s7228_s6 + $0x88] sm:$0xff] %v5369_v9   ;;  %v3761_v52 = vadd.f32 %v3745_v54, %v3697_v50  ;;  %v3113_v2 = vpop.f32.mrf.mxu1  ;;  %v3601_v32 = vadd.f32 %v3585_v36, %v3537_v60  ;;  %v8031_v54 = vld [vmem:[#allocation33_spill] sm:$0xff]  ;;  %v3699_v16 = vmul.f32 %v7287_v30, %v8032_v22  ;;  %v3539_v30 = vmul.f32 %v7323_v48, %v8033_v44 }
 0x2c9   : > { %5654 = vst [vmem:[%s7581_s21 + $0x40] sm:$0xff] %v5564_v43   ;;  %v3002_v15 = vpop.f32.mrf.mxu0  ;;  %v3560_v33 = vpop.permute.xlu1 %3559  ;;  %v3114_v56 = vadd.f32 %v3113_v2, %v3000_v38  ;;  %v3698_v43 = vmul.f32 %v7281_v58, %v8031_v54 }
 0x2ca   : > { %v5409_v34 = vpack.c.bf16 %v3761_v52, %v3760_v61  ;;  %v3115_v13 = vpop.f32.mrf.mxu1  ;;  %v3586_v25 = vmul.f32 %v3560_v33, %v7292_v6  ;;  %v3562_v28 = vpop.permute.xlu0 %3561 }
 0x2cb   : > { %v3116_v4 = vadd.f32 %v3115_v13, %v3002_v15  ;;  %v3004_v26 = vpop.f32.mrf.mxu0  ;;  %v3762_v38 = vadd.f32 %v3746_v27, %v3698_v43  ;;  %v3587_v2 = vmul.f32 %v3562_v28, %v7318_v45  ;;  %v8035_v43 = vld [vmem:[#allocation38_spill] sm:$0xff] }
 0x2cc   : > { %5625 = vst [vmem:[%s7228_s6 + $0xc8] sm:$0xff] %v5409_v34   ;;  %v3602_v39 = vadd.f32 %v3586_v25, %v3538_v7  ;;  %v3117_v24 = vpop.f32.mrf.mxu1  ;;  %v8034_v7 = vld [vmem:[#allocation36_spill] sm:$0xff]  ;;  %v3700_v22 = vmul.f32 %v7323_v48, %v8035_v43 }
 0x2cd   : > { %v5529_v47 = vpack.c.bf16 %v3116_v4, %v3112_v31  ;;  %v3118_v51 = vadd.f32 %v3117_v24, %v3004_v26  ;;  %v3008_v50 = vpop.f32.mrf.mxu0  ;;  %v3721_v9 = vpop.permute.xlu1 %3720 }
 0x2ce   : > { %v5374_v61 = vpack.c.bf16 %v3602_v39, %v3601_v32  ;;  %v3121_v36 = vpop.f32.mrf.mxu1  ;;  %v3747_v52 = vmul.f32 %v3721_v9, %v7292_v6  ;;  %v3723_v62 = vpop.permute.xlu0 %3722  ;;  %v3540_v6 = vmul.f32 %v7329_v42, %v8034_v7  ;;  %v3603_v32 = vadd.f32 %v3587_v2, %v3539_v30 }
 0x2cf   : > { %5647 = vst [vmem:[%s7581_s21 + $0x8] sm:$0xff] %v5529_v47   ;;  %v5569_v14 = vpack.c.bf16 %v3118_v51, %v3114_v56  ;;  %v3010_v15 = vpop.f32.mrf.mxu0  ;;  %v3122_v4 = vadd.f32 %v3121_v36, %v3008_v50  ;;  %v3748_v27 = vmul.f32 %v3723_v62, %v7318_v45  ;;  %v8036_v50 = vld [vmem:[#allocation40_spill] sm:$0xff] }
 0x2d0   : > { %5618 = vst [vmem:[%s7228_s6 + $0x90] sm:$0xff] %v5374_v61   ;;  %v3763_v33 = vadd.f32 %v3747_v52, %v3699_v16  ;;  %v3123_v41 = vpop.f32.mrf.mxu1  ;;  %v3701_v16 = vmul.f32 %v7329_v42, %v8036_v50 }
 0x2d1   : > { %5655 = vst [vmem:[%s7581_s21 + $0x48] sm:$0xff] %v5569_v14   ;;  %v3012_v58 = vpop.f32.mrf.mxu0  ;;  %v3564_v60 = vpop.permute.xlu1 %3563  ;;  %v3124_v56 = vadd.f32 %v3123_v41, %v3010_v15  ;;  %v3764_v15 = vadd.f32 %v3748_v27, %v3700_v22 }
 0x2d2   : > { %v5414_v34 = vpack.c.bf16 %v3763_v33, %v3762_v38  ;;  %v3125_v13 = vpop.f32.mrf.mxu1  ;;  %v3588_v25 = vmul.f32 %v3564_v60, %v7334_v53  ;;  %v3566_v31 = vpop.permute.xlu0 %3565  ;;  %v8038_v60 = vld [vmem:[#allocation42_spill] sm:$0xff] }
 0x2d3   : > { %v3126_v26 = vadd.f32 %v3125_v13, %v3012_v58  ;;  %v3014_v28 = vpop.f32.mrf.mxu0  ;;  %v3589_v38 = vmul.f32 %v3566_v31, %v7360_v57  ;;  %v8037_v58 = vld [vmem:[#allocation39_spill] sm:$0xff] }
 0x2d4   : > { %5626 = vst [vmem:[%s7228_s6 + $0xd0] sm:$0xff] %v5414_v34   ;;  %v3604_v39 = vadd.f32 %v3588_v25, %v3540_v6  ;;  %v3127_v24 = vpop.f32.mrf.mxu1  ;;  %v3541_v42 = vmul.f32 %v7365_v23, %v8037_v58 }
 0x2d5   : > { %v5534_v47 = vpack.c.bf16 %v3126_v26, %v3122_v4  ;;  %v3128_v51 = vadd.f32 %v3127_v24, %v3014_v28  ;;  %v3018_v9 = vpop.f32.mrf.mxu0  ;;  %v3725_v54 = vpop.permute.xlu1 %3724 }
 0x2d6   : > { %v5379_v61 = vpack.c.bf16 %v3604_v39, %v3603_v32  ;;  %v3131_v36 = vpop.f32.mrf.mxu1  ;;  %v3749_v52 = vmul.f32 %v3725_v54, %v7334_v53  ;;  %v3727_v45 = vpop.permute.xlu0 %3726  ;;  %v3542_v53 = vmul.f32 %v7371_v46, %v8038_v60  ;;  %v3605_v31 = vadd.f32 %v3589_v38, %v3541_v42  ;;  %v8042_v38 = vld [vmem:[#allocation46_spill] sm:$0xff] }
 0x2d7   : > { %5648 = vst [vmem:[%s7581_s21 + $0x10] sm:$0xff] %v5534_v47   ;;  %v5574_v62 = vpack.c.bf16 %v3128_v51, %v3124_v56  ;;  %v3020_v14 = vpop.f32.mrf.mxu0  ;;  %v3132_v34 = vadd.f32 %v3131_v36, %v3018_v9  ;;  %v3750_v4 = vmul.f32 %v3727_v45, %v7360_v57  ;;  %v8039_v47 = vld [vmem:[#allocation41_spill] sm:$0xff]  ;;  %v8040_v9 = vld [vmem:[#allocation44_spill] sm:$0xff] }
 0x2d8   : > { %5619 = vst [vmem:[%s7228_s6 + $0x98] sm:$0xff] %v5379_v61   ;;  %v3765_v2 = vadd.f32 %v3749_v52, %v3701_v16  ;;  %v3133_v33 = vpop.f32.mrf.mxu1  ;;  %v3702_v51 = vmul.f32 %v7365_v23, %v8039_v47  ;;  %v3703_v54 = vmul.f32 %v7371_v46, %v8040_v9 }
 0x2d9   : > { %5656 = vst [vmem:[%s7581_s21 + $0x50] sm:$0xff] %v5574_v62   ;;  %v3022_v48 = vpop.f32.mrf.mxu0  ;;  %v3568_v41 = vpop.permute.xlu1 %3567  ;;  %v3134_v32 = vadd.f32 %v3133_v33, %v3020_v14 }
 0x2da   : > { %v5419_v44 = vpack.c.bf16 %v3765_v2, %v3764_v15  ;;  %v3135_v30 = vpop.f32.mrf.mxu1  ;;  %v3590_v7 = vmul.f32 %v3568_v41, %v7376_v40  ;;  %v3570_v6 = vpop.permute.xlu0 %3569  ;;  %v3766_v36 = vadd.f32 %v3750_v4, %v3702_v51  ;;  %v8041_v15 = vld [vmem:[#allocation43_spill] sm:$0xff]  ;;  %v8043_v4 = vld [vmem:[#allocation45_spill] sm:$0xff] }
 0x2db   : > { %v3136_v13 = vadd.f32 %v3135_v30, %v3022_v48  ;;  %v3024_v25 = vpop.f32.mrf.mxu0  ;;  %v3591_v52 = vmul.f32 %v3570_v6, %v7402_v5  ;;  %v3543_v46 = vmul.f32 %v7407_v12, %v8041_v15 }
 0x2dc   : > { %5627 = vst [vmem:[%s7228_s6 + $0xd8] sm:$0xff] %v5419_v44   ;;  %v3606_v26 = vadd.f32 %v3590_v7, %v3542_v53  ;;  %v3137_v28 = vpop.f32.mrf.mxu1 }
 0x2dd   : > { %v5539_v27 = vpack.c.bf16 %v3136_v13, %v3132_v34  ;;  %v3138_v39 = vadd.f32 %v3137_v28, %v3024_v25  ;;  %v3028_v24 = vpop.f32.mrf.mxu0  ;;  %v3729_v56 = vpop.permute.xlu1 %3728  ;;  %v3607_v53 = vadd.f32 %v3591_v52, %v3543_v46  ;;  %v8044_v28 = vld [vmem:[#allocation48_spill] sm:$0xff] }
 0x2de   : > { %v5384_v43 = vpack.c.bf16 %v3606_v26, %v3605_v31  ;;  %v3141_v22 = vpop.f32.mrf.mxu1  ;;  %v3751_v50 = vmul.f32 %v3729_v56, %v7376_v40  ;;  %v3731_v57 = vpop.permute.xlu0 %3730  ;;  %v3544_v40 = vmul.f32 %v7413_v8, %v8042_v38  ;;  %v3704_v26 = vmul.f32 %v7407_v12, %v8043_v4 }
 0x2df   : > { %5649 = vst [vmem:[%s7581_s21 + $0x18] sm:$0xff] %v5539_v27   ;;  %v5579_v16 = vpack.c.bf16 %v3138_v39, %v3134_v32  ;;  %v3030_v61 = vpop.f32.mrf.mxu0  ;;  %v3142_v58 = vadd.f32 %v3141_v22, %v3028_v24  ;;  %v3752_v44 = vmul.f32 %v3731_v57, %v7402_v5  ;;  %v3705_v32 = vmul.f32 %v7413_v8, %v8044_v28  ;;  %v8046_v57 = vld [vmem:[#allocation50_spill] sm:$0xff]  ;;  %v8049_v28 = vld [vmem:[#allocation51_spill] sm:$0xff] }
 0x2e0   : > { %5620 = vst [vmem:[%s7228_s6 + $0xa0] sm:$0xff] %v5384_v43   ;;  %v3767_v45 = vadd.f32 %v3751_v50, %v3703_v54  ;;  %v3143_v62 = vpop.f32.mrf.mxu1  ;;  %v8045_v50 = vld [vmem:[#allocation47_spill] sm:$0xff] }
 0x2e1   : > { %5657 = vst [vmem:[%s7581_s21 + $0x58] sm:$0xff] %v5579_v16   ;;  %v3032_v23 = vpop.f32.mrf.mxu0  ;;  %v3572_v14 = vpop.permute.xlu1 %3571  ;;  %v3144_v6 = vadd.f32 %v3143_v62, %v3030_v61  ;;  %v3768_v51 = vadd.f32 %v3752_v44, %v3704_v26  ;;  %v3545_v8 = vmul.f32 %v7449_v1, %v8045_v50 }
 0x2e2   : > { %v5424_v2 = vpack.c.bf16 %v3767_v45, %v3766_v36  ;;  %v3145_v33 = vpop.f32.mrf.mxu1  ;;  %v3592_v48 = vmul.f32 %v3572_v14, %v7418_v21  ;;  %v3574_v41 = vpop.permute.xlu0 %3573 }
 0x2e3   : > { %v3146_v42 = vadd.f32 %v3145_v33, %v3032_v23  ;;  %v3034_v60 = vpop.f32.mrf.mxu0  ;;  %v3593_v9 = vmul.f32 %v3574_v41, %v7444_v63 }
 0x2e4   : > { %5628 = vst [vmem:[%s7228_s6 + $0xe0] sm:$0xff] %v5424_v2   ;;  %v3608_v30 = vadd.f32 %v3592_v48, %v3544_v40  ;;  %v3147_v7 = vpop.f32.mrf.mxu1 }
 0x2e5   : > { %v5544_v34 = vpack.c.bf16 %v3146_v42, %v3142_v58  ;;  %v3148_v13 = vadd.f32 %v3147_v7, %v3034_v60  ;;  %v3038_v25 = vpop.f32.mrf.mxu0  ;;  %v3733_v31 = vpop.permute.xlu1 %3732  ;;  %v3609_v14 = vadd.f32 %v3593_v9, %v3545_v8  ;;  %v8047_v58 = vld [vmem:[#allocation49_spill] sm:$0xff]  ;;  %v8048_v60 = vld [vmem:[#allocation52_spill] sm:$0xff] }
 0x2e6   : > { %v5389_v27 = vpack.c.bf16 %v3608_v30, %v3607_v53  ;;  %v3151_v39 = vpop.f32.mrf.mxu1  ;;  %v3753_v24 = vmul.f32 %v3733_v31, %v7418_v21  ;;  %v3735_v5 = vpop.permute.xlu0 %3734  ;;  %v3546_v21 = vmul.f32 %v7455_v20, %v8046_v57  ;;  %v3706_v42 = vmul.f32 %v7449_v1, %v8047_v58 }
 0x2e7   : > { %5650 = vst [vmem:[%s7581_s21 + $0x20] sm:$0xff] %v5544_v34   ;;  %v5584_v56 = vpack.c.bf16 %v3148_v13, %v3144_v6  ;;  %v3040_v47 = vpop.f32.mrf.mxu0  ;;  %v3152_v45 = vadd.f32 %v3151_v39, %v3038_v25  ;;  %v3754_v15 = vmul.f32 %v3735_v5, %v7444_v63  ;;  %v3707_v53 = vmul.f32 %v7455_v20, %v8048_v60 }
 0x2e8   : > { %5621 = vst [vmem:[%s7228_s6 + $0xa8] sm:$0xff] %v5389_v27   ;;  %v3769_v54 = vadd.f32 %v3753_v24, %v3705_v32  ;;  %v3153_v43 = vpop.f32.mrf.mxu1  ;;  %v3547_v32 = vmul.f32 %v7491_v3, %v8049_v28  ;;  %v8050_v27 = vld [vmem:[#allocation54_spill] sm:$0xff] }
 0x2e9   : > { %5658 = vst [vmem:[%s7581_s21 + $0x60] sm:$0xff] %v5584_v56   ;;  %v3042_v12 = vpop.f32.mrf.mxu0  ;;  %v3576_v22 = vpop.permute.xlu1 %3575  ;;  %v3154_v40 = vadd.f32 %v3153_v43, %v3040_v47  ;;  %v3770_v13 = vadd.f32 %v3754_v15, %v3706_v42  ;;  %v3548_v39 = vmul.f32 %v7497_v18, %v8050_v27 }
 0x2ea   : > { %v5429_v16 = vpack.c.bf16 %v3769_v54, %v3768_v51  ;;  %v3155_v61 = vpop.f32.mrf.mxu1  ;;  %v3594_v36 = vmul.f32 %v3576_v22, %v7460_v19  ;;  %v3578_v52 = vpop.permute.xlu0 %3577 }
 0x2eb   : > { %v3156_v62 = vadd.f32 %v3155_v61, %v3042_v12  ;;  %v3044_v23 = vpop.f32.mrf.mxu0  ;;  %v3595_v25 = vmul.f32 %v3578_v52, %v7486_v35 }
 0x2ec   : > { %5629 = vst [vmem:[%s7228_s6 + $0xe8] sm:$0xff] %v5429_v16   ;;  %v3610_v46 = vadd.f32 %v3594_v36, %v3546_v21  ;;  %v3157_v38 = vpop.f32.mrf.mxu1  ;;  %v8051_v36 = vld [vmem:[#allocation53_spill] sm:$0xff] }
 0x2ed   : > { %v5549_v2 = vpack.c.bf16 %v3156_v62, %v3152_v45  ;;  %v3158_v33 = vadd.f32 %v3157_v38, %v3044_v23  ;;  %v3048_v48 = vpop.f32.mrf.mxu0  ;;  %v3737_v41 = vpop.permute.xlu1 %3736  ;;  %v3611_v43 = vadd.f32 %v3595_v25, %v3547_v32  ;;  %v3708_v52 = vmul.f32 %v7491_v3, %v8051_v36  ;;  %v8052_v45 = vld [vmem:[#allocation56_spill] sm:$0xff] }
 0x2ee   : > { %v5394_v44 = vpack.c.bf16 %v3610_v46, %v3609_v14  ;;  %v3161_v30 = vpop.f32.mrf.mxu1  ;;  %v3755_v7 = vmul.f32 %v3737_v41, %v7460_v19  ;;  %v3739_v63 = vpop.permute.xlu0 %3738  ;;  %v3709_v62 = vmul.f32 %v7497_v18, %v8052_v45  ;;  %v5849_v25 = vld [vmem:[%s6337_s14 + $0x8] sm:$0xff]  ;;  %v5851_v45 = vld [vmem:[%s6330_s30 + $0x10] sm:$0xff] }
 0x2ef   : > { %5651 = vst [vmem:[%s7581_s21 + $0x28] sm:$0xff] %v5549_v2   ;;  %v5589_v6 = vpack.c.bf16 %v3158_v33, %v3154_v40  ;;  %v3050_v34 = vpop.f32.mrf.mxu0  ;;  %v3162_v51 = vadd.f32 %v3161_v30, %v3048_v48  ;;  %v3756_v12 = vmul.f32 %v3739_v63, %v7486_v35  ;;  %v5846_v33 = vld [vmem:[%s6337_s14] sm:$0xff]  ;;  %v8054_v63 = vld [vmem:[#allocation58_spill] sm:$0xff] }
 0x2f0   : > { %5622 = vst [vmem:[%s7228_s6 + $0xb0] sm:$0xff] %v5394_v44   ;;  %v3771_v31 = vadd.f32 %v3755_v7, %v3707_v53  ;;  %v3163_v4 = vpop.f32.mrf.mxu1  ;;  %v5847_v53 = vld [vmem:[%s6330_s30] sm:$0xff]  ;;  %v5848_v7 = vld [vmem:[%s6330_s30 + $0x8] sm:$0xff] }
 0x2f1   : > { %5659 = vst [vmem:[%s7581_s21 + $0x68] sm:$0xff] %v5589_v6   ;;  %v3052_v1 = vpop.f32.mrf.mxu0  ;;  %v3580_v26 = vpop.permute.xlu1 %3579  ;;  %v3164_v8 = vadd.f32 %v3163_v4, %v3050_v34  ;;  %v3772_v2 = vadd.f32 %v3756_v12, %v3708_v52  ;;  %v8053_v44 = vld [vmem:[#allocation55_spill] sm:$0xff]  ;;  %v3856_v6 = vmul.f32 %v5848_v7, %v8054_v63 }
 0x2f2   : > { %v5434_v24 = vpack.c.bf16 %v3771_v31, %v3770_v13  ;;  %v3165_v5 = vpop.f32.mrf.mxu1  ;;  %v3596_v56 = vmul.f32 %v3580_v26, %v7502_v11  ;;  %v3872_v47 = vpop.permute.xlu0 %3871  ;;  %v3855_v30 = vmul.f32 %v5847_v53, %v8053_v44  ;;  %v8060_v44 = vld [vmem:[#allocation64_spill] sm:$0xff] }
 0x2f3   : > { %v3166_v9 = vadd.f32 %v3165_v5, %v3052_v1  ;;  %v3054_v54 = vpop.f32.mrf.mxu0  ;;  %v3903_v48 = vmul.f32 %v5846_v33, %v3872_v47 }
 0x2f4   : > { %5630 = vst [vmem:[%s7228_s6 + $0xf0] sm:$0xff] %v5434_v24   ;;  %v3612_v22 = vadd.f32 %v3596_v56, %v3548_v39  ;;  %v3167_v50 = vpop.f32.mrf.mxu1 }
 0x2f5   : > { %v5554_v57 = vpack.c.bf16 %v3166_v9, %v3162_v51  ;;  %v3168_v21 = vadd.f32 %v3167_v50, %v3054_v54  ;;  %v3058_v16 = vpop.f32.mrf.mxu0  ;;  %v3741_v61 = vpop.permute.xlu1 %3740  ;;  %v3919_v32 = vadd.f32 %v3903_v48, %v3855_v30  ;;  %v8055_v9 = vld [vmem:[#allocation57_spill] sm:$0xff] }
 0x2f6   : > { %v5399_v23 = vpack.c.bf16 %v3612_v22, %v3611_v43  ;;  %v3171_v14 = vpop.f32.mrf.mxu1  ;;  %v3757_v15 = vmul.f32 %v3741_v61, %v7502_v11  ;;  %v4032_v46 = vpop.permute.xlu0 %4031  ;;  %v4015_v54 = vmul.f32 %v5847_v53, %v8055_v9  ;;  %v8056_v43 = vld [vmem:[#allocation60_spill] sm:$0xff] }
 0x2f7   : > { %5652 = vst [vmem:[%s7581_s21 + $0x30] sm:$0xff] %v5554_v57   ;;  %v5594_v38 = vpack.c.bf16 %v3168_v21, %v3164_v8  ;;  %v3060_v40 = vpop.f32.mrf.mxu0  ;;  %v3172_v1 = vadd.f32 %v3171_v14, %v3058_v16  ;;  %v4063_v27 = vmul.f32 %v5846_v33, %v4032_v46  ;;  %v4016_v12 = vmul.f32 %v5848_v7, %v8056_v43  ;;  %v5850_v16 = vld [vmem:[%s6337_s14 + $0x10] sm:$0xff]  ;;  %v5852_v14 = vld [vmem:[%s6330_s30 + $0x18] sm:$0xff] }
 0x2f8   : > { %5623 = vst [vmem:[%s7228_s6 + $0xb8] sm:$0xff] %v5399_v23   ;;  %v3773_v41 = vadd.f32 %v3757_v15, %v3709_v62  ;;  %v3173_v58 = vpop.f32.mrf.mxu1  ;;  %v8057_v62 = vld [vmem:[#allocation59_spill] sm:$0xff]  ;;  %v8058_v15 = vld [vmem:[#allocation62_spill] sm:$0xff]  ;;  %v4018_v30 = vmul.f32 %v5852_v14, %v8060_v44  ;;  %v8067_v44 = vld [vmem:[#allocation69_spill] sm:$0xff] }
 0x2f9   : > { %5660 = vst [vmem:[%s7581_s21 + $0x70] sm:$0xff] %v5594_v38   ;;  %v3062_v42 = vpop.f32.mrf.mxu0  ;;  %v3874_v60 = vpop.permute.xlu1 %3873  ;;  %v3174_v5 = vadd.f32 %v3173_v58, %v3060_v40  ;;  %v4079_v21 = vadd.f32 %v4063_v27, %v4015_v54  ;;  %v3857_v23 = vmul.f32 %v5851_v45, %v8057_v62  ;;  %v3858_v46 = vmul.f32 %v5852_v14, %v8058_v15  ;;  %v5853_v40 = vld [vmem:[%s6337_s14 + $0x18] sm:$0xff]  ;;  %v8065_v14 = vld [vmem:[#allocation67_spill] sm:$0xff] }
 0x2fa   : > { %v5439_v34 = vpack.c.bf16 %v3773_v41, %v3772_v2  ;;  %v3175_v13 = vpop.f32.mrf.mxu1  ;;  %v3904_v31 = vmul.f32 %v5849_v25, %v3874_v60  ;;  %v3876_v4 = vpop.permute.xlu0 %3875  ;;  %v8059_v60 = vld [vmem:[#allocation61_spill] sm:$0xff]  ;;  %v8062_v27 = vld [vmem:[#allocation66_spill] sm:$0xff] }
 0x2fb   : > { %v3176_v26 = vadd.f32 %v3175_v13, %v3062_v42  ;;  %v3064_v28 = vpop.f32.mrf.mxu0  ;;  %v3905_v61 = vmul.f32 %v5850_v16, %v3876_v4  ;;  %v4017_v53 = vmul.f32 %v5851_v45, %v8059_v60  ;;  %v5854_v13 = vld [vmem:[%s6337_s14 + $0x20] sm:$0xff] }
 0x2fc   : > { %5631 = vst [vmem:[%s7228_s6 + $0xf8] sm:$0xff] %v5439_v34   ;;  %v3920_v39 = vadd.f32 %v3904_v31, %v3856_v6  ;;  %v3177_v24 = vpop.f32.mrf.mxu1 }
 0x2fd   : > { %v5559_v56 = vpack.c.bf16 %v3176_v26, %v3172_v1  ;;  %v3178_v47 = vadd.f32 %v3177_v24, %v3064_v28  ;;  %v4034_v51 = vpop.permute.xlu1 %4033  ;;  %v3921_v48 = vadd.f32 %v3905_v61, %v3857_v23  ;;  %v5855_v1 = vld [vmem:[%s6330_s30 + $0x20] sm:$0xff]  ;;  %v5859_v23 = vld [vmem:[%s6330_s30 + $0x30] sm:$0xff] }
 0x2fe   : > { %v5444_v22 = vpack.c.bf16 %v3920_v39, %v3919_v32  ;;  %v4064_v50 = vmul.f32 %v5849_v25, %v4034_v51  ;;  %v4036_v8 = vpop.permute.xlu0 %4035  ;;  %v8061_v26 = vld [vmem:[#allocation63_spill] sm:$0xff]  ;;  %v5856_v32 = vld [vmem:[%s6330_s30 + $0x28] sm:$0xff]  ;;  %v3861_v15 = vmul.f32 %v5859_v23, %v8065_v14 }
 0x2ff   : > { %5653 = vst [vmem:[%s7581_s21 + $0x38] sm:$0xff] %v5559_v56   ;;  %v5599_v57 = vpack.c.bf16 %v3178_v47, %v3174_v5  ;;  %v4065_v41 = vmul.f32 %v5850_v16, %v4036_v8  ;;  %v3859_v28 = vmul.f32 %v5855_v1, %v8061_v26  ;;  %v3860_v39 = vmul.f32 %v5856_v32, %v8062_v27  ;;  %v5857_v5 = vld [vmem:[%s6337_s14 + $0x28] sm:$0xff] }
 0x300   : > { %5445 = vst [vmem:[%s7693_s12] sm:$0xff] %v5444_v22   ;;  %v4080_v36 = vadd.f32 %v4064_v50, %v4016_v12  ;;  %v8063_v12 = vld [vmem:[#allocation65_spill] sm:$0xff]  ;;  %v8064_v50 = vld [vmem:[#allocation68_spill] sm:$0xff] }
 0x301   : > { %5661 = vst [vmem:[%s7581_s21 + $0x78] sm:$0xff] %v5599_v57   ;;  %v3878_v52 = vpop.permute.xlu1 %3877  ;;  %v4081_v34 = vadd.f32 %v4065_v41, %v4017_v53  ;;  %v4019_v22 = vmul.f32 %v5855_v1, %v8063_v12  ;;  %v4020_v8 = vmul.f32 %v5856_v32, %v8064_v50  ;;  %v8069_v32 = vld [vmem:[#allocation71_spill] sm:$0xff]  ;;  %v8071_v50 = vld [vmem:[#allocation73_spill] sm:$0xff] }
 0x302   : > { %v5484_v38 = vpack.c.bf16 %v4080_v36, %v4079_v21  ;;  %v3906_v2 = vmul.f32 %v5853_v40, %v3878_v52  ;;  %v3880_v33 = vpop.permute.xlu0 %3879  ;;  %v5858_v36 = vld [vmem:[%s6337_s14 + $0x30] sm:$0xff] }
 0x303   : > { %v3907_v25 = vmul.f32 %v5854_v13, %v3880_v33  ;;  %v5861_v33 = vld [vmem:[%s6337_s14 + $0x38] sm:$0xff] }
 0x304   : > { %5639 = vst [vmem:[%s7693_s12 + $0x40] sm:$0xff] %v5484_v38   ;;  %v3922_v58 = vadd.f32 %v3906_v2, %v3858_v46  ;;  %v5860_v46 = vld [vmem:[%s6330_s30 + $0x38] sm:$0xff] }
 0x305   : > { %v4038_v42 = vpop.permute.xlu1 %4037  ;;  %v3923_v51 = vadd.f32 %v3907_v25, %v3859_v28  ;;  %v8066_v38 = vld [vmem:[#allocation70_spill] sm:$0xff]  ;;  %v5863_v28 = vld [vmem:[%s6330_s30 + $0x40] sm:$0xff] }
 0x306   : > { %v5449_v7 = vpack.c.bf16 %v3922_v58, %v3921_v48  ;;  %v4066_v63 = vmul.f32 %v5853_v40, %v4038_v42  ;;  %v4040_v6 = vpop.permute.xlu0 %4039  ;;  %v3862_v40 = vmul.f32 %v5860_v46, %v8066_v38  ;;  %v3863_v27 = vmul.f32 %v5863_v28, %v8069_v32  ;;  %v5871_v32 = vld [vmem:[%s6330_s30 + $0x60] sm:$0xff] }
 0x307   : > { %v4067_v9 = vmul.f32 %v5854_v13, %v4040_v6 }
 0x308   : > { %5632 = vst [vmem:[%s7693_s12 + $0x8] sm:$0xff] %v5449_v7   ;;  %v4082_v31 = vadd.f32 %v4066_v63, %v4018_v30  ;;  %v4021_v30 = vmul.f32 %v5859_v23, %v8067_v44  ;;  %v8068_v7 = vld [vmem:[#allocation72_spill] sm:$0xff] }
 0x309   : > { %v3882_v4 = vpop.permute.xlu1 %3881  ;;  %v4083_v61 = vadd.f32 %v4067_v9, %v4019_v22  ;;  %v4022_v63 = vmul.f32 %v5860_v46, %v8068_v7  ;;  %v8073_v46 = vld [vmem:[#allocation75_spill] sm:$0xff]  ;;  %v8075_v7 = vld [vmem:[#allocation77_spill] sm:$0xff] }
 0x30a   : > { %v5489_v24 = vpack.c.bf16 %v4082_v31, %v4081_v34  ;;  %v3908_v56 = vmul.f32 %v5857_v5, %v3882_v4  ;;  %v3884_v47 = vpop.permute.xlu0 %3883  ;;  %v5862_v31 = vld [vmem:[%s6337_s14 + $0x40] sm:$0xff] }
 0x30b   : > { %v3909_v52 = vmul.f32 %v5858_v36, %v3884_v47  ;;  %v5865_v47 = vld [vmem:[%s6337_s14 + $0x48] sm:$0xff] }
 0x30c   : > { %5640 = vst [vmem:[%s7693_s12 + $0x48] sm:$0xff] %v5489_v24   ;;  %v3924_v54 = vadd.f32 %v3908_v56, %v3860_v39  ;;  %v5864_v39 = vld [vmem:[%s6330_s30 + $0x48] sm:$0xff]  ;;  %v8070_v24 = vld [vmem:[#allocation74_spill] sm:$0xff] }
 0x30d   : > { %v4042_v43 = vpop.permute.xlu1 %4041  ;;  %v3925_v58 = vadd.f32 %v3909_v52, %v3861_v15  ;;  %v5867_v15 = vld [vmem:[%s6330_s30 + $0x50] sm:$0xff] }
 0x30e   : > { %v5454_v57 = vpack.c.bf16 %v3924_v54, %v3923_v51  ;;  %v4068_v21 = vmul.f32 %v5857_v5, %v4042_v43  ;;  %v4044_v16 = vpop.permute.xlu0 %4043  ;;  %v3864_v5 = vmul.f32 %v5864_v39, %v8070_v24  ;;  %v3865_v38 = vmul.f32 %v5867_v15, %v8073_v46 }
 0x30f   : > { %v4069_v42 = vmul.f32 %v5858_v36, %v4044_v16  ;;  %v3868_v24 = vmul.f32 %v7455_v20, %v7525_v17 }
 0x310   : > { %5633 = vst [vmem:[%s7693_s12 + $0x10] sm:$0xff] %v5454_v57   ;;  %v4084_v45 = vadd.f32 %v4068_v21, %v4020_v8  ;;  %v4023_v8 = vmul.f32 %v5863_v28, %v8071_v50  ;;  %v8072_v57 = vld [vmem:[#allocation76_spill] sm:$0xff] }
 0x311   : > { %v3886_v62 = vpop.permute.xlu1 %3885  ;;  %v4085_v25 = vadd.f32 %v4069_v42, %v4021_v30  ;;  %v4024_v21 = vmul.f32 %v5864_v39, %v8072_v57 }
 0x312   : > { %v5494_v2 = vpack.c.bf16 %v4084_v45, %v4083_v61  ;;  %v3910_v48 = vmul.f32 %v5861_v33, %v3886_v62  ;;  %v3888_v41 = vpop.permute.xlu0 %3887  ;;  %v5866_v45 = vld [vmem:[%s6337_s14 + $0x50] sm:$0xff] }
 0x313   : > { %v3911_v4 = vmul.f32 %v5862_v31, %v3888_v41  ;;  %v5869_v41 = vld [vmem:[%s6337_s14 + $0x58] sm:$0xff] }
 0x314   : > { %5641 = vst [vmem:[%s7693_s12 + $0x50] sm:$0xff] %v5494_v2   ;;  %v3926_v60 = vadd.f32 %v3910_v48, %v3862_v40  ;;  %v5868_v40 = vld [vmem:[%s6330_s30 + $0x58] sm:$0xff] }
 0x315   : > { %v4046_v53 = vpop.permute.xlu1 %4045  ;;  %v3927_v54 = vadd.f32 %v3911_v4, %v3863_v27  ;;  %v8074_v2 = vld [vmem:[#allocation78_spill] sm:$0xff]  ;;  %v5870_v4 = vld [vmem:[%s6337_s14 + $0x60] sm:$0xff] }
 0x316   : > { %v5459_v6 = vpack.c.bf16 %v3926_v60, %v3925_v58  ;;  %v4070_v34 = vmul.f32 %v5861_v33, %v4046_v53  ;;  %v4048_v13 = vpop.permute.xlu0 %4047  ;;  %v3866_v33 = vmul.f32 %v5868_v40, %v8074_v2  ;;  %v8076_v27 = vld [vmem:[#allocation79_spill] sm:$0xff] }
 0x317   : > { %v4071_v43 = vmul.f32 %v5862_v31, %v4048_v13  ;;  %v3867_v39 = vmul.f32 %v5871_v32, %v8076_v27 }
 0x318   : > { %5634 = vst [vmem:[%s7693_s12 + $0x18] sm:$0xff] %v5459_v6   ;;  %v4086_v1 = vadd.f32 %v4070_v34, %v4022_v63  ;;  %v4025_v63 = vmul.f32 %v5867_v15, %v8075_v7  ;;  %v4026_v6 = vmul.f32 %v5868_v40, %v7510_v59 }
 0x319   : > { %v3890_v26 = vpop.permute.xlu1 %3889  ;;  %v4087_v52 = vadd.f32 %v4071_v43, %v4023_v8  ;;  %v4027_v43 = vmul.f32 %v5871_v32, %v7514_v37  ;;  %v5873_v8 = vld [vmem:[%s6337_s14 + $0x68] sm:$0xff]  ;;  %v3870_v37 = vmul.f32 %v7497_v18, %v7553_v55 }
 0x31a   : > { %v5499_v56 = vpack.c.bf16 %v4086_v1, %v4085_v25  ;;  %v3912_v51 = vmul.f32 %v5865_v47, %v3890_v26  ;;  %v3892_v9 = vpop.permute.xlu0 %3891 }
 0x31b   : > { %v3913_v62 = vmul.f32 %v5866_v45, %v3892_v9 }
 0x31c   : > { %5642 = vst [vmem:[%s7693_s12 + $0x58] sm:$0xff] %v5499_v56   ;;  %v3928_v12 = vadd.f32 %v3912_v51, %v3864_v5 }
 0x31d   : > { %v4050_v22 = vpop.permute.xlu1 %4049  ;;  %v3929_v60 = vadd.f32 %v3913_v62, %v3865_v38 }
 0x31e   : > { %v5464_v16 = vpack.c.bf16 %v3928_v12, %v3927_v54  ;;  %v4072_v61 = vmul.f32 %v5865_v47, %v4050_v22  ;;  %v4052_v36 = vpop.permute.xlu0 %4051  ;;  %v5872_v12 = vld [vmem:[%s6330_s30 + $0x68] sm:$0xff] }
 0x31f   : > { %v4073_v53 = vmul.f32 %v5866_v45, %v4052_v36  ;;  %v4028_v22 = vmul.f32 %v5872_v12, %v7540_v29 }
 0x320   : > { %5635 = vst [vmem:[%s7693_s12 + $0x20] sm:$0xff] %v5464_v16   ;;  %v4088_v23 = vadd.f32 %v4072_v61, %v4024_v21  ;;  %v3869_v61 = vmul.f32 %v7491_v3, %v7529_v49  ;;  %v4030_v49 = vmul.f32 %v7497_v18, %v7564_v0 }
 0x321   : > { %v3894_v14 = vpop.permute.xlu1 %3893  ;;  %v4089_v31 = vadd.f32 %v4073_v53, %v4025_v63 }
 0x322   : > { %v5504_v48 = vpack.c.bf16 %v4088_v23, %v4087_v52  ;;  %v3914_v58 = vmul.f32 %v5869_v41, %v3894_v14  ;;  %v3896_v42 = vpop.permute.xlu0 %3895  ;;  %v4029_v14 = vmul.f32 %v7491_v3, %v7544_v10 }
 0x323   : > { %v3915_v1 = vmul.f32 %v5870_v4, %v3896_v42 }
 0x324   : > { %5643 = vst [vmem:[%s7693_s12 + $0x60] sm:$0xff] %v5504_v48   ;;  %v3930_v44 = vadd.f32 %v3914_v58, %v3866_v33 }
 0x325   : > { %v4054_v30 = vpop.permute.xlu1 %4053  ;;  %v3931_v47 = vadd.f32 %v3915_v1, %v3867_v39 }
 0x326   : > { %v5469_v34 = vpack.c.bf16 %v3930_v44, %v3929_v60  ;;  %v4074_v13 = vmul.f32 %v5869_v41, %v4054_v30  ;;  %v4056_v25 = vpop.permute.xlu0 %4055 }
 0x327   : > { %v4075_v51 = vmul.f32 %v5870_v4, %v4056_v25 }
 0x328   : > { %5636 = vst [vmem:[%s7693_s12 + $0x28] sm:$0xff] %v5469_v34   ;;  %v4090_v26 = vadd.f32 %v4074_v13, %v4026_v6 }
 0x329   : > { %v3898_v28 = vpop.permute.xlu1 %3897  ;;  %v4091_v20 = vadd.f32 %v4075_v51, %v4027_v43 }
 0x32a   : > { %v5509_v59 = vpack.c.bf16 %v4090_v26, %v4089_v31  ;;  %v3916_v5 = vmul.f32 %v3898_v28, %v7460_v19  ;;  %v3900_v56 = vpop.permute.xlu0 %3899 }
 0x32b   : > { %v3917_v17 = vmul.f32 %v3900_v56, %v7486_v35 }
 0x32c   : > { %5644 = vst [vmem:[%s7693_s12 + $0x68] sm:$0xff] %v5509_v59   ;;  %v3932_v9 = vadd.f32 %v3916_v5, %v3868_v24 }
 0x32d   : > { %v4058_v54 = vpop.permute.xlu1 %4057  ;;  %v3933_v52 = vadd.f32 %v3917_v17, %v3869_v61 }
 0x32e   : > { %v5474_v50 = vpack.c.bf16 %v3932_v9, %v3931_v47  ;;  %v4076_v57 = vmul.f32 %v5873_v8, %v4058_v54  ;;  %v4060_v21 = vpop.permute.xlu0 %4059 }
 0x32f   : > { %v4077_v45 = vmul.f32 %v4060_v21, %v7486_v35 }
 0x330   : > { %5637 = vst [vmem:[%s7693_s12 + $0x30] sm:$0xff] %v5474_v50   ;;  %v4092_v19 = vadd.f32 %v4076_v57, %v4028_v22 }
 0x331   : > { %v3902_v16 = vpop.permute.xlu1 %3901  ;;  %v4093_v46 = vadd.f32 %v4077_v45, %v4029_v14 }
 0x332   : > { %v5514_v36 = vpack.c.bf16 %v4092_v19, %v4091_v20  ;;  %v3918_v29 = vmul.f32 %v3902_v16, %v7502_v11 }
 0x334   : > { %5645 = vst [vmem:[%s7693_s12 + $0x70] sm:$0xff] %v5514_v36   ;;  %v3934_v62 = vadd.f32 %v3918_v29, %v3870_v37 }
 0x335   : > { %v4062_v23 = vpop.permute.xlu1 %4061 }
 0x336   : > { %v5479_v15 = vpack.c.bf16 %v3934_v62, %v3933_v52  ;;  %v4078_v55 = vmul.f32 %v4062_v23, %v7502_v11 }
 0x338   : > { %5638 = vst [vmem:[%s7693_s12 + $0x38] sm:$0xff] %v5479_v15   ;;  %v4094_v38 = vadd.f32 %v4078_v55, %v4030_v49 }
 0x33a   : > { %v5519_v40 = vpack.c.bf16 %v4094_v38, %v4093_v46 }
 0x33c   : > { %5646 = vst [vmem:[%s7693_s12 + $0x78] sm:$0xff] %v5519_v40  }
 0x33d   : > { %s7780_s27 = sshll.u32 %s6203_s10, 10  ;;  %s4371_s1 = sshll.u32 %s7228_s6, 4  ;;  %s4372_s1 = int_to_ptr.vmem [resolvable:$true] %s4371_s1 }
 0x33e   : > { %s4360_s28 = scalar_lea.hbm %s7865_s4, %s7780_s27  ;;  %s6045_s20 = smov 1024  }
 0x33f   : > { %p8077_p2 = scmp.ne.s32.totalorder %s7952_s9, 0  ;;  %s6046_s13 = smov 2048  }
 0x340   : > { %s6047_s17 = smov 16   ;;  %s6048_s29 = smov 64  }
 0x341   : > { %5672 = sst [smem:[#allocation15]] (%p8077_p2), %s6045_s20  ;;  %s6049_s10 = smov 4  }
 0x342   : > { %5673 = sst [smem:[#allocation15 + $0x1]] (%p8077_p2), %s6046_s13  ;;  %s6050_s11 = smov 131072  }
 0x343   : > { %5674 = sst [smem:[#allocation15 + $0x2]] (%p8077_p2), %s6047_s17  ;;  %s6051_s24 = smov 0  }
 0x344   : > { %5675 = sst [smem:[#allocation15 + $0x3]] (%p8077_p2), %s6048_s29 }
 0x345   : > { %5676 = sst [smem:[#allocation15 + $0x4]] (%p8077_p2), %s6048_s29 }
 0x346   : > { %5677 = sst [smem:[#allocation15 + $0x5]] (%p8077_p2), %s6049_s10 }
 0x347   : > { %5678 = dma.general (%p8077_p2), %s4372_s1, 4096, %s4360_s28, %s4338_s16, %s6050_s11, [#allocation15], %s6051_s24, 0  }
 0x348   : > { %s4399_s26 = scalar_lea.hbm %s7866_s5, %s7780_s27  ;;  %s4410_s30 = sshll.u32 %s7693_s12, 4  ;;  %s4411_s30 = int_to_ptr.vmem [resolvable:$true] %s4410_s30 }
 0x349   : > { %s6052_s14 = smov 1024   ;;  %s6053_s7 = smov 2048  }
 0x34a   : > { %5679 = sst [smem:[#allocation17]] (%p8077_p2), %s6052_s14  ;;  %s6054_s19 = smov 16  }
 0x34b   : > { %5680 = sst [smem:[#allocation17 + $0x1]] (%p8077_p2), %s6053_s7  ;;  %s6055_s6 = smov 64  }
 0x34c   : > { %5681 = sst [smem:[#allocation17 + $0x2]] (%p8077_p2), %s6054_s19  ;;  %s6056_s16 = smov 4  }
 0x34d   : > { %5682 = sst [smem:[#allocation17 + $0x3]] (%p8077_p2), %s6055_s6  ;;  %s6057_s1 = smov 131072  }
 0x34e   : > { %5683 = sst [smem:[#allocation17 + $0x4]] (%p8077_p2), %s6055_s6  ;;  %s6058_s12 = smov 0  }
 0x34f   : > { %5684 = sst [smem:[#allocation17 + $0x5]] (%p8077_p2), %s6056_s16 }
 0x350   : > { %5685 = dma.general (%p8077_p2), %s4411_s30, 2048, %s4399_s26, %s7777_s18, %s6057_s1, [#allocation17], %s6058_s12, 0  }
 0x351   : > { %s8078_s28 = sld [smem:[#allocation81_spill]]  ;;  %s4449_s13 = sshll.u32 %s7581_s21, 4  ;;  %s4450_s13 = int_to_ptr.vmem [resolvable:$true] %s4449_s13 }
 0x352   : > { %s6059_s17 = smov 1024   ;;  %s6060_s29 = smov 2048  }
 0x353   : > { %5686 = sst [smem:[#allocation19]] (%p8077_p2), %s6059_s17  ;;  %s6061_s10 = smov 16  }
 0x354   : > { %5687 = sst [smem:[#allocation19 + $0x1]] (%p8077_p2), %s6060_s29  ;;  %s6062_s11 = smov 64  }
 0x355   : > { %5688 = sst [smem:[#allocation19 + $0x2]] (%p8077_p2), %s6061_s10  ;;  %s6063_s24 = smov 4  }
 0x356   : > { %5689 = sst [smem:[#allocation19 + $0x3]] (%p8077_p2), %s6062_s11  ;;  %s6065_s21 = smov 0  }
 0x357   : > { %s4438_s20 = scalar_lea.hbm %s8078_s28, %s7780_s27  ;;  %5690 = sst [smem:[#allocation19 + $0x4]] (%p8077_p2), %s6062_s11 }
 0x358   : > { %5691 = sst [smem:[#allocation19 + $0x5]] (%p8077_p2), %s6063_s24  ;;  %s6064_s27 = smov 131072  }
 0x359   : > { %5692 = dma.general (%p8077_p2), %s4450_s13, 2048, %s4438_s20, %s7777_s18, %s6064_s27, [#allocation19], %s6065_s21, 0  }
 0x35a PF: > { %s8079_s8 = sld [smem:[#allocation25_spill]] }
 0x35b   : > { %s8080_s15 = sld [smem:[#allocation30_spill]] }
 0x35c   : > { %s8081_s26 = sld [smem:[#allocation27_spill]] }
 0x360   : > { %s4477_s30 = sand.u32 1, %s8079_s8  }
 0x361   : > { %p8082_p7 = scmp.ne.s32.totalorder %s8080_s15, 0  ;;  %s4478_s14 = scalar_lea.sflag [#allocation4], %s4477_s30 }
 0x362   : > { %p8083_p1 = scmp.ge.s32.totalorder %s8081_s26, 2 }
 0x364   : > { %p5711_p5 = pnand %p8083_p1, %p8082_p7 }
 0x366   : > { %p5712_p10 = pneg %p5711_p5 }
 0x368   : > { %6013 = dma.done.wait (%p5712_p10), %s4478_s14, 4096  }
 0x369   : > { %6015 = vsyncadd (%p5712_p10), %s4478_s14, 4294963200  ;;  %s8084_s7 = sadd.s32 4294967294, %s8081_s26  }
 0x36a   : > { %s4486_s19 = sand.u32 1, %s8084_s7  }
 0x36b   : > { %s4487_s6 = scalar_lea.sflag [#allocation12], %s4486_s19 }
 0x36c   : > { %6017 = dma.done.wait (%p5712_p10), %s4487_s6, 4096  }
 0x36d   : > { %6019 = vsyncadd (%p5712_p10), %s4487_s6, 4294963200  ;;  %s8085_s24 = sld [smem:[#allocation28_spill]]  ;;  %s8088_s21 = smov %s6026_s22 }
 0x36e   : > { %s8086_s9 = sld [smem:[#allocation26_spill]] }
 0x36f   : > { %s8087_s23 = sld [smem:[#allocation29_spill]] }
 0x373   : > { %p27_p9 = scmp.ge.s32.totalorder %s8085_s24, 4  }
 0x374   : > { %s8089_s22 = smov %s8086_s9 }
 0x375   :  { %29 = sbr.rel (!%p27_p9) target bundleno = 13 (0xd), region = 161 }
 0x37a   :  { %4501 = vsyncpa [#allocation3], 1 }
 0x37b   :  { %4503 = vsyncpa [#allocation3 + $0x1], 1 }
 0x37c   :  { %4504 = vsyncpa [#allocation6], 1 }
 0x37d   :  { %4506 = vsyncpa [#allocation6 + $0x1], 1 }
 0x37e   :  { %4507 = vsyncpa [#allocation9], 1 }
 0x37f   :  { %4508 = vsyncpa [#allocation4], 1 }
 0x380   :  { %4510 = vsyncpa [#allocation4 + $0x1], 1 }
 0x381   :  { %4511 = vsyncpa [#allocation12], 1 }
 0x382   :  { %4513 = vsyncpa [#allocation12 + $0x1], 1 }

</bundles_post_ra>
